<compile_context>
chip_gen: v7x
topology: tpu7x:2x2x1
jax: 0.10.0
libtpu: 0.0.40
codegen_flags: <defaults>
</compile_context>

<pallas_src>
import math

import jax
import jax.numpy as jnp
from jax.experimental import pallas as pl
from jax.experimental.pallas import tpu as pltpu

_EPS = 1e-5
_NEG = -1e30          # "-inf" for max-pool padding (inputs are post-ReLU >= 0)
_LANES = 128


def _round_up(x, m):
    return ((x + m - 1) // m) * m


def _full_spec(shape):
    nd = len(shape)
    return pl.BlockSpec(shape, lambda *args, nd=nd: (0,) * nd)


# ----------------------------------------------------------------------------
# Fused whole-network kernel (built from a static "plan" of the architecture).
# ----------------------------------------------------------------------------
def _build_kernel(plan, *, B, L0, CPAD, SEG, PBASE, n_params):

    def kernel(*refs):
        x_ref = refs[0]
        prefs = refs[1:1 + n_params]
        out_ref = refs[1 + n_params]
        buf = refs[2 + n_params]      # (B*SEG, CPAD) f32 padded staging scratch

        pidx = [0]

        def next_refs(n):
            r = prefs[pidx[0]:pidx[0] + n]
            pidx[0] += n
            return r

        # ---- write current activation into per-batch padded segments -------
        def stage(x2, L, pad, fill):
            for b in range(B):
                base = b * SEG + PBASE            # 8-aligned (PBASE, SEG mult 8)
                if pad > 0:
                    fill_rows = jnp.full((pad, CPAD), fill, jnp.float32)
                    buf[base - pad:base, :] = fill_rows
                    buf[base + L:base + L + pad, :] = fill_rows
                buf[base:base + L, :] = x2[b * L:(b + 1) * L, :]

        # ---- read the K stride-1 window taps back as (B*Lf, CPAD) slabs ----
        def gather_taps(L, pad, K):
            Lf = L + 2 * pad - K + 1
            taps = []
            for t in range(K):
                rows = []
                for b in range(B):
                    start = b * SEG + PBASE - pad + t
                    rows.append(buf[start:start + Lf, :])
                taps.append(rows[0] if B == 1 else jnp.concatenate(rows, axis=0))
            return taps, Lf

        # ---- exact stride-s row selection via a tiny 0/1 matmul (per batch) -
        def rowselect(y, Lf, L_out, stride, offset=0):
            o_i = jax.lax.broadcasted_iota(jnp.int32, (L_out, Lf), 0)
            j_i = jax.lax.broadcasted_iota(jnp.int32, (L_out, Lf), 1)
            sel = (j_i == o_i * stride + offset).astype(jnp.float32)
            outs = []
            for b in range(B):
                yb = y[b * Lf:(b + 1) * Lf, :]
                outs.append(jnp.dot(sel, yb, preferred_element_type=jnp.float32))
            return outs[0] if B == 1 else jnp.concatenate(outs, axis=0)

        # ---- fused Conv1d(bias=False) + BatchNorm1d(train) + optional ReLU --
        def conv_bn_act(x2, L, desc):
            K, s, relu = desc["K"], desc["stride"], desc["relu"]
            w_ref, g_ref, b_ref = next_refs(3)
            pad = (K - 1) // 2
            if K == 1 and s == 1:
                patches, Lf = x2, L                    # 1x1 conv: no staging
            else:
                stage(x2, L, pad, 0.0)
                taps, Lf = gather_taps(L, pad, K)
                patches = taps[0] if K == 1 else jnp.concatenate(taps, axis=-1)
            # Single lane/sublane-dense im2col MXU matmul (bf16 in, f32 acc).
            y = jnp.dot(patches.astype(jnp.bfloat16), w_ref[...],
                        preferred_element_type=jnp.float32)
            L_out = (L + 2 * pad - K) // s + 1
            if s != 1:
                y = rowselect(y, Lf, L_out, s)
            # BatchNorm1d training-mode stats over (batch, length) rows,
            # two-pass variance (numerically safe, never negative).
            mean = jnp.mean(y, axis=0, keepdims=True)
            var = jnp.mean((y - mean) ** 2, axis=0, keepdims=True)
            y = (y - mean) * jax.lax.rsqrt(var + _EPS) * g_ref[...] + b_ref[...]
            if relu:
                y = jnp.maximum(y, 0.0)
            return y, L_out

        def maxpool_3_2(x2, L):                        # MaxPool1d(3, 2, pad=1)
            stage(x2, L, 1, _NEG)
            taps, Lf = gather_taps(L, 1, 3)
            y = jnp.maximum(jnp.maximum(taps[0], taps[1]), taps[2])
            L_out = (L + 2 - 3) // 2 + 1
            return rowselect(y, Lf, L_out, 2), L_out

        def avgpool_2_ceil(x2, L):                     # AvgPool1d(2, ceil_mode)
            L_out = (L + 1) // 2
            even = rowselect(x2, L, L_out, 2, offset=0)
            odd = rowselect(x2, L, L_out, 2, offset=1)   # zero row if OOB
            s = even + odd
            if L % 2 == 1:
                # last (partial) window averages a single element
                o = jax.lax.broadcasted_iota(jnp.int32, (L_out, 1), 0)
                inv = jnp.where(o == L_out - 1, 1.0, 0.5).astype(jnp.float32)
                return s * inv, L_out
            return 0.5 * s, L_out

        # ----------------------------- forward ------------------------------
        x2 = x_ref[...]                                # (B*L0, CPAD) f32
        L = L0
        for desc in plan["stem"]:
            x2, L = conv_bn_act(x2, L, desc)
        x2, L = maxpool_3_2(x2, L)

        for group in plan["blocks"]:
            for blk in group:
                ident, Li = x2, L
                for desc in blk["layers"]:
                    x2, L = conv_bn_act(x2, L, desc)
                if blk["res_pool"]:
                    ident, Li = avgpool_2_ceil(ident, Li)
                if blk["res_conv"] is not None:
                    ident, Li = conv_bn_act(ident, Li, blk["res_conv"])
                x2 = jnp.maximum(x2 + ident, 0.0)      # fused residual add+ReLU

        # ConcatPool [global max ; global mean] per batch row, in registers.
        rows = []
        for b in range(B):
            xb = x2[b * L:(b + 1) * L, :]
            mx = jnp.max(xb, axis=0, keepdims=True)
            av = jnp.mean(xb, axis=0, keepdims=True)
            rows.append(jnp.concatenate([mx, av], axis=-1))
        feats = rows[0] if B == 1 else jnp.concatenate(rows, axis=0)  # (B, 2*CPAD)

        # Head: Linear -> BatchNorm1d(train) -> Linear  (tiny: keep f32).
        w1_ref, b1_ref, hg_ref, hb_ref, w2_ref, b2_ref = next_refs(6)
        h = jnp.dot(feats, w1_ref[...], preferred_element_type=jnp.float32)
        h = h + b1_ref[...]
        mean = jnp.mean(h, axis=0, keepdims=True)
        var = jnp.mean((h - mean) ** 2, axis=0, keepdims=True)
        h = (h - mean) * jax.lax.rsqrt(var + _EPS) * hg_ref[...] + hb_ref[...]
        out = jnp.dot(h, w2_ref[...], preferred_element_type=jnp.float32)
        out_ref[...] = out + b2_ref[...]               # (B, OUTPAD) lane-dense

    return kernel


# ----------------------------------------------------------------------------
# Wrapper: one boundary layout transform + one pallas_call for the whole net.
# ----------------------------------------------------------------------------
def make_xresnet1d_forward(plan):
    CPAD = plan["CPAD"]
    OUTPAD = plan["OUTPAD"]
    c_out = plan["c_out"]
    n_params = plan["n_params"]

    pads = [1]                                         # stem maxpool pad
    for d in plan["stem"]:
        pads.append((d["K"] - 1) // 2)
    for group in plan["blocks"]:
        for blk in group:
            for d in blk["layers"]:
                pads.append((d["K"] - 1) // 2)
            if blk["res_conv"] is not None:
                pads.append((blk["res_conv"]["K"] - 1) // 2)
    PBASE = _round_up(max(pads), 8)                    # 8-aligned staging base

    def forward(x_ncl, *flat):
        B, Cin, L0 = x_ncl.shape
        # One-time boundary transform: PyTorch NCL -> lane-dense (B*L, CPAD).
        x = jnp.transpose(x_ncl, (0, 2, 1)).astype(jnp.float32)
        x = jnp.pad(x, ((0, 0), (0, 0), (0, CPAD - Cin)))
        x2 = x.reshape(B * L0, CPAD)

        SEG = _round_up(L0 + 2 * PBASE, 8)
        kernel = _build_kernel(plan, B=B, L0=L0, CPAD=CPAD, SEG=SEG,
                               PBASE=PBASE, n_params=n_params)
        out = pl.pallas_call(
            kernel,
            grid=(1,),
            in_specs=[_full_spec(a.shape) for a in (x2,) + tuple(flat)],
            out_specs=_full_spec((B, OUTPAD)),
            out_shape=jax.ShapeDtypeStruct((B, OUTPAD), jnp.float32),
            scratch_shapes=[pltpu.VMEM((B * SEG, CPAD), jnp.float32)],
            compiler_params=pltpu.CompilerParams(
                dimension_semantics=("arbitrary",)),
        )(x2, *flat)
        return out[:, :c_out]                          # drop lane padding

    return forward


# ----------------------------------------------------------------------------
# Deterministic parameter init (mirrors the torch __init__).
# ----------------------------------------------------------------------------
def _kaiming_conv(key, k, cin, cout):
    std = math.sqrt(2.0 / (cin * k))                   # kaiming_normal_, fan_in
    return (std * jax.random.normal(key, (k, cin, cout))).astype(jnp.float32)


def _kaiming_linear(key, fin, fout):
    std = math.sqrt(2.0 / fin)
    return (std * jax.random.normal(key, (fin, fout))).astype(jnp.float32)


def _conv_params(key, cin, cout, k, stride, zero_bn=False, relu=True):
    return dict(
        w=_kaiming_conv(key, k, cin, cout),
        gamma=jnp.full((1, cout), 0.0 if zero_bn else 1.0, jnp.float32),
        beta=jnp.zeros((1, cout), jnp.float32),
        stride=stride,
        relu=relu,
    )


def _xres_block_params(keys, expansion, in_ch, between_ch, k, stride):
    in_ch = in_ch * expansion
    out_ch = between_ch * expansion
    if expansion == 1:
        layers = [
            _conv_params(next(keys), in_ch, between_ch, k, stride),
            _conv_params(next(keys), between_ch, out_ch, k, 1,
                         zero_bn=True, relu=False),
        ]
    else:
        layers = [
            _conv_params(next(keys), in_ch, between_ch, 1, 1),
            _conv_params(next(keys), between_ch, between_ch, k, stride),
            _conv_params(next(keys), between_ch, out_ch, 1, 1,
                         zero_bn=True, relu=False),
        ]
    res_conv = (_conv_params(next(keys), in_ch, out_ch, 1, 1, relu=False)
                if in_ch != out_ch else None)
    return dict(layers=layers, res_conv=res_conv, res_pool=(stride != 1))


def init_xresnet1d(key, expansion, num_layers, stem_k, block_k, in_ch, c_out,
                   original_f_number=False):
    keys = iter(jax.random.split(key, 1024))
    stem_filters = [in_ch, 32, 32, 64]
    stem = [_conv_params(next(keys), stem_filters[i], stem_filters[i + 1],
                         stem_k, 2 if i == 0 else 1) for i in range(3)]

    if original_f_number:
        block_filters = [64 // expansion] + [64, 128, 256, 512] + \
            [256] * (len(num_layers) - 4)
    else:
        block_filters = [64 // expansion] + [64, 64, 64, 64] + \
            [32] * (len(num_layers) - 4)

    blocks = []
    for i, n_blocks in enumerate(num_layers):
        stride = 1 if i == 0 else 2
        group = []
        for j in range(n_blocks):
            group.append(_xres_block_params(
                keys, expansion,
                block_filters[i] if j == 0 else block_filters[i + 1],
                block_filters[i + 1], block_k,
                stride if j == 0 else 1))
        blocks.append(group)

    head = dict(
        w1=_kaiming_linear(next(keys), block_filters[-1] * expansion * 2, 128),
        b1=jnp.zeros((1, 128), jnp.float32),
        gamma=jnp.ones((1, 128), jnp.float32),
        beta=jnp.zeros((1, 128), jnp.float32),
        w2=_kaiming_linear(next(keys), 128, c_out),
        b2=jnp.zeros((1, c_out), jnp.float32),
    )
    return dict(stem=stem, blocks=blocks, head=head)


# ----------------------------------------------------------------------------
# Pack: lane-pad channels to CPAD, flatten conv weights to im2col form,
# lane-pad the final classifier to OUTPAD (lane-dense output store).
# ----------------------------------------------------------------------------
def pack_xresnet1d(params, in_ch):
    max_ch = in_ch

    def _track(p):
        nonlocal max_ch
        _, cin, cout = p["w"].shape
        max_ch = max(max_ch, int(cin), int(cout))

    for c in params["stem"]:
        _track(c)
    for group in params["blocks"]:
        for blk in group:
            for c in blk["layers"]:
                _track(c)
            if blk["res_conv"] is not None:
                _track(blk["res_conv"])
    CPAD = _round_up(max_ch, _LANES)

    flat = []

    def emit_conv(c):
        K, cin, cout = c["w"].shape
        w = jnp.zeros((K, CPAD, CPAD), jnp.float32)
        w = w.at[:, :cin, :cout].set(c["w"])
        flat.append(w.reshape(K * CPAD, CPAD).astype(jnp.bfloat16))
        flat.append(jnp.zeros((1, CPAD), jnp.float32).at[:, :cout].set(c["gamma"]))
        flat.append(jnp.zeros((1, CPAD), jnp.float32).at[:, :cout].set(c["beta"]))
        return {"K": int(K), "stride": int(c["stride"]), "relu": bool(c["relu"])}

    stem_plan = [emit_conv(c) for c in params["stem"]]
    blocks_plan = []
    for group in params["blocks"]:
        gplan = []
        for blk in group:
            layers = [emit_conv(c) for c in blk["layers"]]
            rconv = (emit_conv(blk["res_conv"])
                     if blk["res_conv"] is not None else None)
            gplan.append({"layers": layers, "res_conv": rconv,
                          "res_pool": bool(blk["res_pool"])})
        blocks_plan.append(gplan)

    hp = params["head"]
    c_last = hp["w1"].shape[0] // 2
    w1 = jnp.zeros((2 * CPAD, hp["w1"].shape[1]), jnp.float32)
    w1 = w1.at[:c_last, :].set(hp["w1"][:c_last, :])             # max part
    w1 = w1.at[CPAD:CPAD + c_last, :].set(hp["w1"][c_last:, :])  # avg part

    c_out = int(hp["w2"].shape[1])
    OUTPAD = _round_up(c_out, _LANES)
    w2 = jnp.zeros((hp["w2"].shape[0], OUTPAD), jnp.float32)
    w2 = w2.at[:, :c_out].set(hp["w2"])
    b2 = jnp.zeros((1, OUTPAD), jnp.float32).at[:, :c_out].set(hp["b2"])

    flat.extend([w1, hp["b1"], hp["gamma"], hp["beta"], w2, b2])

    plan = dict(stem=stem_plan, blocks=blocks_plan, CPAD=int(CPAD),
                OUTPAD=int(OUTPAD), c_out=c_out, n_params=len(flat))
    return plan, flat


# ----------------------------------------------------------------------------
if __name__ == "__main__":
    key = jax.random.PRNGKey(0)
    pkey, xkey = jax.random.split(key)

    B, in_ch, L, c_out = 2, 4, 64, 5
    params = init_xresnet1d(pkey, expansion=1, num_layers=[1, 1],
                            stem_k=5, block_k=3, in_ch=in_ch, c_out=c_out)
    plan, flat = pack_xresnet1d(params, in_ch)

    forward = jax.jit(make_xresnet1d_forward(plan))

    x = jax.random.normal(xkey, (B, in_ch, L), jnp.float32)   # NCL like PyTorch

    out = forward(x, *flat)
    out = jax.block_until_ready(out)

    assert out.shape == (B, c_out)
    assert bool(jnp.all(jnp.isfinite(out)))
    print("KERNEL_OK")
</pallas_src>

<mosaic_0001>
module attributes {stable_mosaic.version = 11 : i64} {
  func.func @kernel(%arg0: i32, %arg1: memref<128x128xf32, #tpu.memory_space<vmem>>, %arg2: memref<640x128xbf16, #tpu.memory_space<vmem>>, %arg3: memref<1x128xf32, #tpu.memory_space<vmem>>, %arg4: memref<1x128xf32, #tpu.memory_space<vmem>>, %arg5: memref<640x128xbf16, #tpu.memory_space<vmem>>, %arg6: memref<1x128xf32, #tpu.memory_space<vmem>>, %arg7: memref<1x128xf32, #tpu.memory_space<vmem>>, %arg8: memref<640x128xbf16, #tpu.memory_space<vmem>>, %arg9: memref<1x128xf32, #tpu.memory_space<vmem>>, %arg10: memref<1x128xf32, #tpu.memory_space<vmem>>, %arg11: memref<384x128xbf16, #tpu.memory_space<vmem>>, %arg12: memref<1x128xf32, #tpu.memory_space<vmem>>, %arg13: memref<1x128xf32, #tpu.memory_space<vmem>>, %arg14: memref<384x128xbf16, #tpu.memory_space<vmem>>, %arg15: memref<1x128xf32, #tpu.memory_space<vmem>>, %arg16: memref<1x128xf32, #tpu.memory_space<vmem>>, %arg17: memref<384x128xbf16, #tpu.memory_space<vmem>>, %arg18: memref<1x128xf32, #tpu.memory_space<vmem>>, %arg19: memref<1x128xf32, #tpu.memory_space<vmem>>, %arg20: memref<384x128xbf16, #tpu.memory_space<vmem>>, %arg21: memref<1x128xf32, #tpu.memory_space<vmem>>, %arg22: memref<1x128xf32, #tpu.memory_space<vmem>>, %arg23: memref<256x128xf32, #tpu.memory_space<vmem>>, %arg24: memref<1x128xf32, #tpu.memory_space<vmem>>, %arg25: memref<1x128xf32, #tpu.memory_space<vmem>>, %arg26: memref<1x128xf32, #tpu.memory_space<vmem>>, %arg27: memref<128x128xf32, #tpu.memory_space<vmem>>, %arg28: memref<1x128xf32, #tpu.memory_space<vmem>>, %arg29: memref<2x128xf32, #tpu.memory_space<vmem>>, %arg30: memref<160x128xf32, #tpu.memory_space<vmem>>) attributes {dimension_semantics = [#tpu.dimension_semantics<arbitrary>], iteration_bounds = array<i64: 1>, scalar_prefetch = 0 : i64, scratch_operands = 1 : i64, tpu.core_type = #tpu.core_type<tc>, window_params = [{pipeline_mode = #tpu.pipeline_mode<synchronous>, transform_indices = @transform_0, window_bounds = array<i64: 128, 128>}, {pipeline_mode = #tpu.pipeline_mode<synchronous>, transform_indices = @transform_1, window_bounds = array<i64: 640, 128>}, {pipeline_mode = #tpu.pipeline_mode<synchronous>, transform_indices = @transform_2, window_bounds = array<i64: 1, 128>}, {pipeline_mode = #tpu.pipeline_mode<synchronous>, transform_indices = @transform_3, window_bounds = array<i64: 1, 128>}, {pipeline_mode = #tpu.pipeline_mode<synchronous>, transform_indices = @transform_4, window_bounds = array<i64: 640, 128>}, {pipeline_mode = #tpu.pipeline_mode<synchronous>, transform_indices = @transform_5, window_bounds = array<i64: 1, 128>}, {pipeline_mode = #tpu.pipeline_mode<synchronous>, transform_indices = @transform_6, window_bounds = array<i64: 1, 128>}, {pipeline_mode = #tpu.pipeline_mode<synchronous>, transform_indices = @transform_7, window_bounds = array<i64: 640, 128>}, {pipeline_mode = #tpu.pipeline_mode<synchronous>, transform_indices = @transform_8, window_bounds = array<i64: 1, 128>}, {pipeline_mode = #tpu.pipeline_mode<synchronous>, transform_indices = @transform_9, window_bounds = array<i64: 1, 128>}, {pipeline_mode = #tpu.pipeline_mode<synchronous>, transform_indices = @transform_10, window_bounds = array<i64: 384, 128>}, {pipeline_mode = #tpu.pipeline_mode<synchronous>, transform_indices = @transform_11, window_bounds = array<i64: 1, 128>}, {pipeline_mode = #tpu.pipeline_mode<synchronous>, transform_indices = @transform_12, window_bounds = array<i64: 1, 128>}, {pipeline_mode = #tpu.pipeline_mode<synchronous>, transform_indices = @transform_13, window_bounds = array<i64: 384, 128>}, {pipeline_mode = #tpu.pipeline_mode<synchronous>, transform_indices = @transform_14, window_bounds = array<i64: 1, 128>}, {pipeline_mode = #tpu.pipeline_mode<synchronous>, transform_indices = @transform_15, window_bounds = array<i64: 1, 128>}, {pipeline_mode = #tpu.pipeline_mode<synchronous>, transform_indices = @transform_16, window_bounds = array<i64: 384, 128>}, {pipeline_mode = #tpu.pipeline_mode<synchronous>, transform_indices = @transform_17, window_bounds = array<i64: 1, 128>}, {pipeline_mode = #tpu.pipeline_mode<synchronous>, transform_indices = @transform_18, window_bounds = array<i64: 1, 128>}, {pipeline_mode = #tpu.pipeline_mode<synchronous>, transform_indices = @transform_19, window_bounds = array<i64: 384, 128>}, {pipeline_mode = #tpu.pipeline_mode<synchronous>, transform_indices = @transform_20, window_bounds = array<i64: 1, 128>}, {pipeline_mode = #tpu.pipeline_mode<synchronous>, transform_indices = @transform_21, window_bounds = array<i64: 1, 128>}, {pipeline_mode = #tpu.pipeline_mode<synchronous>, transform_indices = @transform_22, window_bounds = array<i64: 256, 128>}, {pipeline_mode = #tpu.pipeline_mode<synchronous>, transform_indices = @transform_23, window_bounds = array<i64: 1, 128>}, {pipeline_mode = #tpu.pipeline_mode<synchronous>, transform_indices = @transform_24, window_bounds = array<i64: 1, 128>}, {pipeline_mode = #tpu.pipeline_mode<synchronous>, transform_indices = @transform_25, window_bounds = array<i64: 1, 128>}, {pipeline_mode = #tpu.pipeline_mode<synchronous>, transform_indices = @transform_26, window_bounds = array<i64: 128, 128>}, {pipeline_mode = #tpu.pipeline_mode<synchronous>, transform_indices = @transform_27, window_bounds = array<i64: 1, 128>}, {pipeline_mode = #tpu.pipeline_mode<synchronous>, transform_indices = @transform_28, window_bounds = array<i64: 2, 128>}]} {
    %c0 = arith.constant 0 : index
    %c0_0 = arith.constant 0 : index
    %0 = vector.load %arg1[%c0, %c0_0] : memref<128x128xf32, #tpu.memory_space<vmem>>, vector<128x128xf32>
    %cst = arith.constant 0.000000e+00 : f32
    %1 = vector.broadcast %cst : f32 to vector<2x128xf32>
    %c6 = arith.constant 6 : index
    %c0_1 = arith.constant 0 : index
    %2 = vector.load %arg30[%c6, %c0_1] : memref<160x128xf32, #tpu.memory_space<vmem>>, vector<2x128xf32>
    tpu.vector_store %arg30[%c6, %c0_1], %1 {strides = array<i32>} : memref<160x128xf32, #tpu.memory_space<vmem>>, vector<2x128xf32>,
    %c72 = arith.constant 72 : index
    %c0_2 = arith.constant 0 : index
    %3 = vector.load %arg30[%c72, %c0_2] : memref<160x128xf32, #tpu.memory_space<vmem>>, vector<2x128xf32>
    tpu.vector_store %arg30[%c72, %c0_2], %1 {strides = array<i32>} : memref<160x128xf32, #tpu.memory_space<vmem>>, vector<2x128xf32>,
    %4 = vector.extract_strided_slice %0 {offsets = [0, 0], sizes = [64, 128], strides = [1, 1]} : vector<128x128xf32> to vector<64x128xf32>
    %c8 = arith.constant 8 : index
    %c0_3 = arith.constant 0 : index
    %5 = vector.load %arg30[%c8, %c0_3] : memref<160x128xf32, #tpu.memory_space<vmem>>, vector<64x128xf32>
    tpu.vector_store %arg30[%c8, %c0_3], %4 {strides = array<i32>} : memref<160x128xf32, #tpu.memory_space<vmem>>, vector<64x128xf32>,
    %cst_4 = arith.constant 0.000000e+00 : f32
    %6 = vector.broadcast %cst_4 : f32 to vector<2x128xf32>
    %c86 = arith.constant 86 : index
    %c0_5 = arith.constant 0 : index
    %7 = vector.load %arg30[%c86, %c0_5] : memref<160x128xf32, #tpu.memory_space<vmem>>, vector<2x128xf32>
    tpu.vector_store %arg30[%c86, %c0_5], %6 {strides = array<i32>} : memref<160x128xf32, #tpu.memory_space<vmem>>, vector<2x128xf32>,
    %c152 = arith.constant 152 : index
    %c0_6 = arith.constant 0 : index
    %8 = vector.load %arg30[%c152, %c0_6] : memref<160x128xf32, #tpu.memory_space<vmem>>, vector<2x128xf32>
    tpu.vector_store %arg30[%c152, %c0_6], %6 {strides = array<i32>} : memref<160x128xf32, #tpu.memory_space<vmem>>, vector<2x128xf32>,
    %9 = vector.extract_strided_slice %0 {offsets = [64, 0], sizes = [64, 128], strides = [1, 1]} : vector<128x128xf32> to vector<64x128xf32>
    %c88 = arith.constant 88 : index
    %c0_7 = arith.constant 0 : index
    %10 = vector.load %arg30[%c88, %c0_7] : memref<160x128xf32, #tpu.memory_space<vmem>>, vector<64x128xf32>
    tpu.vector_store %arg30[%c88, %c0_7], %9 {strides = array<i32>} : memref<160x128xf32, #tpu.memory_space<vmem>>, vector<64x128xf32>,
    %c6_8 = arith.constant 6 : index
    %c0_9 = arith.constant 0 : index
    %11 = vector.load %arg30[%c6_8, %c0_9] : memref<160x128xf32, #tpu.memory_space<vmem>>, vector<64x128xf32>
    %c86_10 = arith.constant 86 : index
    %c0_11 = arith.constant 0 : index
    %12 = vector.load %arg30[%c86_10, %c0_11] : memref<160x128xf32, #tpu.memory_space<vmem>>, vector<64x128xf32>
    %13 = tpu.concatenate %11, %12 in 0 : vector<64x128xf32>, vector<64x128xf32> -> vector<128x128xf32>
    %c7 = arith.constant 7 : index
    %c0_12 = arith.constant 0 : index
    %14 = vector.load %arg30[%c7, %c0_12] : memref<160x128xf32, #tpu.memory_space<vmem>>, vector<64x128xf32>
    %c87 = arith.constant 87 : index
    %c0_13 = arith.constant 0 : index
    %15 = vector.load %arg30[%c87, %c0_13] : memref<160x128xf32, #tpu.memory_space<vmem>>, vector<64x128xf32>
    %16 = tpu.concatenate %14, %15 in 0 : vector<64x128xf32>, vector<64x128xf32> -> vector<128x128xf32>
    %c8_14 = arith.constant 8 : index
    %c0_15 = arith.constant 0 : index
    %17 = vector.load %arg30[%c8_14, %c0_15] : memref<160x128xf32, #tpu.memory_space<vmem>>, vector<64x128xf32>
    %c88_16 = arith.constant 88 : index
    %c0_17 = arith.constant 0 : index
    %18 = vector.load %arg30[%c88_16, %c0_17] : memref<160x128xf32, #tpu.memory_space<vmem>>, vector<64x128xf32>
    %19 = tpu.concatenate %17, %18 in 0 : vector<64x128xf32>, vector<64x128xf32> -> vector<128x128xf32>
    %c9 = arith.constant 9 : index
    %c0_18 = arith.constant 0 : index
    %20 = vector.load %arg30[%c9, %c0_18] : memref<160x128xf32, #tpu.memory_space<vmem>>, vector<64x128xf32>
    %c89 = arith.constant 89 : index
    %c0_19 = arith.constant 0 : index
    %21 = vector.load %arg30[%c89, %c0_19] : memref<160x128xf32, #tpu.memory_space<vmem>>, vector<64x128xf32>
    %22 = tpu.concatenate %20, %21 in 0 : vector<64x128xf32>, vector<64x128xf32> -> vector<128x128xf32>
    %c10 = arith.constant 10 : index
    %c0_20 = arith.constant 0 : index
    %23 = vector.load %arg30[%c10, %c0_20] : memref<160x128xf32, #tpu.memory_space<vmem>>, vector<64x128xf32>
    %c90 = arith.constant 90 : index
    %c0_21 = arith.constant 0 : index
    %24 = vector.load %arg30[%c90, %c0_21] : memref<160x128xf32, #tpu.memory_space<vmem>>, vector<64x128xf32>
    %25 = tpu.concatenate %23, %24 in 0 : vector<64x128xf32>, vector<64x128xf32> -> vector<128x128xf32>
    %26 = tpu.concatenate %13, %16, %19, %22, %25 in 1 : vector<128x128xf32>, vector<128x128xf32>, vector<128x128xf32>, vector<128x128xf32>, vector<128x128xf32> -> vector<128x640xf32>
    %27 = arith.truncf %26 : vector<128x640xf32> to vector<128x640xbf16>
    %c0_22 = arith.constant 0 : index
    %c0_23 = arith.constant 0 : index
    %28 = vector.load %arg2[%c0_22, %c0_23] : memref<640x128xbf16, #tpu.memory_space<vmem>>, vector<640x128xbf16>
    %cst_24 = arith.constant dense<0.000000e+00> : vector<128x128xf32>
    %29 = tpu.matmul %27, %28, %cst_24 {dimension_numbers = #tpu.dot_dimension_numbers<[1], [0], [0], [1], [0, 0, 1, 1], [], []>} : vector<128x640xbf16>, vector<640x128xbf16>, vector<128x128xf32> -> vector<128x128xf32>
    %30 = tpu.iota {dimensions = array<i32: 0>} : vector<32x64xi32>
    %31 = tpu.iota {dimensions = array<i32: 1>} : vector<32x64xi32>
    %c2_i32 = arith.constant 2 : i32
    %32 = vector.broadcast %c2_i32 : i32 to vector<32x64xi32>
    %33 = arith.muli %30, %32 : vector<32x64xi32>
    %c0_i32 = arith.constant 0 : i32
    %34 = vector.broadcast %c0_i32 : i32 to vector<32x64xi32>
    %35 = arith.addi %33, %34 : vector<32x64xi32>
    %36 = arith.cmpi eq, %31, %35 : vector<32x64xi32>
    %37 = arith.extui %36 : vector<32x64xi1> to vector<32x64xi32>
    %38 = arith.sitofp %37 : vector<32x64xi32> to vector<32x64xf32>
    %39 = vector.extract_strided_slice %29 {offsets = [0, 0], sizes = [64, 128], strides = [1, 1]} : vector<128x128xf32> to vector<64x128xf32>
    %cst_25 = arith.constant dense<0.000000e+00> : vector<32x128xf32>
    %40 = tpu.matmul %38, %39, %cst_25 {dimension_numbers = #tpu.dot_dimension_numbers<[1], [0], [0], [1], [0, 0, 1, 1], [], []>} : vector<32x64xf32>, vector<64x128xf32>, vector<32x128xf32> -> vector<32x128xf32>
    %41 = vector.extract_strided_slice %29 {offsets = [64, 0], sizes = [64, 128], strides = [1, 1]} : vector<128x128xf32> to vector<64x128xf32>
    %cst_26 = arith.constant dense<0.000000e+00> : vector<32x128xf32>
    %42 = tpu.matmul %38, %41, %cst_26 {dimension_numbers = #tpu.dot_dimension_numbers<[1], [0], [0], [1], [0, 0, 1, 1], [], []>} : vector<32x64xf32>, vector<64x128xf32>, vector<32x128xf32> -> vector<32x128xf32>
    %43 = tpu.concatenate %40, %42 in 0 : vector<32x128xf32>, vector<32x128xf32> -> vector<64x128xf32>
    %cst_27 = arith.constant dense<0.000000e+00> : vector<128xf32>
    %44 = vector.multi_reduction <add>, %43, %cst_27 [0] : vector<64x128xf32> to vector<128xf32>
    %45 = vector.shape_cast %44 : vector<128xf32> to vector<1x128xf32>
    %cst_28 = arith.constant 6.400000e+01 : f32
    %46 = vector.broadcast %cst_28 : f32 to vector<1x128xf32>
    %47 = arith.divf %45, %46 : vector<1x128xf32>
    %48 = vector.broadcast %47 : vector<1x128xf32> to vector<64x128xf32>
    %49 = arith.subf %43, %48 : vector<64x128xf32>
    %50 = arith.mulf %49, %49 : vector<64x128xf32>
    %cst_29 = arith.constant dense<0.000000e+00> : vector<128xf32>
    %51 = vector.multi_reduction <add>, %50, %cst_29 [0] : vector<64x128xf32> to vector<128xf32>
    %52 = vector.shape_cast %51 : vector<128xf32> to vector<1x128xf32>
    %cst_30 = arith.constant 6.400000e+01 : f32
    %53 = vector.broadcast %cst_30 : f32 to vector<1x128xf32>
    %54 = arith.divf %52, %53 : vector<1x128xf32>
    %55 = vector.broadcast %47 : vector<1x128xf32> to vector<64x128xf32>
    %56 = arith.subf %43, %55 : vector<64x128xf32>
    %cst_31 = arith.constant 9.99999974E-6 : f32
    %57 = vector.broadcast %cst_31 : f32 to vector<1x128xf32>
    %58 = arith.addf %54, %57 : vector<1x128xf32>
    %59 = math.rsqrt %58 : vector<1x128xf32>
    %60 = vector.broadcast %59 : vector<1x128xf32> to vector<64x128xf32>
    %61 = arith.mulf %56, %60 : vector<64x128xf32>
    %c0_32 = arith.constant 0 : index
    %c0_33 = arith.constant 0 : index
    %62 = vector.load %arg3[%c0_32, %c0_33] : memref<1x128xf32, #tpu.memory_space<vmem>>, vector<1x128xf32>
    %63 = vector.broadcast %62 : vector<1x128xf32> to vector<64x128xf32>
    %64 = arith.mulf %61, %63 : vector<64x128xf32>
    %c0_34 = arith.constant 0 : index
    %c0_35 = arith.constant 0 : index
    %65 = vector.load %arg4[%c0_34, %c0_35] : memref<1x128xf32, #tpu.memory_space<vmem>>, vector<1x128xf32>
    %66 = vector.broadcast %65 : vector<1x128xf32> to vector<64x128xf32>
    %67 = arith.addf %64, %66 : vector<64x128xf32>
    %cst_36 = arith.constant 0.000000e+00 : f32
    %68 = vector.broadcast %cst_36 : f32 to vector<64x128xf32>
    %69 = arith.maximumf %67, %68 : vector<64x128xf32>
    %cst_37 = arith.constant 0.000000e+00 : f32
    %70 = vector.broadcast %cst_37 : f32 to vector<2x128xf32>
    %c6_38 = arith.constant 6 : index
    %c0_39 = arith.constant 0 : index
    %71 = vector.load %arg30[%c6_38, %c0_39] : memref<160x128xf32, #tpu.memory_space<vmem>>, vector<2x128xf32>
    tpu.vector_store %arg30[%c6_38, %c0_39], %70 {strides = array<i32>} : memref<160x128xf32, #tpu.memory_space<vmem>>, vector<2x128xf32>,
    %c40 = arith.constant 40 : index
    %c0_40 = arith.constant 0 : index
    %72 = vector.load %arg30[%c40, %c0_40] : memref<160x128xf32, #tpu.memory_space<vmem>>, vector<2x128xf32>
    tpu.vector_store %arg30[%c40, %c0_40], %70 {strides = array<i32>} : memref<160x128xf32, #tpu.memory_space<vmem>>, vector<2x128xf32>,
    %73 = vector.extract_strided_slice %69 {offsets = [0, 0], sizes = [32, 128], strides = [1, 1]} : vector<64x128xf32> to vector<32x128xf32>
    %c8_41 = arith.constant 8 : index
    %c0_42 = arith.constant 0 : index
    %74 = vector.load %arg30[%c8_41, %c0_42] : memref<160x128xf32, #tpu.memory_space<vmem>>, vector<32x128xf32>
    tpu.vector_store %arg30[%c8_41, %c0_42], %73 {strides = array<i32>} : memref<160x128xf32, #tpu.memory_space<vmem>>, vector<32x128xf32>,
    %cst_43 = arith.constant 0.000000e+00 : f32
    %75 = vector.broadcast %cst_43 : f32 to vector<2x128xf32>
    %c86_44 = arith.constant 86 : index
    %c0_45 = arith.constant 0 : index
    %76 = vector.load %arg30[%c86_44, %c0_45] : memref<160x128xf32, #tpu.memory_space<vmem>>, vector<2x128xf32>
    tpu.vector_store %arg30[%c86_44, %c0_45], %75 {strides = array<i32>} : memref<160x128xf32, #tpu.memory_space<vmem>>, vector<2x128xf32>,
    %c120 = arith.constant 120 : index
    %c0_46 = arith.constant 0 : index
    %77 = vector.load %arg30[%c120, %c0_46] : memref<160x128xf32, #tpu.memory_space<vmem>>, vector<2x128xf32>
    tpu.vector_store %arg30[%c120, %c0_46], %75 {strides = array<i32>} : memref<160x128xf32, #tpu.memory_space<vmem>>, vector<2x128xf32>,
    %78 = vector.extract_strided_slice %69 {offsets = [32, 0], sizes = [32, 128], strides = [1, 1]} : vector<64x128xf32> to vector<32x128xf32>
    %c88_47 = arith.constant 88 : index
    %c0_48 = arith.constant 0 : index
    %79 = vector.load %arg30[%c88_47, %c0_48] : memref<160x128xf32, #tpu.memory_space<vmem>>, vector<32x128xf32>
    tpu.vector_store %arg30[%c88_47, %c0_48], %78 {strides = array<i32>} : memref<160x128xf32, #tpu.memory_space<vmem>>, vector<32x128xf32>,
    %c6_49 = arith.constant 6 : index
    %c0_50 = arith.constant 0 : index
    %80 = vector.load %arg30[%c6_49, %c0_50] : memref<160x128xf32, #tpu.memory_space<vmem>>, vector<32x128xf32>
    %c86_51 = arith.constant 86 : index
    %c0_52 = arith.constant 0 : index
    %81 = vector.load %arg30[%c86_51, %c0_52] : memref<160x128xf32, #tpu.memory_space<vmem>>, vector<32x128xf32>
    %82 = tpu.concatenate %80, %81 in 0 : vector<32x128xf32>, vector<32x128xf32> -> vector<64x128xf32>
    %c7_53 = arith.constant 7 : index
    %c0_54 = arith.constant 0 : index
    %83 = vector.load %arg30[%c7_53, %c0_54] : memref<160x128xf32, #tpu.memory_space<vmem>>, vector<32x128xf32>
    %c87_55 = arith.constant 87 : index
    %c0_56 = arith.constant 0 : index
    %84 = vector.load %arg30[%c87_55, %c0_56] : memref<160x128xf32, #tpu.memory_space<vmem>>, vector<32x128xf32>
    %85 = tpu.concatenate %83, %84 in 0 : vector<32x128xf32>, vector<32x128xf32> -> vector<64x128xf32>
    %c8_57 = arith.constant 8 : index
    %c0_58 = arith.constant 0 : index
    %86 = vector.load %arg30[%c8_57, %c0_58] : memref<160x128xf32, #tpu.memory_space<vmem>>, vector<32x128xf32>
    %c88_59 = arith.constant 88 : index
    %c0_60 = arith.constant 0 : index
    %87 = vector.load %arg30[%c88_59, %c0_60] : memref<160x128xf32, #tpu.memory_space<vmem>>, vector<32x128xf32>
    %88 = tpu.concatenate %86, %87 in 0 : vector<32x128xf32>, vector<32x128xf32> -> vector<64x128xf32>
    %c9_61 = arith.constant 9 : index
    %c0_62 = arith.constant 0 : index
    %89 = vector.load %arg30[%c9_61, %c0_62] : memref<160x128xf32, #tpu.memory_space<vmem>>, vector<32x128xf32>
    %c89_63 = arith.constant 89 : index
    %c0_64 = arith.constant 0 : index
    %90 = vector.load %arg30[%c89_63, %c0_64] : memref<160x128xf32, #tpu.memory_space<vmem>>, vector<32x128xf32>
    %91 = tpu.concatenate %89, %90 in 0 : vector<32x128xf32>, vector<32x128xf32> -> vector<64x128xf32>
    %c10_65 = arith.constant 10 : index
    %c0_66 = arith.constant 0 : index
    %92 = vector.load %arg30[%c10_65, %c0_66] : memref<160x128xf32, #tpu.memory_space<vmem>>, vector<32x128xf32>
    %c90_67 = arith.constant 90 : index
    %c0_68 = arith.constant 0 : index
    %93 = vector.load %arg30[%c90_67, %c0_68] : memref<160x128xf32, #tpu.memory_space<vmem>>, vector<32x128xf32>
    %94 = tpu.concatenate %92, %93 in 0 : vector<32x128xf32>, vector<32x128xf32> -> vector<64x128xf32>
    %95 = tpu.concatenate %82, %85, %88, %91, %94 in 1 : vector<64x128xf32>, vector<64x128xf32>, vector<64x128xf32>, vector<64x128xf32>, vector<64x128xf32> -> vector<64x640xf32>
    %96 = arith.truncf %95 : vector<64x640xf32> to vector<64x640xbf16>
    %c0_69 = arith.constant 0 : index
    %c0_70 = arith.constant 0 : index
    %97 = vector.load %arg5[%c0_69, %c0_70] : memref<640x128xbf16, #tpu.memory_space<vmem>>, vector<640x128xbf16>
    %cst_71 = arith.constant dense<0.000000e+00> : vector<64x128xf32>
    %98 = tpu.matmul %96, %97, %cst_71 {dimension_numbers = #tpu.dot_dimension_numbers<[1], [0], [0], [1], [0, 0, 1, 1], [], []>} : vector<64x640xbf16>, vector<640x128xbf16>, vector<64x128xf32> -> vector<64x128xf32>
    %cst_72 = arith.constant dense<0.000000e+00> : vector<128xf32>
    %99 = vector.multi_reduction <add>, %98, %cst_72 [0] : vector<64x128xf32> to vector<128xf32>
    %100 = vector.shape_cast %99 : vector<128xf32> to vector<1x128xf32>
    %cst_73 = arith.constant 6.400000e+01 : f32
    %101 = vector.broadcast %cst_73 : f32 to vector<1x128xf32>
    %102 = arith.divf %100, %101 : vector<1x128xf32>
    %103 = vector.broadcast %102 : vector<1x128xf32> to vector<64x128xf32>
    %104 = arith.subf %98, %103 : vector<64x128xf32>
    %105 = arith.mulf %104, %104 : vector<64x128xf32>
    %cst_74 = arith.constant dense<0.000000e+00> : vector<128xf32>
    %106 = vector.multi_reduction <add>, %105, %cst_74 [0] : vector<64x128xf32> to vector<128xf32>
    %107 = vector.shape_cast %106 : vector<128xf32> to vector<1x128xf32>
    %cst_75 = arith.constant 6.400000e+01 : f32
    %108 = vector.broadcast %cst_75 : f32 to vector<1x128xf32>
    %109 = arith.divf %107, %108 : vector<1x128xf32>
    %110 = vector.broadcast %102 : vector<1x128xf32> to vector<64x128xf32>
    %111 = arith.subf %98, %110 : vector<64x128xf32>
    %cst_76 = arith.constant 9.99999974E-6 : f32
    %112 = vector.broadcast %cst_76 : f32 to vector<1x128xf32>
    %113 = arith.addf %109, %112 : vector<1x128xf32>
    %114 = math.rsqrt %113 : vector<1x128xf32>
    %115 = vector.broadcast %114 : vector<1x128xf32> to vector<64x128xf32>
    %116 = arith.mulf %111, %115 : vector<64x128xf32>
    %c0_77 = arith.constant 0 : index
    %c0_78 = arith.constant 0 : index
    %117 = vector.load %arg6[%c0_77, %c0_78] : memref<1x128xf32, #tpu.memory_space<vmem>>, vector<1x128xf32>
    %118 = vector.broadcast %117 : vector<1x128xf32> to vector<64x128xf32>
    %119 = arith.mulf %116, %118 : vector<64x128xf32>
    %c0_79 = arith.constant 0 : index
    %c0_80 = arith.constant 0 : index
    %120 = vector.load %arg7[%c0_79, %c0_80] : memref<1x128xf32, #tpu.memory_space<vmem>>, vector<1x128xf32>
    %121 = vector.broadcast %120 : vector<1x128xf32> to vector<64x128xf32>
    %122 = arith.addf %119, %121 : vector<64x128xf32>
    %cst_81 = arith.constant 0.000000e+00 : f32
    %123 = vector.broadcast %cst_81 : f32 to vector<64x128xf32>
    %124 = arith.maximumf %122, %123 : vector<64x128xf32>
    %cst_82 = arith.constant 0.000000e+00 : f32
    %125 = vector.broadcast %cst_82 : f32 to vector<2x128xf32>
    %c6_83 = arith.constant 6 : index
    %c0_84 = arith.constant 0 : index
    %126 = vector.load %arg30[%c6_83, %c0_84] : memref<160x128xf32, #tpu.memory_space<vmem>>, vector<2x128xf32>
    tpu.vector_store %arg30[%c6_83, %c0_84], %125 {strides = array<i32>} : memref<160x128xf32, #tpu.memory_space<vmem>>, vector<2x128xf32>,
    %c40_85 = arith.constant 40 : index
    %c0_86 = arith.constant 0 : index
    %127 = vector.load %arg30[%c40_85, %c0_86] : memref<160x128xf32, #tpu.memory_space<vmem>>, vector<2x128xf32>
    tpu.vector_store %arg30[%c40_85, %c0_86], %125 {strides = array<i32>} : memref<160x128xf32, #tpu.memory_space<vmem>>, vector<2x128xf32>,
    %128 = vector.extract_strided_slice %124 {offsets = [0, 0], sizes = [32, 128], strides = [1, 1]} : vector<64x128xf32> to vector<32x128xf32>
    %c8_87 = arith.constant 8 : index
    %c0_88 = arith.constant 0 : index
    %129 = vector.load %arg30[%c8_87, %c0_88] : memref<160x128xf32, #tpu.memory_space<vmem>>, vector<32x128xf32>
    tpu.vector_store %arg30[%c8_87, %c0_88], %128 {strides = array<i32>} : memref<160x128xf32, #tpu.memory_space<vmem>>, vector<32x128xf32>,
    %cst_89 = arith.constant 0.000000e+00 : f32
    %130 = vector.broadcast %cst_89 : f32 to vector<2x128xf32>
    %c86_90 = arith.constant 86 : index
    %c0_91 = arith.constant 0 : index
    %131 = vector.load %arg30[%c86_90, %c0_91] : memref<160x128xf32, #tpu.memory_space<vmem>>, vector<2x128xf32>
    tpu.vector_store %arg30[%c86_90, %c0_91], %130 {strides = array<i32>} : memref<160x128xf32, #tpu.memory_space<vmem>>, vector<2x128xf32>,
    %c120_92 = arith.constant 120 : index
    %c0_93 = arith.constant 0 : index
    %132 = vector.load %arg30[%c120_92, %c0_93] : memref<160x128xf32, #tpu.memory_space<vmem>>, vector<2x128xf32>
    tpu.vector_store %arg30[%c120_92, %c0_93], %130 {strides = array<i32>} : memref<160x128xf32, #tpu.memory_space<vmem>>, vector<2x128xf32>,
    %133 = vector.extract_strided_slice %124 {offsets = [32, 0], sizes = [32, 128], strides = [1, 1]} : vector<64x128xf32> to vector<32x128xf32>
    %c88_94 = arith.constant 88 : index
    %c0_95 = arith.constant 0 : index
    %134 = vector.load %arg30[%c88_94, %c0_95] : memref<160x128xf32, #tpu.memory_space<vmem>>, vector<32x128xf32>
    tpu.vector_store %arg30[%c88_94, %c0_95], %133 {strides = array<i32>} : memref<160x128xf32, #tpu.memory_space<vmem>>, vector<32x128xf32>,
    %c6_96 = arith.constant 6 : index
    %c0_97 = arith.constant 0 : index
    %135 = vector.load %arg30[%c6_96, %c0_97] : memref<160x128xf32, #tpu.memory_space<vmem>>, vector<32x128xf32>
    %c86_98 = arith.constant 86 : index
    %c0_99 = arith.constant 0 : index
    %136 = vector.load %arg30[%c86_98, %c0_99] : memref<160x128xf32, #tpu.memory_space<vmem>>, vector<32x128xf32>
    %137 = tpu.concatenate %135, %136 in 0 : vector<32x128xf32>, vector<32x128xf32> -> vector<64x128xf32>
    %c7_100 = arith.constant 7 : index
    %c0_101 = arith.constant 0 : index
    %138 = vector.load %arg30[%c7_100, %c0_101] : memref<160x128xf32, #tpu.memory_space<vmem>>, vector<32x128xf32>
    %c87_102 = arith.constant 87 : index
    %c0_103 = arith.constant 0 : index
    %139 = vector.load %arg30[%c87_102, %c0_103] : memref<160x128xf32, #tpu.memory_space<vmem>>, vector<32x128xf32>
    %140 = tpu.concatenate %138, %139 in 0 : vector<32x128xf32>, vector<32x128xf32> -> vector<64x128xf32>
    %c8_104 = arith.constant 8 : index
    %c0_105 = arith.constant 0 : index
    %141 = vector.load %arg30[%c8_104, %c0_105] : memref<160x128xf32, #tpu.memory_space<vmem>>, vector<32x128xf32>
    %c88_106 = arith.constant 88 : index
    %c0_107 = arith.constant 0 : index
    %142 = vector.load %arg30[%c88_106, %c0_107] : memref<160x128xf32, #tpu.memory_space<vmem>>, vector<32x128xf32>
    %143 = tpu.concatenate %141, %142 in 0 : vector<32x128xf32>, vector<32x128xf32> -> vector<64x128xf32>
    %c9_108 = arith.constant 9 : index
    %c0_109 = arith.constant 0 : index
    %144 = vector.load %arg30[%c9_108, %c0_109] : memref<160x128xf32, #tpu.memory_space<vmem>>, vector<32x128xf32>
    %c89_110 = arith.constant 89 : index
    %c0_111 = arith.constant 0 : index
    %145 = vector.load %arg30[%c89_110, %c0_111] : memref<160x128xf32, #tpu.memory_space<vmem>>, vector<32x128xf32>
    %146 = tpu.concatenate %144, %145 in 0 : vector<32x128xf32>, vector<32x128xf32> -> vector<64x128xf32>
    %c10_112 = arith.constant 10 : index
    %c0_113 = arith.constant 0 : index
    %147 = vector.load %arg30[%c10_112, %c0_113] : memref<160x128xf32, #tpu.memory_space<vmem>>, vector<32x128xf32>
    %c90_114 = arith.constant 90 : index
    %c0_115 = arith.constant 0 : index
    %148 = vector.load %arg30[%c90_114, %c0_115] : memref<160x128xf32, #tpu.memory_space<vmem>>, vector<32x128xf32>
    %149 = tpu.concatenate %147, %148 in 0 : vector<32x128xf32>, vector<32x128xf32> -> vector<64x128xf32>
    %150 = tpu.concatenate %137, %140, %143, %146, %149 in 1 : vector<64x128xf32>, vector<64x128xf32>, vector<64x128xf32>, vector<64x128xf32>, vector<64x128xf32> -> vector<64x640xf32>
    %151 = arith.truncf %150 : vector<64x640xf32> to vector<64x640xbf16>
    %c0_116 = arith.constant 0 : index
    %c0_117 = arith.constant 0 : index
    %152 = vector.load %arg8[%c0_116, %c0_117] : memref<640x128xbf16, #tpu.memory_space<vmem>>, vector<640x128xbf16>
    %cst_118 = arith.constant dense<0.000000e+00> : vector<64x128xf32>
    %153 = tpu.matmul %151, %152, %cst_118 {dimension_numbers = #tpu.dot_dimension_numbers<[1], [0], [0], [1], [0, 0, 1, 1], [], []>} : vector<64x640xbf16>, vector<640x128xbf16>, vector<64x128xf32> -> vector<64x128xf32>
    %cst_119 = arith.constant dense<0.000000e+00> : vector<128xf32>
    %154 = vector.multi_reduction <add>, %153, %cst_119 [0] : vector<64x128xf32> to vector<128xf32>
    %155 = vector.shape_cast %154 : vector<128xf32> to vector<1x128xf32>
    %cst_120 = arith.constant 6.400000e+01 : f32
    %156 = vector.broadcast %cst_120 : f32 to vector<1x128xf32>
    %157 = arith.divf %155, %156 : vector<1x128xf32>
    %158 = vector.broadcast %157 : vector<1x128xf32> to vector<64x128xf32>
    %159 = arith.subf %153, %158 : vector<64x128xf32>
    %160 = arith.mulf %159, %159 : vector<64x128xf32>
    %cst_121 = arith.constant dense<0.000000e+00> : vector<128xf32>
    %161 = vector.multi_reduction <add>, %160, %cst_121 [0] : vector<64x128xf32> to vector<128xf32>
    %162 = vector.shape_cast %161 : vector<128xf32> to vector<1x128xf32>
    %cst_122 = arith.constant 6.400000e+01 : f32
    %163 = vector.broadcast %cst_122 : f32 to vector<1x128xf32>
    %164 = arith.divf %162, %163 : vector<1x128xf32>
    %165 = vector.broadcast %157 : vector<1x128xf32> to vector<64x128xf32>
    %166 = arith.subf %153, %165 : vector<64x128xf32>
    %cst_123 = arith.constant 9.99999974E-6 : f32
    %167 = vector.broadcast %cst_123 : f32 to vector<1x128xf32>
    %168 = arith.addf %164, %167 : vector<1x128xf32>
    %169 = math.rsqrt %168 : vector<1x128xf32>
    %170 = vector.broadcast %169 : vector<1x128xf32> to vector<64x128xf32>
    %171 = arith.mulf %166, %170 : vector<64x128xf32>
    %c0_124 = arith.constant 0 : index
    %c0_125 = arith.constant 0 : index
    %172 = vector.load %arg9[%c0_124, %c0_125] : memref<1x128xf32, #tpu.memory_space<vmem>>, vector<1x128xf32>
    %173 = vector.broadcast %172 : vector<1x128xf32> to vector<64x128xf32>
    %174 = arith.mulf %171, %173 : vector<64x128xf32>
    %c0_126 = arith.constant 0 : index
    %c0_127 = arith.constant 0 : index
    %175 = vector.load %arg10[%c0_126, %c0_127] : memref<1x128xf32, #tpu.memory_space<vmem>>, vector<1x128xf32>
    %176 = vector.broadcast %175 : vector<1x128xf32> to vector<64x128xf32>
    %177 = arith.addf %174, %176 : vector<64x128xf32>
    %cst_128 = arith.constant 0.000000e+00 : f32
    %178 = vector.broadcast %cst_128 : f32 to vector<64x128xf32>
    %179 = arith.maximumf %177, %178 : vector<64x128xf32>
    %cst_129 = arith.constant -1.000000e+30 : f32
    %180 = vector.broadcast %cst_129 : f32 to vector<1x128xf32>
    %c7_130 = arith.constant 7 : index
    %c0_131 = arith.constant 0 : index
    %181 = vector.load %arg30[%c7_130, %c0_131] : memref<160x128xf32, #tpu.memory_space<vmem>>, vector<1x128xf32>
    tpu.vector_store %arg30[%c7_130, %c0_131], %180 {strides = array<i32>} : memref<160x128xf32, #tpu.memory_space<vmem>>, vector<1x128xf32>,
    %c40_132 = arith.constant 40 : index
    %c0_133 = arith.constant 0 : index
    %182 = vector.load %arg30[%c40_132, %c0_133] : memref<160x128xf32, #tpu.memory_space<vmem>>, vector<1x128xf32>
    tpu.vector_store %arg30[%c40_132, %c0_133], %180 {strides = array<i32>} : memref<160x128xf32, #tpu.memory_space<vmem>>, vector<1x128xf32>,
    %183 = vector.extract_strided_slice %179 {offsets = [0, 0], sizes = [32, 128], strides = [1, 1]} : vector<64x128xf32> to vector<32x128xf32>
    %c8_134 = arith.constant 8 : index
    %c0_135 = arith.constant 0 : index
    %184 = vector.load %arg30[%c8_134, %c0_135] : memref<160x128xf32, #tpu.memory_space<vmem>>, vector<32x128xf32>
    tpu.vector_store %arg30[%c8_134, %c0_135], %183 {strides = array<i32>} : memref<160x128xf32, #tpu.memory_space<vmem>>, vector<32x128xf32>,
    %cst_136 = arith.constant -1.000000e+30 : f32
    %185 = vector.broadcast %cst_136 : f32 to vector<1x128xf32>
    %c87_137 = arith.constant 87 : index
    %c0_138 = arith.constant 0 : index
    %186 = vector.load %arg30[%c87_137, %c0_138] : memref<160x128xf32, #tpu.memory_space<vmem>>, vector<1x128xf32>
    tpu.vector_store %arg30[%c87_137, %c0_138], %185 {strides = array<i32>} : memref<160x128xf32, #tpu.memory_space<vmem>>, vector<1x128xf32>,
    %c120_139 = arith.constant 120 : index
    %c0_140 = arith.constant 0 : index
    %187 = vector.load %arg30[%c120_139, %c0_140] : memref<160x128xf32, #tpu.memory_space<vmem>>, vector<1x128xf32>
    tpu.vector_store %arg30[%c120_139, %c0_140], %185 {strides = array<i32>} : memref<160x128xf32, #tpu.memory_space<vmem>>, vector<1x128xf32>,
    %188 = vector.extract_strided_slice %179 {offsets = [32, 0], sizes = [32, 128], strides = [1, 1]} : vector<64x128xf32> to vector<32x128xf32>
    %c88_141 = arith.constant 88 : index
    %c0_142 = arith.constant 0 : index
    %189 = vector.load %arg30[%c88_141, %c0_142] : memref<160x128xf32, #tpu.memory_space<vmem>>, vector<32x128xf32>
    tpu.vector_store %arg30[%c88_141, %c0_142], %188 {strides = array<i32>} : memref<160x128xf32, #tpu.memory_space<vmem>>, vector<32x128xf32>,
    %c7_143 = arith.constant 7 : index
    %c0_144 = arith.constant 0 : index
    %190 = vector.load %arg30[%c7_143, %c0_144] : memref<160x128xf32, #tpu.memory_space<vmem>>, vector<32x128xf32>
    %c87_145 = arith.constant 87 : index
    %c0_146 = arith.constant 0 : index
    %191 = vector.load %arg30[%c87_145, %c0_146] : memref<160x128xf32, #tpu.memory_space<vmem>>, vector<32x128xf32>
    %192 = tpu.concatenate %190, %191 in 0 : vector<32x128xf32>, vector<32x128xf32> -> vector<64x128xf32>
    %c8_147 = arith.constant 8 : index
    %c0_148 = arith.constant 0 : index
    %193 = vector.load %arg30[%c8_147, %c0_148] : memref<160x128xf32, #tpu.memory_space<vmem>>, vector<32x128xf32>
    %c88_149 = arith.constant 88 : index
    %c0_150 = arith.constant 0 : index
    %194 = vector.load %arg30[%c88_149, %c0_150] : memref<160x128xf32, #tpu.memory_space<vmem>>, vector<32x128xf32>
    %195 = tpu.concatenate %193, %194 in 0 : vector<32x128xf32>, vector<32x128xf32> -> vector<64x128xf32>
    %c9_151 = arith.constant 9 : index
    %c0_152 = arith.constant 0 : index
    %196 = vector.load %arg30[%c9_151, %c0_152] : memref<160x128xf32, #tpu.memory_space<vmem>>, vector<32x128xf32>
    %c89_153 = arith.constant 89 : index
    %c0_154 = arith.constant 0 : index
    %197 = vector.load %arg30[%c89_153, %c0_154] : memref<160x128xf32, #tpu.memory_space<vmem>>, vector<32x128xf32>
    %198 = tpu.concatenate %196, %197 in 0 : vector<32x128xf32>, vector<32x128xf32> -> vector<64x128xf32>
    %199 = arith.maximumf %192, %195 : vector<64x128xf32>
    %200 = arith.maximumf %199, %198 : vector<64x128xf32>
    %201 = tpu.iota {dimensions = array<i32: 0>} : vector<16x32xi32>
    %202 = tpu.iota {dimensions = array<i32: 1>} : vector<16x32xi32>
    %c2_i32_155 = arith.constant 2 : i32
    %203 = vector.broadcast %c2_i32_155 : i32 to vector<16x32xi32>
    %204 = arith.muli %201, %203 : vector<16x32xi32>
    %c0_i32_156 = arith.constant 0 : i32
    %205 = vector.broadcast %c0_i32_156 : i32 to vector<16x32xi32>
    %206 = arith.addi %204, %205 : vector<16x32xi32>
    %207 = arith.cmpi eq, %202, %206 : vector<16x32xi32>
    %208 = arith.extui %207 : vector<16x32xi1> to vector<16x32xi32>
    %209 = arith.sitofp %208 : vector<16x32xi32> to vector<16x32xf32>
    %210 = vector.extract_strided_slice %200 {offsets = [0, 0], sizes = [32, 128], strides = [1, 1]} : vector<64x128xf32> to vector<32x128xf32>
    %cst_157 = arith.constant dense<0.000000e+00> : vector<16x128xf32>
    %211 = tpu.matmul %209, %210, %cst_157 {dimension_numbers = #tpu.dot_dimension_numbers<[1], [0], [0], [1], [0, 0, 1, 1], [], []>} : vector<16x32xf32>, vector<32x128xf32>, vector<16x128xf32> -> vector<16x128xf32>
    %212 = vector.extract_strided_slice %200 {offsets = [32, 0], sizes = [32, 128], strides = [1, 1]} : vector<64x128xf32> to vector<32x128xf32>
    %cst_158 = arith.constant dense<0.000000e+00> : vector<16x128xf32>
    %213 = tpu.matmul %209, %212, %cst_158 {dimension_numbers = #tpu.dot_dimension_numbers<[1], [0], [0], [1], [0, 0, 1, 1], [], []>} : vector<16x32xf32>, vector<32x128xf32>, vector<16x128xf32> -> vector<16x128xf32>
    %214 = tpu.concatenate %211, %213 in 0 : vector<16x128xf32>, vector<16x128xf32> -> vector<32x128xf32>
    %cst_159 = arith.constant 0.000000e+00 : f32
    %215 = vector.broadcast %cst_159 : f32 to vector<1x128xf32>
    %c7_160 = arith.constant 7 : index
    %c0_161 = arith.constant 0 : index
    %216 = vector.load %arg30[%c7_160, %c0_161] : memref<160x128xf32, #tpu.memory_space<vmem>>, vector<1x128xf32>
    tpu.vector_store %arg30[%c7_160, %c0_161], %215 {strides = array<i32>} : memref<160x128xf32, #tpu.memory_space<vmem>>, vector<1x128xf32>,
    %c24 = arith.constant 24 : index
    %c0_162 = arith.constant 0 : index
    %217 = vector.load %arg30[%c24, %c0_162] : memref<160x128xf32, #tpu.memory_space<vmem>>, vector<1x128xf32>
    tpu.vector_store %arg30[%c24, %c0_162], %215 {strides = array<i32>} : memref<160x128xf32, #tpu.memory_space<vmem>>, vector<1x128xf32>,
    %218 = vector.extract_strided_slice %214 {offsets = [0, 0], sizes = [16, 128], strides = [1, 1]} : vector<32x128xf32> to vector<16x128xf32>
    %c8_163 = arith.constant 8 : index
    %c0_164 = arith.constant 0 : index
    %219 = vector.load %arg30[%c8_163, %c0_164] : memref<160x128xf32, #tpu.memory_space<vmem>>, vector<16x128xf32>
    tpu.vector_store %arg30[%c8_163, %c0_164], %218 {strides = array<i32>} : memref<160x128xf32, #tpu.memory_space<vmem>>, vector<16x128xf32>,
    %cst_165 = arith.constant 0.000000e+00 : f32
    %220 = vector.broadcast %cst_165 : f32 to vector<1x128xf32>
    %c87_166 = arith.constant 87 : index
    %c0_167 = arith.constant 0 : index
    %221 = vector.load %arg30[%c87_166, %c0_167] : memref<160x128xf32, #tpu.memory_space<vmem>>, vector<1x128xf32>
    tpu.vector_store %arg30[%c87_166, %c0_167], %220 {strides = array<i32>} : memref<160x128xf32, #tpu.memory_space<vmem>>, vector<1x128xf32>,
    %c104 = arith.constant 104 : index
    %c0_168 = arith.constant 0 : index
    %222 = vector.load %arg30[%c104, %c0_168] : memref<160x128xf32, #tpu.memory_space<vmem>>, vector<1x128xf32>
    tpu.vector_store %arg30[%c104, %c0_168], %220 {strides = array<i32>} : memref<160x128xf32, #tpu.memory_space<vmem>>, vector<1x128xf32>,
    %223 = vector.extract_strided_slice %214 {offsets = [16, 0], sizes = [16, 128], strides = [1, 1]} : vector<32x128xf32> to vector<16x128xf32>
    %c88_169 = arith.constant 88 : index
    %c0_170 = arith.constant 0 : index
    %224 = vector.load %arg30[%c88_169, %c0_170] : memref<160x128xf32, #tpu.memory_space<vmem>>, vector<16x128xf32>
    tpu.vector_store %arg30[%c88_169, %c0_170], %223 {strides = array<i32>} : memref<160x128xf32, #tpu.memory_space<vmem>>, vector<16x128xf32>,
    %c7_171 = arith.constant 7 : index
    %c0_172 = arith.constant 0 : index
    %225 = vector.load %arg30[%c7_171, %c0_172] : memref<160x128xf32, #tpu.memory_space<vmem>>, vector<16x128xf32>
    %c87_173 = arith.constant 87 : index
    %c0_174 = arith.constant 0 : index
    %226 = vector.load %arg30[%c87_173, %c0_174] : memref<160x128xf32, #tpu.memory_space<vmem>>, vector<16x128xf32>
    %227 = tpu.concatenate %225, %226 in 0 : vector<16x128xf32>, vector<16x128xf32> -> vector<32x128xf32>
    %c8_175 = arith.constant 8 : index
    %c0_176 = arith.constant 0 : index
    %228 = vector.load %arg30[%c8_175, %c0_176] : memref<160x128xf32, #tpu.memory_space<vmem>>, vector<16x128xf32>
    %c88_177 = arith.constant 88 : index
    %c0_178 = arith.constant 0 : index
    %229 = vector.load %arg30[%c88_177, %c0_178] : memref<160x128xf32, #tpu.memory_space<vmem>>, vector<16x128xf32>
    %230 = tpu.concatenate %228, %229 in 0 : vector<16x128xf32>, vector<16x128xf32> -> vector<32x128xf32>
    %c9_179 = arith.constant 9 : index
    %c0_180 = arith.constant 0 : index
    %231 = vector.load %arg30[%c9_179, %c0_180] : memref<160x128xf32, #tpu.memory_space<vmem>>, vector<16x128xf32>
    %c89_181 = arith.constant 89 : index
    %c0_182 = arith.constant 0 : index
    %232 = vector.load %arg30[%c89_181, %c0_182] : memref<160x128xf32, #tpu.memory_space<vmem>>, vector<16x128xf32>
    %233 = tpu.concatenate %231, %232 in 0 : vector<16x128xf32>, vector<16x128xf32> -> vector<32x128xf32>
    %234 = tpu.concatenate %227, %230, %233 in 1 : vector<32x128xf32>, vector<32x128xf32>, vector<32x128xf32> -> vector<32x384xf32>
    %235 = arith.truncf %234 : vector<32x384xf32> to vector<32x384xbf16>
    %c0_183 = arith.constant 0 : index
    %c0_184 = arith.constant 0 : index
    %236 = vector.load %arg11[%c0_183, %c0_184] : memref<384x128xbf16, #tpu.memory_space<vmem>>, vector<384x128xbf16>
    %cst_185 = arith.constant dense<0.000000e+00> : vector<32x128xf32>
    %237 = tpu.matmul %235, %236, %cst_185 {dimension_numbers = #tpu.dot_dimension_numbers<[1], [0], [0], [1], [0, 0, 1, 1], [], []>} : vector<32x384xbf16>, vector<384x128xbf16>, vector<32x128xf32> -> vector<32x128xf32>
    %cst_186 = arith.constant dense<0.000000e+00> : vector<128xf32>
    %238 = vector.multi_reduction <add>, %237, %cst_186 [0] : vector<32x128xf32> to vector<128xf32>
    %239 = vector.shape_cast %238 : vector<128xf32> to vector<1x128xf32>
    %cst_187 = arith.constant 3.200000e+01 : f32
    %240 = vector.broadcast %cst_187 : f32 to vector<1x128xf32>
    %241 = arith.divf %239, %240 : vector<1x128xf32>
    %242 = vector.broadcast %241 : vector<1x128xf32> to vector<32x128xf32>
    %243 = arith.subf %237, %242 : vector<32x128xf32>
    %244 = arith.mulf %243, %243 : vector<32x128xf32>
    %cst_188 = arith.constant dense<0.000000e+00> : vector<128xf32>
    %245 = vector.multi_reduction <add>, %244, %cst_188 [0] : vector<32x128xf32> to vector<128xf32>
    %246 = vector.shape_cast %245 : vector<128xf32> to vector<1x128xf32>
    %cst_189 = arith.constant 3.200000e+01 : f32
    %247 = vector.broadcast %cst_189 : f32 to vector<1x128xf32>
    %248 = arith.divf %246, %247 : vector<1x128xf32>
    %249 = vector.broadcast %241 : vector<1x128xf32> to vector<32x128xf32>
    %250 = arith.subf %237, %249 : vector<32x128xf32>
    %cst_190 = arith.constant 9.99999974E-6 : f32
    %251 = vector.broadcast %cst_190 : f32 to vector<1x128xf32>
    %252 = arith.addf %248, %251 : vector<1x128xf32>
    %253 = math.rsqrt %252 : vector<1x128xf32>
    %254 = vector.broadcast %253 : vector<1x128xf32> to vector<32x128xf32>
    %255 = arith.mulf %250, %254 : vector<32x128xf32>
    %c0_191 = arith.constant 0 : index
    %c0_192 = arith.constant 0 : index
    %256 = vector.load %arg12[%c0_191, %c0_192] : memref<1x128xf32, #tpu.memory_space<vmem>>, vector<1x128xf32>
    %257 = vector.broadcast %256 : vector<1x128xf32> to vector<32x128xf32>
    %258 = arith.mulf %255, %257 : vector<32x128xf32>
    %c0_193 = arith.constant 0 : index
    %c0_194 = arith.constant 0 : index
    %259 = vector.load %arg13[%c0_193, %c0_194] : memref<1x128xf32, #tpu.memory_space<vmem>>, vector<1x128xf32>
    %260 = vector.broadcast %259 : vector<1x128xf32> to vector<32x128xf32>
    %261 = arith.addf %258, %260 : vector<32x128xf32>
    %cst_195 = arith.constant 0.000000e+00 : f32
    %262 = vector.broadcast %cst_195 : f32 to vector<32x128xf32>
    %263 = arith.maximumf %261, %262 : vector<32x128xf32>
    %cst_196 = arith.constant 0.000000e+00 : f32
    %264 = vector.broadcast %cst_196 : f32 to vector<1x128xf32>
    %c7_197 = arith.constant 7 : index
    %c0_198 = arith.constant 0 : index
    %265 = vector.load %arg30[%c7_197, %c0_198] : memref<160x128xf32, #tpu.memory_space<vmem>>, vector<1x128xf32>
    tpu.vector_store %arg30[%c7_197, %c0_198], %264 {strides = array<i32>} : memref<160x128xf32, #tpu.memory_space<vmem>>, vector<1x128xf32>,
    %c24_199 = arith.constant 24 : index
    %c0_200 = arith.constant 0 : index
    %266 = vector.load %arg30[%c24_199, %c0_200] : memref<160x128xf32, #tpu.memory_space<vmem>>, vector<1x128xf32>
    tpu.vector_store %arg30[%c24_199, %c0_200], %264 {strides = array<i32>} : memref<160x128xf32, #tpu.memory_space<vmem>>, vector<1x128xf32>,
    %267 = vector.extract_strided_slice %263 {offsets = [0, 0], sizes = [16, 128], strides = [1, 1]} : vector<32x128xf32> to vector<16x128xf32>
    %c8_201 = arith.constant 8 : index
    %c0_202 = arith.constant 0 : index
    %268 = vector.load %arg30[%c8_201, %c0_202] : memref<160x128xf32, #tpu.memory_space<vmem>>, vector<16x128xf32>
    tpu.vector_store %arg30[%c8_201, %c0_202], %267 {strides = array<i32>} : memref<160x128xf32, #tpu.memory_space<vmem>>, vector<16x128xf32>,
    %cst_203 = arith.constant 0.000000e+00 : f32
    %269 = vector.broadcast %cst_203 : f32 to vector<1x128xf32>
    %c87_204 = arith.constant 87 : index
    %c0_205 = arith.constant 0 : index
    %270 = vector.load %arg30[%c87_204, %c0_205] : memref<160x128xf32, #tpu.memory_space<vmem>>, vector<1x128xf32>
    tpu.vector_store %arg30[%c87_204, %c0_205], %269 {strides = array<i32>} : memref<160x128xf32, #tpu.memory_space<vmem>>, vector<1x128xf32>,
    %c104_206 = arith.constant 104 : index
    %c0_207 = arith.constant 0 : index
    %271 = vector.load %arg30[%c104_206, %c0_207] : memref<160x128xf32, #tpu.memory_space<vmem>>, vector<1x128xf32>
    tpu.vector_store %arg30[%c104_206, %c0_207], %269 {strides = array<i32>} : memref<160x128xf32, #tpu.memory_space<vmem>>, vector<1x128xf32>,
    %272 = vector.extract_strided_slice %263 {offsets = [16, 0], sizes = [16, 128], strides = [1, 1]} : vector<32x128xf32> to vector<16x128xf32>
    %c88_208 = arith.constant 88 : index
    %c0_209 = arith.constant 0 : index
    %273 = vector.load %arg30[%c88_208, %c0_209] : memref<160x128xf32, #tpu.memory_space<vmem>>, vector<16x128xf32>
    tpu.vector_store %arg30[%c88_208, %c0_209], %272 {strides = array<i32>} : memref<160x128xf32, #tpu.memory_space<vmem>>, vector<16x128xf32>,
    %c7_210 = arith.constant 7 : index
    %c0_211 = arith.constant 0 : index
    %274 = vector.load %arg30[%c7_210, %c0_211] : memref<160x128xf32, #tpu.memory_space<vmem>>, vector<16x128xf32>
    %c87_212 = arith.constant 87 : index
    %c0_213 = arith.constant 0 : index
    %275 = vector.load %arg30[%c87_212, %c0_213] : memref<160x128xf32, #tpu.memory_space<vmem>>, vector<16x128xf32>
    %276 = tpu.concatenate %274, %275 in 0 : vector<16x128xf32>, vector<16x128xf32> -> vector<32x128xf32>
    %c8_214 = arith.constant 8 : index
    %c0_215 = arith.constant 0 : index
    %277 = vector.load %arg30[%c8_214, %c0_215] : memref<160x128xf32, #tpu.memory_space<vmem>>, vector<16x128xf32>
    %c88_216 = arith.constant 88 : index
    %c0_217 = arith.constant 0 : index
    %278 = vector.load %arg30[%c88_216, %c0_217] : memref<160x128xf32, #tpu.memory_space<vmem>>, vector<16x128xf32>
    %279 = tpu.concatenate %277, %278 in 0 : vector<16x128xf32>, vector<16x128xf32> -> vector<32x128xf32>
    %c9_218 = arith.constant 9 : index
    %c0_219 = arith.constant 0 : index
    %280 = vector.load %arg30[%c9_218, %c0_219] : memref<160x128xf32, #tpu.memory_space<vmem>>, vector<16x128xf32>
    %c89_220 = arith.constant 89 : index
    %c0_221 = arith.constant 0 : index
    %281 = vector.load %arg30[%c89_220, %c0_221] : memref<160x128xf32, #tpu.memory_space<vmem>>, vector<16x128xf32>
    %282 = tpu.concatenate %280, %281 in 0 : vector<16x128xf32>, vector<16x128xf32> -> vector<32x128xf32>
    %283 = tpu.concatenate %276, %279, %282 in 1 : vector<32x128xf32>, vector<32x128xf32>, vector<32x128xf32> -> vector<32x384xf32>
    %284 = arith.truncf %283 : vector<32x384xf32> to vector<32x384xbf16>
    %c0_222 = arith.constant 0 : index
    %c0_223 = arith.constant 0 : index
    %285 = vector.load %arg14[%c0_222, %c0_223] : memref<384x128xbf16, #tpu.memory_space<vmem>>, vector<384x128xbf16>
    %cst_224 = arith.constant dense<0.000000e+00> : vector<32x128xf32>
    %286 = tpu.matmul %284, %285, %cst_224 {dimension_numbers = #tpu.dot_dimension_numbers<[1], [0], [0], [1], [0, 0, 1, 1], [], []>} : vector<32x384xbf16>, vector<384x128xbf16>, vector<32x128xf32> -> vector<32x128xf32>
    %cst_225 = arith.constant dense<0.000000e+00> : vector<128xf32>
    %287 = vector.multi_reduction <add>, %286, %cst_225 [0] : vector<32x128xf32> to vector<128xf32>
    %288 = vector.shape_cast %287 : vector<128xf32> to vector<1x128xf32>
    %cst_226 = arith.constant 3.200000e+01 : f32
    %289 = vector.broadcast %cst_226 : f32 to vector<1x128xf32>
    %290 = arith.divf %288, %289 : vector<1x128xf32>
    %291 = vector.broadcast %290 : vector<1x128xf32> to vector<32x128xf32>
    %292 = arith.subf %286, %291 : vector<32x128xf32>
    %293 = arith.mulf %292, %292 : vector<32x128xf32>
    %cst_227 = arith.constant dense<0.000000e+00> : vector<128xf32>
    %294 = vector.multi_reduction <add>, %293, %cst_227 [0] : vector<32x128xf32> to vector<128xf32>
    %295 = vector.shape_cast %294 : vector<128xf32> to vector<1x128xf32>
    %cst_228 = arith.constant 3.200000e+01 : f32
    %296 = vector.broadcast %cst_228 : f32 to vector<1x128xf32>
    %297 = arith.divf %295, %296 : vector<1x128xf32>
    %298 = vector.broadcast %290 : vector<1x128xf32> to vector<32x128xf32>
    %299 = arith.subf %286, %298 : vector<32x128xf32>
    %cst_229 = arith.constant 9.99999974E-6 : f32
    %300 = vector.broadcast %cst_229 : f32 to vector<1x128xf32>
    %301 = arith.addf %297, %300 : vector<1x128xf32>
    %302 = math.rsqrt %301 : vector<1x128xf32>
    %303 = vector.broadcast %302 : vector<1x128xf32> to vector<32x128xf32>
    %304 = arith.mulf %299, %303 : vector<32x128xf32>
    %c0_230 = arith.constant 0 : index
    %c0_231 = arith.constant 0 : index
    %305 = vector.load %arg15[%c0_230, %c0_231] : memref<1x128xf32, #tpu.memory_space<vmem>>, vector<1x128xf32>
    %306 = vector.broadcast %305 : vector<1x128xf32> to vector<32x128xf32>
    %307 = arith.mulf %304, %306 : vector<32x128xf32>
    %c0_232 = arith.constant 0 : index
    %c0_233 = arith.constant 0 : index
    %308 = vector.load %arg16[%c0_232, %c0_233] : memref<1x128xf32, #tpu.memory_space<vmem>>, vector<1x128xf32>
    %309 = vector.broadcast %308 : vector<1x128xf32> to vector<32x128xf32>
    %310 = arith.addf %307, %309 : vector<32x128xf32>
    %311 = arith.addf %310, %214 : vector<32x128xf32>
    %cst_234 = arith.constant 0.000000e+00 : f32
    %312 = vector.broadcast %cst_234 : f32 to vector<32x128xf32>
    %313 = arith.maximumf %311, %312 : vector<32x128xf32>
    %cst_235 = arith.constant 0.000000e+00 : f32
    %314 = vector.broadcast %cst_235 : f32 to vector<1x128xf32>
    %c7_236 = arith.constant 7 : index
    %c0_237 = arith.constant 0 : index
    %315 = vector.load %arg30[%c7_236, %c0_237] : memref<160x128xf32, #tpu.memory_space<vmem>>, vector<1x128xf32>
    tpu.vector_store %arg30[%c7_236, %c0_237], %314 {strides = array<i32>} : memref<160x128xf32, #tpu.memory_space<vmem>>, vector<1x128xf32>,
    %c24_238 = arith.constant 24 : index
    %c0_239 = arith.constant 0 : index
    %316 = vector.load %arg30[%c24_238, %c0_239] : memref<160x128xf32, #tpu.memory_space<vmem>>, vector<1x128xf32>
    tpu.vector_store %arg30[%c24_238, %c0_239], %314 {strides = array<i32>} : memref<160x128xf32, #tpu.memory_space<vmem>>, vector<1x128xf32>,
    %317 = vector.extract_strided_slice %313 {offsets = [0, 0], sizes = [16, 128], strides = [1, 1]} : vector<32x128xf32> to vector<16x128xf32>
    %c8_240 = arith.constant 8 : index
    %c0_241 = arith.constant 0 : index
    %318 = vector.load %arg30[%c8_240, %c0_241] : memref<160x128xf32, #tpu.memory_space<vmem>>, vector<16x128xf32>
    tpu.vector_store %arg30[%c8_240, %c0_241], %317 {strides = array<i32>} : memref<160x128xf32, #tpu.memory_space<vmem>>, vector<16x128xf32>,
    %cst_242 = arith.constant 0.000000e+00 : f32
    %319 = vector.broadcast %cst_242 : f32 to vector<1x128xf32>
    %c87_243 = arith.constant 87 : index
    %c0_244 = arith.constant 0 : index
    %320 = vector.load %arg30[%c87_243, %c0_244] : memref<160x128xf32, #tpu.memory_space<vmem>>, vector<1x128xf32>
    tpu.vector_store %arg30[%c87_243, %c0_244], %319 {strides = array<i32>} : memref<160x128xf32, #tpu.memory_space<vmem>>, vector<1x128xf32>,
    %c104_245 = arith.constant 104 : index
    %c0_246 = arith.constant 0 : index
    %321 = vector.load %arg30[%c104_245, %c0_246] : memref<160x128xf32, #tpu.memory_space<vmem>>, vector<1x128xf32>
    tpu.vector_store %arg30[%c104_245, %c0_246], %319 {strides = array<i32>} : memref<160x128xf32, #tpu.memory_space<vmem>>, vector<1x128xf32>,
    %322 = vector.extract_strided_slice %313 {offsets = [16, 0], sizes = [16, 128], strides = [1, 1]} : vector<32x128xf32> to vector<16x128xf32>
    %c88_247 = arith.constant 88 : index
    %c0_248 = arith.constant 0 : index
    %323 = vector.load %arg30[%c88_247, %c0_248] : memref<160x128xf32, #tpu.memory_space<vmem>>, vector<16x128xf32>
    tpu.vector_store %arg30[%c88_247, %c0_248], %322 {strides = array<i32>} : memref<160x128xf32, #tpu.memory_space<vmem>>, vector<16x128xf32>,
    %c7_249 = arith.constant 7 : index
    %c0_250 = arith.constant 0 : index
    %324 = vector.load %arg30[%c7_249, %c0_250] : memref<160x128xf32, #tpu.memory_space<vmem>>, vector<16x128xf32>
    %c87_251 = arith.constant 87 : index
    %c0_252 = arith.constant 0 : index
    %325 = vector.load %arg30[%c87_251, %c0_252] : memref<160x128xf32, #tpu.memory_space<vmem>>, vector<16x128xf32>
    %326 = tpu.concatenate %324, %325 in 0 : vector<16x128xf32>, vector<16x128xf32> -> vector<32x128xf32>
    %c8_253 = arith.constant 8 : index
    %c0_254 = arith.constant 0 : index
    %327 = vector.load %arg30[%c8_253, %c0_254] : memref<160x128xf32, #tpu.memory_space<vmem>>, vector<16x128xf32>
    %c88_255 = arith.constant 88 : index
    %c0_256 = arith.constant 0 : index
    %328 = vector.load %arg30[%c88_255, %c0_256] : memref<160x128xf32, #tpu.memory_space<vmem>>, vector<16x128xf32>
    %329 = tpu.concatenate %327, %328 in 0 : vector<16x128xf32>, vector<16x128xf32> -> vector<32x128xf32>
    %c9_257 = arith.constant 9 : index
    %c0_258 = arith.constant 0 : index
    %330 = vector.load %arg30[%c9_257, %c0_258] : memref<160x128xf32, #tpu.memory_space<vmem>>, vector<16x128xf32>
    %c89_259 = arith.constant 89 : index
    %c0_260 = arith.constant 0 : index
    %331 = vector.load %arg30[%c89_259, %c0_260] : memref<160x128xf32, #tpu.memory_space<vmem>>, vector<16x128xf32>
    %332 = tpu.concatenate %330, %331 in 0 : vector<16x128xf32>, vector<16x128xf32> -> vector<32x128xf32>
    %333 = tpu.concatenate %326, %329, %332 in 1 : vector<32x128xf32>, vector<32x128xf32>, vector<32x128xf32> -> vector<32x384xf32>
    %334 = arith.truncf %333 : vector<32x384xf32> to vector<32x384xbf16>
    %c0_261 = arith.constant 0 : index
    %c0_262 = arith.constant 0 : index
    %335 = vector.load %arg17[%c0_261, %c0_262] : memref<384x128xbf16, #tpu.memory_space<vmem>>, vector<384x128xbf16>
    %cst_263 = arith.constant dense<0.000000e+00> : vector<32x128xf32>
    %336 = tpu.matmul %334, %335, %cst_263 {dimension_numbers = #tpu.dot_dimension_numbers<[1], [0], [0], [1], [0, 0, 1, 1], [], []>} : vector<32x384xbf16>, vector<384x128xbf16>, vector<32x128xf32> -> vector<32x128xf32>
    %337 = tpu.iota {dimensions = array<i32: 0>} : vector<8x16xi32>
    %338 = tpu.iota {dimensions = array<i32: 1>} : vector<8x16xi32>
    %c2_i32_264 = arith.constant 2 : i32
    %339 = vector.broadcast %c2_i32_264 : i32 to vector<8x16xi32>
    %340 = arith.muli %337, %339 : vector<8x16xi32>
    %c0_i32_265 = arith.constant 0 : i32
    %341 = vector.broadcast %c0_i32_265 : i32 to vector<8x16xi32>
    %342 = arith.addi %340, %341 : vector<8x16xi32>
    %343 = arith.cmpi eq, %338, %342 : vector<8x16xi32>
    %344 = arith.extui %343 : vector<8x16xi1> to vector<8x16xi32>
    %345 = arith.sitofp %344 : vector<8x16xi32> to vector<8x16xf32>
    %346 = vector.extract_strided_slice %336 {offsets = [0, 0], sizes = [16, 128], strides = [1, 1]} : vector<32x128xf32> to vector<16x128xf32>
    %cst_266 = arith.constant dense<0.000000e+00> : vector<8x128xf32>
    %347 = tpu.matmul %345, %346, %cst_266 {dimension_numbers = #tpu.dot_dimension_numbers<[1], [0], [0], [1], [0, 0, 1, 1], [], []>} : vector<8x16xf32>, vector<16x128xf32>, vector<8x128xf32> -> vector<8x128xf32>
    %348 = vector.extract_strided_slice %336 {offsets = [16, 0], sizes = [16, 128], strides = [1, 1]} : vector<32x128xf32> to vector<16x128xf32>
    %cst_267 = arith.constant dense<0.000000e+00> : vector<8x128xf32>
    %349 = tpu.matmul %345, %348, %cst_267 {dimension_numbers = #tpu.dot_dimension_numbers<[1], [0], [0], [1], [0, 0, 1, 1], [], []>} : vector<8x16xf32>, vector<16x128xf32>, vector<8x128xf32> -> vector<8x128xf32>
    %350 = tpu.concatenate %347, %349 in 0 : vector<8x128xf32>, vector<8x128xf32> -> vector<16x128xf32>
    %cst_268 = arith.constant dense<0.000000e+00> : vector<128xf32>
    %351 = vector.multi_reduction <add>, %350, %cst_268 [0] : vector<16x128xf32> to vector<128xf32>
    %352 = vector.shape_cast %351 : vector<128xf32> to vector<1x128xf32>
    %cst_269 = arith.constant 1.600000e+01 : f32
    %353 = vector.broadcast %cst_269 : f32 to vector<1x128xf32>
    %354 = arith.divf %352, %353 : vector<1x128xf32>
    %355 = vector.broadcast %354 : vector<1x128xf32> to vector<16x128xf32>
    %356 = arith.subf %350, %355 : vector<16x128xf32>
    %357 = arith.mulf %356, %356 : vector<16x128xf32>
    %cst_270 = arith.constant dense<0.000000e+00> : vector<128xf32>
    %358 = vector.multi_reduction <add>, %357, %cst_270 [0] : vector<16x128xf32> to vector<128xf32>
    %359 = vector.shape_cast %358 : vector<128xf32> to vector<1x128xf32>
    %cst_271 = arith.constant 1.600000e+01 : f32
    %360 = vector.broadcast %cst_271 : f32 to vector<1x128xf32>
    %361 = arith.divf %359, %360 : vector<1x128xf32>
    %362 = vector.broadcast %354 : vector<1x128xf32> to vector<16x128xf32>
    %363 = arith.subf %350, %362 : vector<16x128xf32>
    %cst_272 = arith.constant 9.99999974E-6 : f32
    %364 = vector.broadcast %cst_272 : f32 to vector<1x128xf32>
    %365 = arith.addf %361, %364 : vector<1x128xf32>
    %366 = math.rsqrt %365 : vector<1x128xf32>
    %367 = vector.broadcast %366 : vector<1x128xf32> to vector<16x128xf32>
    %368 = arith.mulf %363, %367 : vector<16x128xf32>
    %c0_273 = arith.constant 0 : index
    %c0_274 = arith.constant 0 : index
    %369 = vector.load %arg18[%c0_273, %c0_274] : memref<1x128xf32, #tpu.memory_space<vmem>>, vector<1x128xf32>
    %370 = vector.broadcast %369 : vector<1x128xf32> to vector<16x128xf32>
    %371 = arith.mulf %368, %370 : vector<16x128xf32>
    %c0_275 = arith.constant 0 : index
    %c0_276 = arith.constant 0 : index
    %372 = vector.load %arg19[%c0_275, %c0_276] : memref<1x128xf32, #tpu.memory_space<vmem>>, vector<1x128xf32>
    %373 = vector.broadcast %372 : vector<1x128xf32> to vector<16x128xf32>
    %374 = arith.addf %371, %373 : vector<16x128xf32>
    %cst_277 = arith.constant 0.000000e+00 : f32
    %375 = vector.broadcast %cst_277 : f32 to vector<16x128xf32>
    %376 = arith.maximumf %374, %375 : vector<16x128xf32>
    %cst_278 = arith.constant 0.000000e+00 : f32
    %377 = vector.broadcast %cst_278 : f32 to vector<1x128xf32>
    %c7_279 = arith.constant 7 : index
    %c0_280 = arith.constant 0 : index
    %378 = vector.load %arg30[%c7_279, %c0_280] : memref<160x128xf32, #tpu.memory_space<vmem>>, vector<1x128xf32>
    tpu.vector_store %arg30[%c7_279, %c0_280], %377 {strides = array<i32>} : memref<160x128xf32, #tpu.memory_space<vmem>>, vector<1x128xf32>,
    %c16 = arith.constant 16 : index
    %c0_281 = arith.constant 0 : index
    %379 = vector.load %arg30[%c16, %c0_281] : memref<160x128xf32, #tpu.memory_space<vmem>>, vector<1x128xf32>
    tpu.vector_store %arg30[%c16, %c0_281], %377 {strides = array<i32>} : memref<160x128xf32, #tpu.memory_space<vmem>>, vector<1x128xf32>,
    %380 = vector.extract_strided_slice %376 {offsets = [0, 0], sizes = [8, 128], strides = [1, 1]} : vector<16x128xf32> to vector<8x128xf32>
    %c8_282 = arith.constant 8 : index
    %c0_283 = arith.constant 0 : index
    %381 = vector.load %arg30[%c8_282, %c0_283] : memref<160x128xf32, #tpu.memory_space<vmem>>, vector<8x128xf32>
    tpu.vector_store %arg30[%c8_282, %c0_283], %380 {strides = array<i32>} : memref<160x128xf32, #tpu.memory_space<vmem>>, vector<8x128xf32>,
    %cst_284 = arith.constant 0.000000e+00 : f32
    %382 = vector.broadcast %cst_284 : f32 to vector<1x128xf32>
    %c87_285 = arith.constant 87 : index
    %c0_286 = arith.constant 0 : index
    %383 = vector.load %arg30[%c87_285, %c0_286] : memref<160x128xf32, #tpu.memory_space<vmem>>, vector<1x128xf32>
    tpu.vector_store %arg30[%c87_285, %c0_286], %382 {strides = array<i32>} : memref<160x128xf32, #tpu.memory_space<vmem>>, vector<1x128xf32>,
    %c96 = arith.constant 96 : index
    %c0_287 = arith.constant 0 : index
    %384 = vector.load %arg30[%c96, %c0_287] : memref<160x128xf32, #tpu.memory_space<vmem>>, vector<1x128xf32>
    tpu.vector_store %arg30[%c96, %c0_287], %382 {strides = array<i32>} : memref<160x128xf32, #tpu.memory_space<vmem>>, vector<1x128xf32>,
    %385 = vector.extract_strided_slice %376 {offsets = [8, 0], sizes = [8, 128], strides = [1, 1]} : vector<16x128xf32> to vector<8x128xf32>
    %c88_288 = arith.constant 88 : index
    %c0_289 = arith.constant 0 : index
    %386 = vector.load %arg30[%c88_288, %c0_289] : memref<160x128xf32, #tpu.memory_space<vmem>>, vector<8x128xf32>
    tpu.vector_store %arg30[%c88_288, %c0_289], %385 {strides = array<i32>} : memref<160x128xf32, #tpu.memory_space<vmem>>, vector<8x128xf32>,
    %c7_290 = arith.constant 7 : index
    %c0_291 = arith.constant 0 : index
    %387 = vector.load %arg30[%c7_290, %c0_291] : memref<160x128xf32, #tpu.memory_space<vmem>>, vector<8x128xf32>
    %c87_292 = arith.constant 87 : index
    %c0_293 = arith.constant 0 : index
    %388 = vector.load %arg30[%c87_292, %c0_293] : memref<160x128xf32, #tpu.memory_space<vmem>>, vector<8x128xf32>
    %389 = tpu.concatenate %387, %388 in 0 : vector<8x128xf32>, vector<8x128xf32> -> vector<16x128xf32>
    %c8_294 = arith.constant 8 : index
    %c0_295 = arith.constant 0 : index
    %390 = vector.load %arg30[%c8_294, %c0_295] : memref<160x128xf32, #tpu.memory_space<vmem>>, vector<8x128xf32>
    %c88_296 = arith.constant 88 : index
    %c0_297 = arith.constant 0 : index
    %391 = vector.load %arg30[%c88_296, %c0_297] : memref<160x128xf32, #tpu.memory_space<vmem>>, vector<8x128xf32>
    %392 = tpu.concatenate %390, %391 in 0 : vector<8x128xf32>, vector<8x128xf32> -> vector<16x128xf32>
    %c9_298 = arith.constant 9 : index
    %c0_299 = arith.constant 0 : index
    %393 = vector.load %arg30[%c9_298, %c0_299] : memref<160x128xf32, #tpu.memory_space<vmem>>, vector<8x128xf32>
    %c89_300 = arith.constant 89 : index
    %c0_301 = arith.constant 0 : index
    %394 = vector.load %arg30[%c89_300, %c0_301] : memref<160x128xf32, #tpu.memory_space<vmem>>, vector<8x128xf32>
    %395 = tpu.concatenate %393, %394 in 0 : vector<8x128xf32>, vector<8x128xf32> -> vector<16x128xf32>
    %396 = tpu.concatenate %389, %392, %395 in 1 : vector<16x128xf32>, vector<16x128xf32>, vector<16x128xf32> -> vector<16x384xf32>
    %397 = arith.truncf %396 : vector<16x384xf32> to vector<16x384xbf16>
    %c0_302 = arith.constant 0 : index
    %c0_303 = arith.constant 0 : index
    %398 = vector.load %arg20[%c0_302, %c0_303] : memref<384x128xbf16, #tpu.memory_space<vmem>>, vector<384x128xbf16>
    %cst_304 = arith.constant dense<0.000000e+00> : vector<16x128xf32>
    %399 = tpu.matmul %397, %398, %cst_304 {dimension_numbers = #tpu.dot_dimension_numbers<[1], [0], [0], [1], [0, 0, 1, 1], [], []>} : vector<16x384xbf16>, vector<384x128xbf16>, vector<16x128xf32> -> vector<16x128xf32>
    %cst_305 = arith.constant dense<0.000000e+00> : vector<128xf32>
    %400 = vector.multi_reduction <add>, %399, %cst_305 [0] : vector<16x128xf32> to vector<128xf32>
    %401 = vector.shape_cast %400 : vector<128xf32> to vector<1x128xf32>
    %cst_306 = arith.constant 1.600000e+01 : f32
    %402 = vector.broadcast %cst_306 : f32 to vector<1x128xf32>
    %403 = arith.divf %401, %402 : vector<1x128xf32>
    %404 = vector.broadcast %403 : vector<1x128xf32> to vector<16x128xf32>
    %405 = arith.subf %399, %404 : vector<16x128xf32>
    %406 = arith.mulf %405, %405 : vector<16x128xf32>
    %cst_307 = arith.constant dense<0.000000e+00> : vector<128xf32>
    %407 = vector.multi_reduction <add>, %406, %cst_307 [0] : vector<16x128xf32> to vector<128xf32>
    %408 = vector.shape_cast %407 : vector<128xf32> to vector<1x128xf32>
    %cst_308 = arith.constant 1.600000e+01 : f32
    %409 = vector.broadcast %cst_308 : f32 to vector<1x128xf32>
    %410 = arith.divf %408, %409 : vector<1x128xf32>
    %411 = vector.broadcast %403 : vector<1x128xf32> to vector<16x128xf32>
    %412 = arith.subf %399, %411 : vector<16x128xf32>
    %cst_309 = arith.constant 9.99999974E-6 : f32
    %413 = vector.broadcast %cst_309 : f32 to vector<1x128xf32>
    %414 = arith.addf %410, %413 : vector<1x128xf32>
    %415 = math.rsqrt %414 : vector<1x128xf32>
    %416 = vector.broadcast %415 : vector<1x128xf32> to vector<16x128xf32>
    %417 = arith.mulf %412, %416 : vector<16x128xf32>
    %c0_310 = arith.constant 0 : index
    %c0_311 = arith.constant 0 : index
    %418 = vector.load %arg21[%c0_310, %c0_311] : memref<1x128xf32, #tpu.memory_space<vmem>>, vector<1x128xf32>
    %419 = vector.broadcast %418 : vector<1x128xf32> to vector<16x128xf32>
    %420 = arith.mulf %417, %419 : vector<16x128xf32>
    %c0_312 = arith.constant 0 : index
    %c0_313 = arith.constant 0 : index
    %421 = vector.load %arg22[%c0_312, %c0_313] : memref<1x128xf32, #tpu.memory_space<vmem>>, vector<1x128xf32>
    %422 = vector.broadcast %421 : vector<1x128xf32> to vector<16x128xf32>
    %423 = arith.addf %420, %422 : vector<16x128xf32>
    %424 = tpu.iota {dimensions = array<i32: 0>} : vector<8x16xi32>
    %425 = tpu.iota {dimensions = array<i32: 1>} : vector<8x16xi32>
    %c2_i32_314 = arith.constant 2 : i32
    %426 = vector.broadcast %c2_i32_314 : i32 to vector<8x16xi32>
    %427 = arith.muli %424, %426 : vector<8x16xi32>
    %c0_i32_315 = arith.constant 0 : i32
    %428 = vector.broadcast %c0_i32_315 : i32 to vector<8x16xi32>
    %429 = arith.addi %427, %428 : vector<8x16xi32>
    %430 = arith.cmpi eq, %425, %429 : vector<8x16xi32>
    %431 = arith.extui %430 : vector<8x16xi1> to vector<8x16xi32>
    %432 = arith.sitofp %431 : vector<8x16xi32> to vector<8x16xf32>
    %433 = vector.extract_strided_slice %313 {offsets = [0, 0], sizes = [16, 128], strides = [1, 1]} : vector<32x128xf32> to vector<16x128xf32>
    %cst_316 = arith.constant dense<0.000000e+00> : vector<8x128xf32>
    %434 = tpu.matmul %432, %433, %cst_316 {dimension_numbers = #tpu.dot_dimension_numbers<[1], [0], [0], [1], [0, 0, 1, 1], [], []>} : vector<8x16xf32>, vector<16x128xf32>, vector<8x128xf32> -> vector<8x128xf32>
    %435 = vector.extract_strided_slice %313 {offsets = [16, 0], sizes = [16, 128], strides = [1, 1]} : vector<32x128xf32> to vector<16x128xf32>
    %cst_317 = arith.constant dense<0.000000e+00> : vector<8x128xf32>
    %436 = tpu.matmul %432, %435, %cst_317 {dimension_numbers = #tpu.dot_dimension_numbers<[1], [0], [0], [1], [0, 0, 1, 1], [], []>} : vector<8x16xf32>, vector<16x128xf32>, vector<8x128xf32> -> vector<8x128xf32>
    %437 = tpu.concatenate %434, %436 in 0 : vector<8x128xf32>, vector<8x128xf32> -> vector<16x128xf32>
    %438 = tpu.iota {dimensions = array<i32: 0>} : vector<8x16xi32>
    %439 = tpu.iota {dimensions = array<i32: 1>} : vector<8x16xi32>
    %c2_i32_318 = arith.constant 2 : i32
    %440 = vector.broadcast %c2_i32_318 : i32 to vector<8x16xi32>
    %441 = arith.muli %438, %440 : vector<8x16xi32>
    %c1_i32 = arith.constant 1 : i32
    %442 = vector.broadcast %c1_i32 : i32 to vector<8x16xi32>
    %443 = arith.addi %441, %442 : vector<8x16xi32>
    %444 = arith.cmpi eq, %439, %443 : vector<8x16xi32>
    %445 = arith.extui %444 : vector<8x16xi1> to vector<8x16xi32>
    %446 = arith.sitofp %445 : vector<8x16xi32> to vector<8x16xf32>
    %447 = vector.extract_strided_slice %313 {offsets = [0, 0], sizes = [16, 128], strides = [1, 1]} : vector<32x128xf32> to vector<16x128xf32>
    %cst_319 = arith.constant dense<0.000000e+00> : vector<8x128xf32>
    %448 = tpu.matmul %446, %447, %cst_319 {dimension_numbers = #tpu.dot_dimension_numbers<[1], [0], [0], [1], [0, 0, 1, 1], [], []>} : vector<8x16xf32>, vector<16x128xf32>, vector<8x128xf32> -> vector<8x128xf32>
    %449 = vector.extract_strided_slice %313 {offsets = [16, 0], sizes = [16, 128], strides = [1, 1]} : vector<32x128xf32> to vector<16x128xf32>
    %cst_320 = arith.constant dense<0.000000e+00> : vector<8x128xf32>
    %450 = tpu.matmul %446, %449, %cst_320 {dimension_numbers = #tpu.dot_dimension_numbers<[1], [0], [0], [1], [0, 0, 1, 1], [], []>} : vector<8x16xf32>, vector<16x128xf32>, vector<8x128xf32> -> vector<8x128xf32>
    %451 = tpu.concatenate %448, %450 in 0 : vector<8x128xf32>, vector<8x128xf32> -> vector<16x128xf32>
    %452 = arith.addf %437, %451 : vector<16x128xf32>
    %cst_321 = arith.constant 5.000000e-01 : f32
    %453 = vector.broadcast %cst_321 : f32 to vector<16x128xf32>
    %454 = arith.mulf %453, %452 : vector<16x128xf32>
    %455 = arith.addf %423, %454 : vector<16x128xf32>
    %cst_322 = arith.constant 0.000000e+00 : f32
    %456 = vector.broadcast %cst_322 : f32 to vector<16x128xf32>
    %457 = arith.maximumf %455, %456 : vector<16x128xf32>
    %458 = vector.extract_strided_slice %457 {offsets = [0, 0], sizes = [8, 128], strides = [1, 1]} : vector<16x128xf32> to vector<8x128xf32>
    %cst_323 = arith.constant dense<0xFF800000> : vector<128xf32>
    %459 = vector.multi_reduction <maximumf>, %458, %cst_323 [0] : vector<8x128xf32> to vector<128xf32>
    %460 = vector.shape_cast %459 : vector<128xf32> to vector<1x128xf32>
    %cst_324 = arith.constant dense<0.000000e+00> : vector<128xf32>
    %461 = vector.multi_reduction <add>, %458, %cst_324 [0] : vector<8x128xf32> to vector<128xf32>
    %462 = vector.shape_cast %461 : vector<128xf32> to vector<1x128xf32>
    %cst_325 = arith.constant 8.000000e+00 : f32
    %463 = vector.broadcast %cst_325 : f32 to vector<1x128xf32>
    %464 = arith.divf %462, %463 : vector<1x128xf32>
    %465 = tpu.concatenate %460, %464 in 1 : vector<1x128xf32>, vector<1x128xf32> -> vector<1x256xf32>
    %466 = vector.extract_strided_slice %457 {offsets = [8, 0], sizes = [8, 128], strides = [1, 1]} : vector<16x128xf32> to vector<8x128xf32>
    %cst_326 = arith.constant dense<0xFF800000> : vector<128xf32>
    %467 = vector.multi_reduction <maximumf>, %466, %cst_326 [0] : vector<8x128xf32> to vector<128xf32>
    %468 = vector.shape_cast %467 : vector<128xf32> to vector<1x128xf32>
    %cst_327 = arith.constant dense<0.000000e+00> : vector<128xf32>
    %469 = vector.multi_reduction <add>, %466, %cst_327 [0] : vector<8x128xf32> to vector<128xf32>
    %470 = vector.shape_cast %469 : vector<128xf32> to vector<1x128xf32>
    %cst_328 = arith.constant 8.000000e+00 : f32
    %471 = vector.broadcast %cst_328 : f32 to vector<1x128xf32>
    %472 = arith.divf %470, %471 : vector<1x128xf32>
    %473 = tpu.concatenate %468, %472 in 1 : vector<1x128xf32>, vector<1x128xf32> -> vector<1x256xf32>
    %474 = tpu.concatenate %465, %473 in 0 : vector<1x256xf32>, vector<1x256xf32> -> vector<2x256xf32>
    %c0_329 = arith.constant 0 : index
    %c0_330 = arith.constant 0 : index
    %475 = vector.load %arg23[%c0_329, %c0_330] : memref<256x128xf32, #tpu.memory_space<vmem>>, vector<256x128xf32>
    %cst_331 = arith.constant dense<0.000000e+00> : vector<2x128xf32>
    %476 = tpu.matmul %474, %475, %cst_331 {dimension_numbers = #tpu.dot_dimension_numbers<[1], [0], [0], [1], [0, 0, 1, 1], [], []>} : vector<2x256xf32>, vector<256x128xf32>, vector<2x128xf32> -> vector<2x128xf32>
    %c0_332 = arith.constant 0 : index
    %c0_333 = arith.constant 0 : index
    %477 = vector.load %arg24[%c0_332, %c0_333] : memref<1x128xf32, #tpu.memory_space<vmem>>, vector<1x128xf32>
    %478 = vector.broadcast %477 : vector<1x128xf32> to vector<2x128xf32>
    %479 = arith.addf %476, %478 : vector<2x128xf32>
    %cst_334 = arith.constant dense<0.000000e+00> : vector<128xf32>
    %480 = vector.multi_reduction <add>, %479, %cst_334 [0] : vector<2x128xf32> to vector<128xf32>
    %481 = vector.shape_cast %480 : vector<128xf32> to vector<1x128xf32>
    %cst_335 = arith.constant 2.000000e+00 : f32
    %482 = vector.broadcast %cst_335 : f32 to vector<1x128xf32>
    %483 = arith.divf %481, %482 : vector<1x128xf32>
    %484 = vector.broadcast %483 : vector<1x128xf32> to vector<2x128xf32>
    %485 = arith.subf %479, %484 : vector<2x128xf32>
    %486 = arith.mulf %485, %485 : vector<2x128xf32>
    %cst_336 = arith.constant dense<0.000000e+00> : vector<128xf32>
    %487 = vector.multi_reduction <add>, %486, %cst_336 [0] : vector<2x128xf32> to vector<128xf32>
    %488 = vector.shape_cast %487 : vector<128xf32> to vector<1x128xf32>
    %cst_337 = arith.constant 2.000000e+00 : f32
    %489 = vector.broadcast %cst_337 : f32 to vector<1x128xf32>
    %490 = arith.divf %488, %489 : vector<1x128xf32>
    %491 = vector.broadcast %483 : vector<1x128xf32> to vector<2x128xf32>
    %492 = arith.subf %479, %491 : vector<2x128xf32>
    %cst_338 = arith.constant 9.99999974E-6 : f32
    %493 = vector.broadcast %cst_338 : f32 to vector<1x128xf32>
    %494 = arith.addf %490, %493 : vector<1x128xf32>
    %495 = math.rsqrt %494 : vector<1x128xf32>
    %496 = vector.broadcast %495 : vector<1x128xf32> to vector<2x128xf32>
    %497 = arith.mulf %492, %496 : vector<2x128xf32>
    %c0_339 = arith.constant 0 : index
    %c0_340 = arith.constant 0 : index
    %498 = vector.load %arg25[%c0_339, %c0_340] : memref<1x128xf32, #tpu.memory_space<vmem>>, vector<1x128xf32>
    %499 = vector.broadcast %498 : vector<1x128xf32> to vector<2x128xf32>
    %500 = arith.mulf %497, %499 : vector<2x128xf32>
    %c0_341 = arith.constant 0 : index
    %c0_342 = arith.constant 0 : index
    %501 = vector.load %arg26[%c0_341, %c0_342] : memref<1x128xf32, #tpu.memory_space<vmem>>, vector<1x128xf32>
    %502 = vector.broadcast %501 : vector<1x128xf32> to vector<2x128xf32>
    %503 = arith.addf %500, %502 : vector<2x128xf32>
    %c0_343 = arith.constant 0 : index
    %c0_344 = arith.constant 0 : index
    %504 = vector.load %arg27[%c0_343, %c0_344] : memref<128x128xf32, #tpu.memory_space<vmem>>, vector<128x128xf32>
    %cst_345 = arith.constant dense<0.000000e+00> : vector<2x128xf32>
    %505 = tpu.matmul %503, %504, %cst_345 {dimension_numbers = #tpu.dot_dimension_numbers<[1], [0], [0], [1], [0, 0, 1, 1], [], []>} : vector<2x128xf32>, vector<128x128xf32>, vector<2x128xf32> -> vector<2x128xf32>
    %c0_346 = arith.constant 0 : index
    %c0_347 = arith.constant 0 : index
    %506 = vector.load %arg28[%c0_346, %c0_347] : memref<1x128xf32, #tpu.memory_space<vmem>>, vector<1x128xf32>
    %507 = vector.broadcast %506 : vector<1x128xf32> to vector<2x128xf32>
    %508 = arith.addf %505, %507 : vector<2x128xf32>
    %c0_348 = arith.constant 0 : index
    %c0_349 = arith.constant 0 : index
    %509 = vector.load %arg29[%c0_348, %c0_349] : memref<2x128xf32, #tpu.memory_space<vmem>>, vector<2x128xf32>
    tpu.vector_store %arg29[%c0_348, %c0_349], %508 {strides = array<i32>} : memref<2x128xf32, #tpu.memory_space<vmem>>, vector<2x128xf32>,
    return
  }
  func.func @transform_0(%arg0: i32) -> (i32, i32) {
    %c0_i32 = arith.constant 0 : i32
    %c0_i32_0 = arith.constant 0 : i32
    %c0_i32_1 = arith.constant 0 : i32
    return %c0_i32, %c0_i32_0 : i32, i32
  }
  func.func @transform_1(%arg0: i32) -> (i32, i32) {
    %c0_i32 = arith.constant 0 : i32
    %c0_i32_0 = arith.constant 0 : i32
    %c0_i32_1 = arith.constant 0 : i32
    return %c0_i32, %c0_i32_0 : i32, i32
  }
  func.func @transform_2(%arg0: i32) -> (i32, i32) {
    %c0_i32 = arith.constant 0 : i32
    %c0_i32_0 = arith.constant 0 : i32
    %c0_i32_1 = arith.constant 0 : i32
    return %c0_i32, %c0_i32_0 : i32, i32
  }
  func.func @transform_3(%arg0: i32) -> (i32, i32) {
    %c0_i32 = arith.constant 0 : i32
    %c0_i32_0 = arith.constant 0 : i32
    %c0_i32_1 = arith.constant 0 : i32
    return %c0_i32, %c0_i32_0 : i32, i32
  }
  func.func @transform_4(%arg0: i32) -> (i32, i32) {
    %c0_i32 = arith.constant 0 : i32
    %c0_i32_0 = arith.constant 0 : i32
    %c0_i32_1 = arith.constant 0 : i32
    return %c0_i32, %c0_i32_0 : i32, i32
  }
  func.func @transform_5(%arg0: i32) -> (i32, i32) {
    %c0_i32 = arith.constant 0 : i32
    %c0_i32_0 = arith.constant 0 : i32
    %c0_i32_1 = arith.constant 0 : i32
    return %c0_i32, %c0_i32_0 : i32, i32
  }
  func.func @transform_6(%arg0: i32) -> (i32, i32) {
    %c0_i32 = arith.constant 0 : i32
    %c0_i32_0 = arith.constant 0 : i32
    %c0_i32_1 = arith.constant 0 : i32
    return %c0_i32, %c0_i32_0 : i32, i32
  }
  func.func @transform_7(%arg0: i32) -> (i32, i32) {
    %c0_i32 = arith.constant 0 : i32
    %c0_i32_0 = arith.constant 0 : i32
    %c0_i32_1 = arith.constant 0 : i32
    return %c0_i32, %c0_i32_0 : i32, i32
  }
  func.func @transform_8(%arg0: i32) -> (i32, i32) {
    %c0_i32 = arith.constant 0 : i32
    %c0_i32_0 = arith.constant 0 : i32
    %c0_i32_1 = arith.constant 0 : i32
    return %c0_i32, %c0_i32_0 : i32, i32
  }
  func.func @transform_9(%arg0: i32) -> (i32, i32) {
    %c0_i32 = arith.constant 0 : i32
    %c0_i32_0 = arith.constant 0 : i32
    %c0_i32_1 = arith.constant 0 : i32
    return %c0_i32, %c0_i32_0 : i32, i32
  }
  func.func @transform_10(%arg0: i32) -> (i32, i32) {
    %c0_i32 = arith.constant 0 : i32
    %c0_i32_0 = arith.constant 0 : i32
    %c0_i32_1 = arith.constant 0 : i32
    return %c0_i32, %c0_i32_0 : i32, i32
  }
  func.func @transform_11(%arg0: i32) -> (i32, i32) {
    %c0_i32 = arith.constant 0 : i32
    %c0_i32_0 = arith.constant 0 : i32
    %c0_i32_1 = arith.constant 0 : i32
    return %c0_i32, %c0_i32_0 : i32, i32
  }
  func.func @transform_12(%arg0: i32) -> (i32, i32) {
    %c0_i32 = arith.constant 0 : i32
    %c0_i32_0 = arith.constant 0 : i32
    %c0_i32_1 = arith.constant 0 : i32
    return %c0_i32, %c0_i32_0 : i32, i32
  }
  func.func @transform_13(%arg0: i32) -> (i32, i32) {
    %c0_i32 = arith.constant 0 : i32
    %c0_i32_0 = arith.constant 0 : i32
    %c0_i32_1 = arith.constant 0 : i32
    return %c0_i32, %c0_i32_0 : i32, i32
  }
  func.func @transform_14(%arg0: i32) -> (i32, i32) {
    %c0_i32 = arith.constant 0 : i32
    %c0_i32_0 = arith.constant 0 : i32
    %c0_i32_1 = arith.constant 0 : i32
    return %c0_i32, %c0_i32_0 : i32, i32
  }
  func.func @transform_15(%arg0: i32) -> (i32, i32) {
    %c0_i32 = arith.constant 0 : i32
    %c0_i32_0 = arith.constant 0 : i32
    %c0_i32_1 = arith.constant 0 : i32
    return %c0_i32, %c0_i32_0 : i32, i32
  }
  func.func @transform_16(%arg0: i32) -> (i32, i32) {
    %c0_i32 = arith.constant 0 : i32
    %c0_i32_0 = arith.constant 0 : i32
    %c0_i32_1 = arith.constant 0 : i32
    return %c0_i32, %c0_i32_0 : i32, i32
  }
  func.func @transform_17(%arg0: i32) -> (i32, i32) {
    %c0_i32 = arith.constant 0 : i32
    %c0_i32_0 = arith.constant 0 : i32
    %c0_i32_1 = arith.constant 0 : i32
    return %c0_i32, %c0_i32_0 : i32, i32
  }
  func.func @transform_18(%arg0: i32) -> (i32, i32) {
    %c0_i32 = arith.constant 0 : i32
    %c0_i32_0 = arith.constant 0 : i32
    %c0_i32_1 = arith.constant 0 : i32
    return %c0_i32, %c0_i32_0 : i32, i32
  }
  func.func @transform_19(%arg0: i32) -> (i32, i32) {
    %c0_i32 = arith.constant 0 : i32
    %c0_i32_0 = arith.constant 0 : i32
    %c0_i32_1 = arith.constant 0 : i32
    return %c0_i32, %c0_i32_0 : i32, i32
  }
  func.func @transform_20(%arg0: i32) -> (i32, i32) {
    %c0_i32 = arith.constant 0 : i32
    %c0_i32_0 = arith.constant 0 : i32
    %c0_i32_1 = arith.constant 0 : i32
    return %c0_i32, %c0_i32_0 : i32, i32
  }
  func.func @transform_21(%arg0: i32) -> (i32, i32) {
    %c0_i32 = arith.constant 0 : i32
    %c0_i32_0 = arith.constant 0 : i32
    %c0_i32_1 = arith.constant 0 : i32
    return %c0_i32, %c0_i32_0 : i32, i32
  }
  func.func @transform_22(%arg0: i32) -> (i32, i32) {
    %c0_i32 = arith.constant 0 : i32
    %c0_i32_0 = arith.constant 0 : i32
    %c0_i32_1 = arith.constant 0 : i32
    return %c0_i32, %c0_i32_0 : i32, i32
  }
  func.func @transform_23(%arg0: i32) -> (i32, i32) {
    %c0_i32 = arith.constant 0 : i32
    %c0_i32_0 = arith.constant 0 : i32
    %c0_i32_1 = arith.constant 0 : i32
    return %c0_i32, %c0_i32_0 : i32, i32
  }
  func.func @transform_24(%arg0: i32) -> (i32, i32) {
    %c0_i32 = arith.constant 0 : i32
    %c0_i32_0 = arith.constant 0 : i32
    %c0_i32_1 = arith.constant 0 : i32
    return %c0_i32, %c0_i32_0 : i32, i32
  }
  func.func @transform_25(%arg0: i32) -> (i32, i32) {
    %c0_i32 = arith.constant 0 : i32
    %c0_i32_0 = arith.constant 0 : i32
    %c0_i32_1 = arith.constant 0 : i32
    return %c0_i32, %c0_i32_0 : i32, i32
  }
  func.func @transform_26(%arg0: i32) -> (i32, i32) {
    %c0_i32 = arith.constant 0 : i32
    %c0_i32_0 = arith.constant 0 : i32
    %c0_i32_1 = arith.constant 0 : i32
    return %c0_i32, %c0_i32_0 : i32, i32
  }
  func.func @transform_27(%arg0: i32) -> (i32, i32) {
    %c0_i32 = arith.constant 0 : i32
    %c0_i32_0 = arith.constant 0 : i32
    %c0_i32_1 = arith.constant 0 : i32
    return %c0_i32, %c0_i32_0 : i32, i32
  }
  func.func @transform_28(%arg0: i32) -> (i32, i32) {
    %c0_i32 = arith.constant 0 : i32
    %c0_i32_0 = arith.constant 0 : i32
    %c0_i32_1 = arith.constant 0 : i32
    return %c0_i32, %c0_i32_0 : i32, i32
  }
}

</mosaic_0001>

<bundles_post_ra>
// kernel: forward.1
= control target key start
LH: loop header
LB: loop body
LE: loop exit
PB: predicated region body
PF: predicated region fallthrough
CT: control target
= control target key end

     0   :  { %s7888_s0 = inlined_call_operand.vmem [shape: f32[128,128], index: 0, kind: input, shape index: {}]   ;;  %s7889_s1 = inlined_call_operand.vmem [shape: bf16[640,128], index: 1, kind: input, shape index: {}]   ;;  %s7890_s2 = inlined_call_operand.vmem [shape: f32[1,128], index: 2, kind: input, shape index: {}]   ;;  %s7891_s3 = inlined_call_operand.hbm [shape: f32[1,128], index: 3, kind: input, shape index: {}]   ;;  %s7892_s4 = inlined_call_operand.hbm [shape: bf16[640,128], index: 4, kind: input, shape index: {}]   ;;  %s7893_s5 = inlined_call_operand.hbm [shape: f32[1,128], index: 5, kind: input, shape index: {}]   ;;  %s7894_s6 = inlined_call_operand.hbm [shape: f32[1,128], index: 6, kind: input, shape index: {}]   ;;  %s7895_s7 = inlined_call_operand.hbm [shape: bf16[640,128], index: 7, kind: input, shape index: {}]   ;;  %s7896_s8 = inlined_call_operand.hbm [shape: f32[1,128], index: 8, kind: input, shape index: {}]   ;;  %s7897_s9 = inlined_call_operand.hbm [shape: f32[1,128], index: 9, kind: input, shape index: {}]   ;;  %s7898_s10 = inlined_call_operand.hbm [shape: bf16[384,128], index: 10, kind: input, shape index: {}]   ;;  %s7899_s11 = inlined_call_operand.hbm [shape: f32[1,128], index: 11, kind: input, shape index: {}]   ;;  %s7900_s12 = inlined_call_operand.hbm [shape: f32[1,128], index: 12, kind: input, shape index: {}]   ;;  %s7901_s13 = inlined_call_operand.hbm [shape: bf16[384,128], index: 13, kind: input, shape index: {}]   ;;  %s7902_s14 = inlined_call_operand.hbm [shape: f32[1,128], index: 14, kind: input, shape index: {}]   ;;  %s7903_s15 = inlined_call_operand.vmem [shape: f32[1,128], index: 15, kind: input, shape index: {}]   ;;  %s7904_s16 = inlined_call_operand.hbm [shape: bf16[384,128], index: 16, kind: input, shape index: {}]   ;;  %s7905_s17 = inlined_call_operand.vmem [shape: f32[1,128], index: 17, kind: input, shape index: {}]   ;;  %s7906_s18 = inlined_call_operand.vmem [shape: f32[1,128], index: 18, kind: input, shape index: {}]   ;;  %s7907_s19 = inlined_call_operand.hbm [shape: bf16[384,128], index: 19, kind: input, shape index: {}]   ;;  %s7908_s20 = inlined_call_operand.vmem [shape: f32[1,128], index: 20, kind: input, shape index: {}]   ;;  %s7909_s21 = inlined_call_operand.vmem [shape: f32[1,128], index: 21, kind: input, shape index: {}]   ;;  %s7910_s22 = inlined_call_operand.hbm [shape: f32[256,128], index: 22, kind: input, shape index: {}]   ;;  %s7911_s23 = inlined_call_operand.vmem [shape: f32[1,128], index: 23, kind: input, shape index: {}]   ;;  %s7912_s24 = inlined_call_operand.vmem [shape: f32[1,128], index: 24, kind: input, shape index: {}]   ;;  %s7913_s25 = inlined_call_operand.vmem [shape: f32[1,128], index: 25, kind: input, shape index: {}]   ;;  %s7914_s26 = inlined_call_operand.vmem [shape: f32[128,128], index: 26, kind: input, shape index: {}]   ;;  %s7915_s27 = inlined_call_operand.vmem [shape: f32[1,128], index: 27, kind: input, shape index: {}]   ;;  %s7916_s28 = inlined_call_operand.hbm [shape: f32[2,128], index: 28, kind: output, shape index: {}]  }
   0x1   :  { %7930 = sst [smem:[#allocation37_spill]] %s7888_s0 }
   0x2   :  { %7931 = sst [smem:[#allocation38_spill]] %s7889_s1 }
   0x3   :  { %7932 = sst [smem:[#allocation39_spill]] %s7890_s2 }
   0x4   :  { %7933 = sst [smem:[#allocation40_spill]] %s7891_s3 }
   0x5   :  { %7934 = sst [smem:[#allocation41_spill]] %s7892_s4 }
   0x6   :  { %7935 = sst [smem:[#allocation42_spill]] %s7893_s5 }
   0x7   :  { %7936 = sst [smem:[#allocation43_spill]] %s7894_s6 }
   0x8   :  { %7937 = sst [smem:[#allocation44_spill]] %s7895_s7 }
   0x9   :  { %7938 = sst [smem:[#allocation45_spill]] %s7896_s8 }
   0xa   :  { %7939 = sst [smem:[#allocation46_spill]] %s7897_s9 }
   0xb   :  { %7940 = sst [smem:[#allocation47_spill]] %s7898_s10 }
   0xc   :  { %7941 = sst [smem:[#allocation48_spill]] %s7899_s11 }
   0xd   :  { %7942 = sst [smem:[#allocation49_spill]] %s7900_s12 }
   0xe   :  { %7943 = sst [smem:[#allocation50_spill]] %s7913_s25 }
   0xf   :  { %7944 = sst [smem:[#allocation51_spill]] %s7915_s27 }
  0x10   :  { %7945 = sst [smem:[#allocation52_spill]] %s7916_s28 }
  0x11   :  { %33 = vsyncpa [#allocation4], 0 }
  0x12   :  { %34 = vsyncpa [#allocation7], 0 }
  0x13   :  { %35 = vsyncpa [#allocation10], 0 }
  0x14   :  { %36 = vsyncpa [#allocation13], 0 }
  0x15   :  { %37 = vsyncpa [#allocation16], 0 }
  0x16   :  { %38 = vsyncpa [#allocation19], 0 }
  0x17   :  { %39 = vsyncpa [#allocation22], 0 }
  0x18   :  { %40 = vsyncpa [#allocation25], 0 }
  0x19   :  { %41 = vsyncpa [#allocation5], 0  ;;  %s6987_s8 = smov [#allocation6]   ;;  %s7946_s3 = sld [smem:[#allocation41_spill]] }
  0x1a   :  { %s63_s5 = sshll.u32 %s6987_s8, 4  ;;  %s64_s5 = int_to_ptr.vmem [resolvable:$true] %s63_s5 }
  0x1f   :  { %s6617_s6 = scalar_lea.hbm %s7946_s3, 5120 }
  0x20   :  { %p6618_p0 = scmp.ne.s32.totalorder %s7946_s3, %s6617_s6  ;;  %p6621_p1 = scmp.lt.u32.totalorder %s6617_s6, %s7946_s3 }
  0x22   :  { %p6623_p2 = pnand %p6621_p1, %p6618_p0 }
  0x24   :  { %6626 = shalt.err (!%p6623_p2)
}
  0x25   :  { %s6627_s2 = scalar_lea.vmem %s64_s5, 5120  ;;  %p6632_p4 = scmp.lt.s32.totalorder %s64_s5, %s64_s5 }
  0x26   :  { %p6628_p3 = scmp.ne.s32.totalorder %s64_s5, %s6627_s2  ;;  %p6633_p5 = scmp.lt.s32.totalorder %s6627_s2, %s6627_s2 }
  0x28   :  { %p6634_p6 = por %p6633_p5, %p6632_p4 }
  0x2a   :  { %p6635_p7 = pnand %p6634_p6, %p6628_p3 }
  0x2c   :  { %6638 = shalt.err (!%p6635_p7)
}
  0x2d   :  { %s6988_s7 = smov 64   ;;  %s6989_s12 = smov 4  }
  0x2e   :  { %69 = dma.hbm_to_vmem [thread:$0]  %s7946_s3, 5120, %s64_s5, [#allocation7], %s6988_s7, %s6988_s7, %s6989_s12  }
  0x2f   :  { %s6990_s8 = smov [#allocation9]   ;;  %s6991_s30 = smov [#allocation12]  }
  0x30   :  { %s86_s9 = sshll.u32 %s6990_s8, 4  ;;  %s108_s6 = sshll.u32 %s6991_s30, 4  ;;  %s87_s9 = int_to_ptr.vmem [resolvable:$true] %s86_s9  ;;  %s109_s6 = int_to_ptr.vmem [resolvable:$true] %s108_s6 }
  0x31   :  { %s7947_s11 = sld [smem:[#allocation43_spill]] }
  0x37   :  { %s6639_s29 = scalar_lea.hbm %s7947_s11, 16 }
  0x38   :  { %p6640_p8 = scmp.ne.s32.totalorder %s7947_s11, %s6639_s29  ;;  %p6643_p9 = scmp.lt.u32.totalorder %s6639_s29, %s7947_s11 }
  0x3a   :  { %p6645_p10 = pnand %p6643_p9, %p6640_p8 }
  0x3c   :  { %6648 = shalt.err (!%p6645_p10)
}
  0x3d   :  { %s6649_s5 = scalar_lea.vmem %s87_s9, 16  ;;  %s6653_s3 = scalar_lea.vmem %s87_s9, 32 }
  0x3e   :  { %p6650_p11 = scmp.ne.s32.totalorder %s87_s9, %s6649_s5  ;;  %p6654_p12 = scmp.lt.s32.totalorder %s87_s9, %s87_s9 }
  0x3f   :  { %p6655_p13 = scmp.lt.s32.totalorder %s6653_s3, %s6649_s5 }
  0x41   :  { %p6656_p0 = por %p6655_p13, %p6654_p12 }
  0x43   :  { %p6657_p1 = pnand %p6656_p0, %p6650_p11 }
  0x45   :  { %6660 = shalt.err (!%p6657_p1)
}
  0x46   :  { %89 = dma.hbm_to_vmem [thread:$0]  %s7947_s11, 16, %s87_s9, [#allocation10]  }
  0x47   :  { %s7948_s30 = sld [smem:[#allocation45_spill]] }
  0x4d   :  { %s6661_s25 = scalar_lea.hbm %s7948_s30, 16 }
  0x4e   :  { %p6662_p2 = scmp.ne.s32.totalorder %s7948_s30, %s6661_s25  ;;  %p6665_p3 = scmp.lt.u32.totalorder %s6661_s25, %s7948_s30 }
  0x50   :  { %p6667_p4 = pnand %p6665_p3, %p6662_p2 }
  0x52   :  { %6670 = shalt.err (!%p6667_p4)
}
  0x53   :  { %s6671_s2 = scalar_lea.vmem %s109_s6, 16  ;;  %s6675_s5 = scalar_lea.vmem %s109_s6, 32 }
  0x54   :  { %p6672_p5 = scmp.ne.s32.totalorder %s109_s6, %s6671_s2  ;;  %p6676_p6 = scmp.lt.s32.totalorder %s109_s6, %s109_s6 }
  0x55   :  { %p6677_p7 = scmp.lt.s32.totalorder %s6675_s5, %s6671_s2 }
  0x57   :  { %p6678_p8 = por %p6677_p7, %p6676_p6 }
  0x59   :  { %p6679_p9 = pnand %p6678_p8, %p6672_p5 }
  0x5b   :  { %6682 = shalt.err (!%p6679_p9)
}
  0x5c   :  { %111 = dma.hbm_to_vmem [thread:$0]  %s7948_s30, 16, %s109_s6, [#allocation13]  }
  0x5d   :  { %s6992_s3 = smov [#allocation15]   ;;  %s6993_s4 = smov [#allocation18]  }
  0x5e   :  { %s127_s1 = sshll.u32 %s6992_s3, 4  ;;  %s150_s28 = sshll.u32 %s6993_s4, 4  ;;  %s128_s1 = int_to_ptr.vmem [resolvable:$true] %s127_s1  ;;  %s151_s28 = int_to_ptr.vmem [resolvable:$true] %s150_s28 }
  0x5f   :  { %s7949_s27 = sld [smem:[#allocation47_spill]] }
  0x65   :  { %s6683_s10 = scalar_lea.hbm %s7949_s27, 3072 }
  0x66   :  { %p6684_p10 = scmp.ne.s32.totalorder %s7949_s27, %s6683_s10  ;;  %p6687_p11 = scmp.lt.u32.totalorder %s6683_s10, %s7949_s27 }
  0x68   :  { %p6689_p12 = pnand %p6687_p11, %p6684_p10 }
  0x6a   :  { %6692 = shalt.err (!%p6689_p12)
}
  0x6b   :  { %s6693_s6 = scalar_lea.vmem %s128_s1, 3072  ;;  %p6698_p0 = scmp.lt.s32.totalorder %s128_s1, %s128_s1 }
  0x6c   :  { %p6694_p13 = scmp.ne.s32.totalorder %s128_s1, %s6693_s6  ;;  %p6699_p1 = scmp.lt.s32.totalorder %s6693_s6, %s6693_s6 }
  0x6e   :  { %p6700_p2 = por %p6699_p1, %p6698_p0 }
  0x70   :  { %p6701_p3 = pnand %p6700_p2, %p6694_p13 }
  0x72   :  { %6704 = shalt.err (!%p6701_p3)
}
  0x73   :  { %133 = dma.hbm_to_vmem [thread:$0]  %s7949_s27, 3072, %s128_s1, [#allocation16], %s6988_s7, %s6988_s7, %s6989_s12  }
  0x74   :  { %s7950_s4 = sld [smem:[#allocation49_spill]] }
  0x7a   :  { %s6705_s8 = scalar_lea.hbm %s7950_s4, 16 }
  0x7b   :  { %p6706_p4 = scmp.ne.s32.totalorder %s7950_s4, %s6705_s8  ;;  %p6709_p5 = scmp.lt.u32.totalorder %s6705_s8, %s7950_s4 }
  0x7d   :  { %p6711_p6 = pnand %p6709_p5, %p6706_p4 }
  0x7f   :  { %6714 = shalt.err (!%p6711_p6)
}
  0x80   :  { %s6715_s2 = scalar_lea.vmem %s151_s28, 16  ;;  %s6719_s5 = scalar_lea.vmem %s151_s28, 32 }
  0x81   :  { %p6716_p7 = scmp.ne.s32.totalorder %s151_s28, %s6715_s2  ;;  %p6720_p8 = scmp.lt.s32.totalorder %s151_s28, %s151_s28 }
  0x82   :  { %p6721_p9 = scmp.lt.s32.totalorder %s6719_s5, %s6715_s2 }
  0x84   :  { %p6722_p10 = por %p6721_p9, %p6720_p8 }
  0x86   :  { %p6723_p11 = pnand %p6722_p10, %p6716_p7 }
  0x88   :  { %6726 = shalt.err (!%p6723_p11)
}
  0x89   :  { %153 = dma.hbm_to_vmem [thread:$0]  %s7950_s4, 16, %s151_s28, [#allocation19]  }
  0x8a   :  { %s6994_s6 = smov [#allocation21]   ;;  %s6995_s9 = smov [#allocation24]  }
  0x8b   :  { %s172_s30 = sshll.u32 %s6994_s6, 4  ;;  %s199_s11 = sshll.u32 %s6995_s9, 4  ;;  %s173_s30 = int_to_ptr.vmem [resolvable:$true] %s172_s30  ;;  %s200_s11 = int_to_ptr.vmem [resolvable:$true] %s199_s11 }
  0x8c   :  { %s6727_s25 = scalar_lea.hbm %s7902_s14, 16 }
  0x8d   :  { %p6728_p12 = scmp.ne.s32.totalorder %s7902_s14, %s6727_s25  ;;  %p6731_p13 = scmp.lt.u32.totalorder %s6727_s25, %s7902_s14 }
  0x8f   :  { %p6733_p0 = pnand %p6731_p13, %p6728_p12 }
  0x91   :  { %6736 = shalt.err (!%p6733_p0)
}
  0x92   :  { %s6737_s28 = scalar_lea.vmem %s173_s30, 16  ;;  %s6741_s4 = scalar_lea.vmem %s173_s30, 32 }
  0x93   :  { %p6738_p1 = scmp.ne.s32.totalorder %s173_s30, %s6737_s28  ;;  %p6742_p2 = scmp.lt.s32.totalorder %s173_s30, %s173_s30 }
  0x94   :  { %p6743_p3 = scmp.lt.s32.totalorder %s6741_s4, %s6737_s28 }
  0x96   :  { %p6744_p4 = por %p6743_p3, %p6742_p2 }
  0x98   :  { %p6745_p5 = pnand %p6744_p4, %p6738_p1 }
  0x9a   :  { %6748 = shalt.err (!%p6745_p5)
}
  0x9b   :  { %175 = dma.hbm_to_vmem [thread:$0]  %s7902_s14, 16, %s173_s30, [#allocation22]  }
  0x9c   :  { %s6749_s9 = scalar_lea.hbm %s7907_s19, 3072 }
  0x9d   :  { %p6750_p6 = scmp.ne.s32.totalorder %s7907_s19, %s6749_s9  ;;  %p6753_p7 = scmp.lt.u32.totalorder %s6749_s9, %s7907_s19 }
  0x9f   :  { %p6755_p8 = pnand %p6753_p7, %p6750_p6 }
  0xa1   :  { %6758 = shalt.err (!%p6755_p8)
}
  0xa2   :  { %s6759_s0 = scalar_lea.vmem %s200_s11, 3072  ;;  %p6764_p10 = scmp.lt.s32.totalorder %s200_s11, %s200_s11 }
  0xa3   :  { %p6760_p9 = scmp.ne.s32.totalorder %s200_s11, %s6759_s0  ;;  %p6765_p11 = scmp.lt.s32.totalorder %s6759_s0, %s6759_s0 }
  0xa5   :  { %p6766_p12 = por %p6765_p11, %p6764_p10 }
  0xa7   :  { %p6767_p13 = pnand %p6766_p12, %p6760_p9 }
  0xa9   :  { %6770 = shalt.err (!%p6767_p13)
}
  0xaa   :  { %205 = dma.hbm_to_vmem [thread:$0]  %s7907_s19, 3072, %s200_s11, [#allocation25], %s6988_s7, %s6988_s7, %s6989_s12  }
  0xab   :  { %s6996_s29 = smov [#allocation3]   ;;  %s6997_s28 = smov [#allocation8]  }
  0xac   :  { %s54_s2 = sshll.u32 %s6996_s29, 4  ;;  %s76_s4 = sshll.u32 %s6997_s28, 4  ;;  %s55_s2 = int_to_ptr.vmem [resolvable:$true] %s54_s2  ;;  %s77_s4 = int_to_ptr.vmem [resolvable:$true] %s76_s4 }
  0xad   :  { %s7951_s27 = sld [smem:[#allocation40_spill]] }
  0xb3   :  { %s6771_s6 = scalar_lea.hbm %s7951_s27, 16 }
  0xb4   :  { %p6772_p0 = scmp.ne.s32.totalorder %s7951_s27, %s6771_s6  ;;  %p6775_p1 = scmp.lt.u32.totalorder %s6771_s6, %s7951_s27 }
  0xb6   :  { %p6777_p2 = pnand %p6775_p1, %p6772_p0 }
  0xb8   :  { %6780 = shalt.err (!%p6777_p2)
}
  0xb9   :  { %s6781_s19 = scalar_lea.vmem %s55_s2, 16  ;;  %s6785_s11 = scalar_lea.vmem %s55_s2, 32 }
  0xba   :  { %p6782_p3 = scmp.ne.s32.totalorder %s55_s2, %s6781_s19  ;;  %p6786_p4 = scmp.lt.s32.totalorder %s55_s2, %s55_s2 }
  0xbb   :  { %p6787_p5 = scmp.lt.s32.totalorder %s6785_s11, %s6781_s19 }
  0xbd   :  { %p6788_p6 = por %p6787_p5, %p6786_p4 }
  0xbf   :  { %p6789_p7 = pnand %p6788_p6, %p6782_p3 }
  0xc1   :  { %6792 = shalt.err (!%p6789_p7)
}
  0xc2   :  { %57 = dma.hbm_to_vmem [thread:$0]  %s7951_s27, 16, %s55_s2, [#allocation4]  }
  0xc3   :  { %s7952_s29 = sld [smem:[#allocation42_spill]] }
  0xc9   :  { %s6793_s28 = scalar_lea.hbm %s7952_s29, 16 }
  0xca   :  { %p6794_p8 = scmp.ne.s32.totalorder %s7952_s29, %s6793_s28  ;;  %p6797_p9 = scmp.lt.u32.totalorder %s6793_s28, %s7952_s29 }
  0xcc   :  { %p6799_p10 = pnand %p6797_p9, %p6794_p8 }
  0xce   :  { %6802 = shalt.err (!%p6799_p10)
}
  0xcf   :  { %s6803_s3 = scalar_lea.vmem %s77_s4, 16  ;;  %s6807_s8 = scalar_lea.vmem %s77_s4, 32 }
  0xd0   :  { %p6804_p11 = scmp.ne.s32.totalorder %s77_s4, %s6803_s3  ;;  %p6808_p12 = scmp.lt.s32.totalorder %s77_s4, %s77_s4 }
  0xd1   :  { %p6809_p13 = scmp.lt.s32.totalorder %s6807_s8, %s6803_s3 }
  0xd3   :  { %p6810_p0 = por %p6809_p13, %p6808_p12 }
  0xd5   :  { %p6811_p1 = pnand %p6810_p0, %p6804_p11 }
  0xd7   :  { %6814 = shalt.err (!%p6811_p1)
}
  0xd8   :  { %79 = dma.hbm_to_vmem [thread:$0]  %s7952_s29, 16, %s77_s4, [#allocation7]  }
  0xd9   :  { %s6998_s25 = smov [#allocation11]   ;;  %s6999_s11 = smov [#allocation14]  }
  0xda   :  { %s95_s19 = sshll.u32 %s6998_s25, 4  ;;  %s118_s10 = sshll.u32 %s6999_s11, 4  ;;  %s96_s19 = int_to_ptr.vmem [resolvable:$true] %s95_s19  ;;  %s119_s10 = int_to_ptr.vmem [resolvable:$true] %s118_s10 }
  0xdb   :  { %s7953_s30 = sld [smem:[#allocation44_spill]] }
  0xe1   :  { %s6815_s28 = scalar_lea.hbm %s7953_s30, 5120 }
  0xe2   :  { %p6816_p2 = scmp.ne.s32.totalorder %s7953_s30, %s6815_s28  ;;  %p6819_p3 = scmp.lt.u32.totalorder %s6815_s28, %s7953_s30 }
  0xe4   :  { %p6821_p4 = pnand %p6819_p3, %p6816_p2 }
  0xe6   :  { %6824 = shalt.err (!%p6821_p4)
}
  0xe7   :  { %s6825_s4 = scalar_lea.vmem %s96_s19, 5120  ;;  %p6830_p6 = scmp.lt.s32.totalorder %s96_s19, %s96_s19 }
  0xe8   :  { %p6826_p5 = scmp.ne.s32.totalorder %s96_s19, %s6825_s4  ;;  %p6831_p7 = scmp.lt.s32.totalorder %s6825_s4, %s6825_s4 }
  0xea   :  { %p6832_p8 = por %p6831_p7, %p6830_p6 }
  0xec   :  { %p6833_p9 = pnand %p6832_p8, %p6826_p5 }
  0xee   :  { %6836 = shalt.err (!%p6833_p9)
}
  0xef   :  { %101 = dma.hbm_to_vmem [thread:$0]  %s7953_s30, 5120, %s96_s19, [#allocation10], %s6988_s7, %s6988_s7, %s6989_s12  }
  0xf0   :  { %s7954_s27 = sld [smem:[#allocation46_spill]] }
  0xf6   :  { %s6837_s25 = scalar_lea.hbm %s7954_s27, 16 }
  0xf7   :  { %p6838_p10 = scmp.ne.s32.totalorder %s7954_s27, %s6837_s25  ;;  %p6841_p11 = scmp.lt.u32.totalorder %s6837_s25, %s7954_s27 }
  0xf9   :  { %p6843_p12 = pnand %p6841_p11, %p6838_p10 }
  0xfb   :  { %6846 = shalt.err (!%p6843_p12)
}
  0xfc   :  { %s6847_s5 = scalar_lea.vmem %s119_s10, 16  ;;  %s6851_s1 = scalar_lea.vmem %s119_s10, 32 }
  0xfd   :  { %p6848_p13 = scmp.ne.s32.totalorder %s119_s10, %s6847_s5  ;;  %p6852_p0 = scmp.lt.s32.totalorder %s119_s10, %s119_s10 }
  0xfe   :  { %p6853_p1 = scmp.lt.s32.totalorder %s6851_s1, %s6847_s5 }
 0x100   :  { %p6854_p2 = por %p6853_p1, %p6852_p0 }
 0x102   :  { %p6855_p3 = pnand %p6854_p2, %p6848_p13 }
 0x104   :  { %6858 = shalt.err (!%p6855_p3)
}
 0x105   :  { %121 = dma.hbm_to_vmem [thread:$0]  %s7954_s27, 16, %s119_s10, [#allocation13]  }
 0x106   :  { %s7000_s6 = smov [#allocation17]   ;;  %s7001_s4 = smov [#allocation20]  }
 0x107   :  { %s140_s9 = sshll.u32 %s7000_s6, 4  ;;  %s159_s29 = sshll.u32 %s7001_s4, 4  ;;  %s141_s9 = int_to_ptr.vmem [resolvable:$true] %s140_s9  ;;  %s160_s29 = int_to_ptr.vmem [resolvable:$true] %s159_s29 }
 0x108   :  { %s7955_s2 = sld [smem:[#allocation48_spill]] }
 0x10e   :  { %s6859_s25 = scalar_lea.hbm %s7955_s2, 16 }
 0x10f   :  { %p6860_p4 = scmp.ne.s32.totalorder %s7955_s2, %s6859_s25  ;;  %p6863_p5 = scmp.lt.u32.totalorder %s6859_s25, %s7955_s2 }
 0x111   :  { %p6865_p6 = pnand %p6863_p5, %p6860_p4 }
 0x113   :  { %6868 = shalt.err (!%p6865_p6)
}
 0x114   :  { %s6869_s10 = scalar_lea.vmem %s141_s9, 16  ;;  %s6873_s27 = scalar_lea.vmem %s141_s9, 32 }
 0x115   :  { %p6870_p7 = scmp.ne.s32.totalorder %s141_s9, %s6869_s10  ;;  %p6874_p8 = scmp.lt.s32.totalorder %s141_s9, %s141_s9 }
 0x116   :  { %p6875_p9 = scmp.lt.s32.totalorder %s6873_s27, %s6869_s10 }
 0x118   :  { %p6876_p10 = por %p6875_p9, %p6874_p8 }
 0x11a   :  { %p6877_p11 = pnand %p6876_p10, %p6870_p7 }
 0x11c   :  { %6880 = shalt.err (!%p6877_p11)
}
 0x11d   :  { %143 = dma.hbm_to_vmem [thread:$0]  %s7955_s2, 16, %s141_s9, [#allocation16]  }
 0x11e   :  { %s6881_s6 = scalar_lea.hbm %s7901_s13, 3072 }
 0x11f   :  { %p6882_p12 = scmp.ne.s32.totalorder %s7901_s13, %s6881_s6  ;;  %p6885_p13 = scmp.lt.u32.totalorder %s6881_s6, %s7901_s13 }
 0x121   :  { %p6887_p0 = pnand %p6885_p13, %p6882_p12 }
 0x123   :  { %6890 = shalt.err (!%p6887_p0)
}
 0x124   :  { %s6891_s11 = scalar_lea.vmem %s160_s29, 3072  ;;  %p6896_p2 = scmp.lt.s32.totalorder %s160_s29, %s160_s29 }
 0x125   :  { %p6892_p1 = scmp.ne.s32.totalorder %s160_s29, %s6891_s11  ;;  %p6897_p3 = scmp.lt.s32.totalorder %s6891_s11, %s6891_s11 }
 0x127   :  { %p6898_p4 = por %p6897_p3, %p6896_p2 }
 0x129   :  { %p6899_p5 = pnand %p6898_p4, %p6892_p1 }
 0x12b   :  { %6902 = shalt.err (!%p6899_p5)
}
 0x12c   :  { %165 = dma.hbm_to_vmem [thread:$0]  %s7901_s13, 3072, %s160_s29, [#allocation19], %s6988_s7, %s6988_s7, %s6989_s12  }
 0x12d   :  { %s7002_s0 = smov [#allocation23]   ;;  %s7003_s28 = smov [#allocation26]  }
 0x12e   :  { %s183_s14 = sshll.u32 %s7002_s0, 4  ;;  %s215_s10 = sshll.u32 %s7003_s28, 4  ;;  %s184_s14 = int_to_ptr.vmem [resolvable:$true] %s183_s14  ;;  %s216_s10 = int_to_ptr.vmem [resolvable:$true] %s215_s10 }
 0x12f   :  { %s6903_s1 = scalar_lea.hbm %s7904_s16, 3072 }
 0x130   :  { %p6904_p6 = scmp.ne.s32.totalorder %s7904_s16, %s6903_s1  ;;  %p6907_p7 = scmp.lt.u32.totalorder %s6903_s1, %s7904_s16 }
 0x132   :  { %p6909_p8 = pnand %p6907_p7, %p6904_p6 }
 0x134   :  { %6912 = shalt.err (!%p6909_p8)
}
 0x135   :  { %s6913_s13 = scalar_lea.vmem %s184_s14, 3072  ;;  %p6918_p10 = scmp.lt.s32.totalorder %s184_s14, %s184_s14 }
 0x136   :  { %p6914_p9 = scmp.ne.s32.totalorder %s184_s14, %s6913_s13  ;;  %p6919_p11 = scmp.lt.s32.totalorder %s6913_s13, %s6913_s13 }
 0x138   :  { %p6920_p12 = por %p6919_p11, %p6918_p10 }
 0x13a   :  { %p6921_p13 = pnand %p6920_p12, %p6914_p9 }
 0x13c   :  { %6924 = shalt.err (!%p6921_p13)
}
 0x13d   :  { %189 = dma.hbm_to_vmem [thread:$0]  %s7904_s16, 3072, %s184_s14, [#allocation22], %s6988_s7, %s6988_s7, %s6989_s12  }
 0x13e   :  { %s6925_s11 = scalar_lea.hbm %s7910_s22, 4096 }
 0x13f   :  { %p6926_p0 = scmp.ne.s32.totalorder %s7910_s22, %s6925_s11  ;;  %p6929_p1 = scmp.lt.u32.totalorder %s6925_s11, %s7910_s22 }
 0x141   :  { %p6931_p2 = pnand %p6929_p1, %p6926_p0 }
 0x143   :  { %6934 = shalt.err (!%p6931_p2)
}
 0x144   :  { %s6935_s27 = scalar_lea.vmem %s216_s10, 4096  ;;  %p6940_p4 = scmp.lt.s32.totalorder %s216_s10, %s216_s10 }
 0x145   :  { %p6936_p3 = scmp.ne.s32.totalorder %s216_s10, %s6935_s27  ;;  %p6941_p5 = scmp.lt.s32.totalorder %s6935_s27, %s6935_s27 }
 0x147   :  { %p6942_p6 = por %p6941_p5, %p6940_p4 }
 0x149   :  { %p6943_p7 = pnand %p6942_p6, %p6936_p3 }
 0x14b   :  { %6946 = shalt.err (!%p6943_p7)
}
 0x14c   :  { %s7004_s16 = smov 128   ;;  %s7005_s7 = smov 8  }
 0x14d   :  { %221 = dma.hbm_to_vmem [thread:$0]  %s7910_s22, 4096, %s216_s10, [#allocation25], %s7004_s16, %s7004_s16, %s7005_s7  }
 0x14e   :  { %6969 = dma.done.wait [#allocation4], 16  }
 0x14f   :  { %6970 = vsyncadd [#allocation4], 4294967280 }
 0x150   :  { %6971 = dma.done.wait [#allocation7], 5136  }
 0x151   :  { %6972 = vsyncadd [#allocation7], 4294962160 }
 0x152   :  { %6973 = dma.done.wait [#allocation10], 5136  }
 0x153   :  { %6974 = vsyncadd [#allocation10], 4294962160 }
 0x154   :  { %6975 = dma.done.wait [#allocation13], 32  }
 0x155   :  { %6976 = vsyncadd [#allocation13], 4294967264 }
 0x156   :  { %6977 = dma.done.wait [#allocation16], 3088  }
 0x157   :  { %6978 = vsyncadd [#allocation16], 4294964208 }
 0x158   :  { %6979 = dma.done.wait [#allocation19], 3088  }
 0x159   :  { %6980 = vsyncadd [#allocation19], 4294964208 }
 0x15a   :  { %6981 = dma.done.wait [#allocation22], 3088  }
 0x15b   :  { %6982 = vsyncadd [#allocation22], 4294964208 }
 0x15c   :  { %6983 = dma.done.wait [#allocation25], 7168  }
 0x15d   :  { %6984 = vsyncadd [#allocation25], 4294960128  ;;  %v7006_v0 = vmov 0.0   ;;  %s7956_s5 = sld [smem:[#allocation38_spill]]  ;;  %s7957_s22 = sld [smem:[#allocation37_spill]]  ;;  %vm1068_vm1 = vcmask 523264  }
 0x15e   :  { %294 = vst [vmem:[#allocation2 + $0x6] sm:$0x3] %v7006_v0  ;;  %295 = vst [vmem:[#allocation2 + $0x48] sm:$0x3] %v7006_v0  ;;  %s7958_s6 = sld [smem:[#allocation39_spill]]  ;;  %vm2754_vm5 = vcmask 261120  }
 0x15f   :  { %304 = vst [vmem:[#allocation2 + $0x56] sm:$0x3] %v7006_v0  ;;  %305 = vst [vmem:[#allocation2 + $0x98] sm:$0x3] %v7006_v0  ;;  %vm7009_vm6 = vmmov 0   ;;  %vm3982_vm7 = vcmask 130048  }
 0x160   :  { %vm4829_vm9 = vcmask 1040384   ;;  %vm4941_vm10 = vcmask 1041408   ;;  %s7959_s7 = sld [smem:[#allocation50_spill]]  ;;  %s7010_s10 = smov [#allocation27]  }
 0x161   :  { %s5080_s1 = sshll.u32 %s7010_s10, 4  ;;  %s5081_s1 = int_to_ptr.vmem [resolvable:$true] %s5080_s1 }
 0x162   :  { %p6952_p9 = scmp.lt.s32.totalorder %s5081_s1, %s5081_s1 }
 0x163   :  { %v6385_v1 = vld [vmem:[%s7956_s5 + $0x40] sm:$0xff]   ;;  %v6389_v5 = vld [vmem:[%s7956_s5 + $0x48] sm:$0xff]   ;;  %v6393_v9 = vld [vmem:[%s7956_s5 + $0x50] sm:$0xff]  }
 0x164   :  { %v6386_v2 = vld [vmem:[%s7956_s5 + $0xc0] sm:$0xff]   ;;  %5353 = vmatprep.subr.bf16.mxu0 %v6385_v1  ;;  %v6390_v6 = vld [vmem:[%s7956_s5 + $0xc8] sm:$0xff]   ;;  %v6394_v10 = vld [vmem:[%s7956_s5 + $0xd0] sm:$0xff]  }
 0x165   :  { %v6387_v3 = vld [vmem:[%s7956_s5] sm:$0xff]   ;;  %5417 = vmatprep.subr.bf16.mxu1 %v6386_v2  ;;  %v6391_v7 = vld [vmem:[%s7956_s5 + $0x8] sm:$0xff]   ;;  %v6395_v11 = vld [vmem:[%s7956_s5 + $0x10] sm:$0xff]  }
 0x166   :  { %v6388_v4 = vld [vmem:[%s7956_s5 + $0x80] sm:$0xff]   ;;  %5354 = vmatpush3.bf16.msra.mxu0 %v6387_v3  ;;  %v6392_v8 = vld [vmem:[%s7956_s5 + $0x88] sm:$0xff]   ;;  %v6396_v12 = vld [vmem:[%s7956_s5 + $0x90] sm:$0xff]  }
 0x167   :  { %5418 = vmatpush3.bf16.msra.mxu1 %v6388_v4  ;;  %5355 = vmatprep.subr.bf16.mxu0 %v6389_v5  ;;  %v6397_v13 = vld [vmem:[%s7956_s5 + $0x58] sm:$0xff]   ;;  %v6401_v17 = vld [vmem:[%s7956_s5 + $0x60] sm:$0xff]   ;;  %v6405_v21 = vld [vmem:[%s7956_s5 + $0x68] sm:$0xff]  }
 0x168   :  { %5419 = vmatprep.subr.bf16.mxu1 %v6390_v6  ;;  %v6398_v14 = vld [vmem:[%s7956_s5 + $0xd8] sm:$0xff]   ;;  %v6402_v18 = vld [vmem:[%s7956_s5 + $0xe0] sm:$0xff]   ;;  %v6406_v22 = vld [vmem:[%s7956_s5 + $0xe8] sm:$0xff]  }
 0x169   :  { %v6399_v15 = vld [vmem:[%s7956_s5 + $0x18] sm:$0xff]   ;;  %v6403_v19 = vld [vmem:[%s7956_s5 + $0x20] sm:$0xff]   ;;  %v6407_v23 = vld [vmem:[%s7956_s5 + $0x28] sm:$0xff]  }
 0x16a   :  { %5356 = vmatpush3.bf16.msra.mxu0 %v6391_v7  ;;  %v6400_v16 = vld [vmem:[%s7956_s5 + $0x98] sm:$0xff]   ;;  %v6404_v20 = vld [vmem:[%s7956_s5 + $0xa0] sm:$0xff]   ;;  %v6408_v24 = vld [vmem:[%s7956_s5 + $0xa8] sm:$0xff]  }
 0x16b   :  { %5420 = vmatpush3.bf16.msra.mxu1 %v6392_v8  ;;  %5357 = vmatprep.subr.bf16.mxu0 %v6393_v9  ;;  %v6409_v25 = vld [vmem:[%s7956_s5 + $0x70] sm:$0xff]   ;;  %v6413_v29 = vld [vmem:[%s7956_s5 + $0x78] sm:$0xff]   ;;  %v278_v33 = vld [vmem:[%s7957_s22] sm:$0xff] }
 0x16c   :  { %5421 = vmatprep.subr.bf16.mxu1 %v6394_v10  ;;  %v6410_v26 = vld [vmem:[%s7956_s5 + $0xf0] sm:$0xff]   ;;  %v6414_v30 = vld [vmem:[%s7956_s5 + $0xf8] sm:$0xff]   ;;  %v279_v34 = vld [vmem:[%s7957_s22 + $0x8] sm:$0xff]  ;;  %296 = vst [vmem:[#allocation2 + $0x8] sm:$0xff] %v278_v33 }
 0x16d   :  { %v6411_v27 = vld [vmem:[%s7956_s5 + $0x30] sm:$0xff]   ;;  %v6415_v31 = vld [vmem:[%s7956_s5 + $0x38] sm:$0xff]   ;;  %297 = vst [vmem:[#allocation2 + $0x10] sm:$0xff] %v279_v34  ;;  %v7474_v37 = vld [vmem:[%s7957_s22 + $0x20] sm:$0xff]  ;;  %v396_v54 = vpack.c.bf16 %v279_v34, %v278_v33 }
 0x16e   :  { %5358 = vmatpush3.bf16.msra.mxu0 %v6395_v11  ;;  %v6412_v28 = vld [vmem:[%s7956_s5 + $0xb0] sm:$0xff]   ;;  %v6416_v32 = vld [vmem:[%s7956_s5 + $0xb8] sm:$0xff]   ;;  %v7479_v38 = vld [vmem:[%s7957_s22 + $0x28] sm:$0xff]  ;;  %300 = vst [vmem:[#allocation2 + $0x28] sm:$0xff] %v7474_v37 }
 0x16f   :  { %5422 = vmatpush3.bf16.msra.mxu1 %v6396_v12  ;;  %5359 = vmatprep.subr.bf16.mxu0 %v6397_v13  ;;  %v7463_v35 = vld [vmem:[%s7957_s22 + $0x10] sm:$0xff]  ;;  %v7469_v36 = vld [vmem:[%s7957_s22 + $0x18] sm:$0xff]  ;;  %301 = vst [vmem:[#allocation2 + $0x30] sm:$0xff] %v7479_v38  ;;  %v7497_v41 = vld [vmem:[%s7957_s22 + $0x40] sm:$0xff] }
 0x170   :  { %5423 = vmatprep.subr.bf16.mxu1 %v6398_v14  ;;  %298 = vst [vmem:[#allocation2 + $0x18] sm:$0xff] %v7463_v35  ;;  %299 = vst [vmem:[#allocation2 + $0x20] sm:$0xff] %v7469_v36  ;;  %v7487_v39 = vld [vmem:[%s7957_s22 + $0x30] sm:$0xff]  ;;  %v7492_v40 = vld [vmem:[%s7957_s22 + $0x38] sm:$0xff]  ;;  %v401_v9 = vpack.c.bf16 %v7469_v36, %v7463_v35 }
 0x171   :  { %302 = vst [vmem:[#allocation2 + $0x38] sm:$0xff] %v7487_v39  ;;  %303 = vst [vmem:[#allocation2 + $0x40] sm:$0xff] %v7492_v40  ;;  %v7504_v42 = vld [vmem:[%s7957_s22 + $0x48] sm:$0xff]  ;;  %v7510_v43 = vld [vmem:[%s7957_s22 + $0x50] sm:$0xff] }
 0x172   :  { %5360 = vmatpush3.bf16.msra.mxu0 %v6399_v15  ;;  %306 = vst [vmem:[#allocation2 + $0x58] sm:$0xff] %v7497_v41  ;;  %307 = vst [vmem:[#allocation2 + $0x60] sm:$0xff] %v7504_v42  ;;  %v6417_v44 = vld [vmem:[%s7956_s5 + $0x100] sm:$0xff]   ;;  %v7520_v45 = vld [vmem:[%s7957_s22 + $0x58] sm:$0xff] }
 0x173   :  { %5424 = vmatpush3.bf16.msra.mxu1 %v6400_v16  ;;  %5361 = vmatprep.subr.bf16.mxu0 %v6401_v17  ;;  %308 = vst [vmem:[#allocation2 + $0x68] sm:$0xff] %v7510_v43  ;;  %309 = vst [vmem:[#allocation2 + $0x70] sm:$0xff] %v7520_v45  ;;  %v7526_v46 = vld [vmem:[%s7957_s22 + $0x60] sm:$0xff]  ;;  %v6418_v62 = vld [vmem:[%s7956_s5 + $0x108] sm:$0xff]  }
 0x174   :  { %5425 = vmatprep.subr.bf16.mxu1 %v6402_v18  ;;  %310 = vst [vmem:[#allocation2 + $0x78] sm:$0xff] %v7526_v46  ;;  %v330_v47 = vld [vmem:[#allocation2 + $0x7] sm:$0xff]  ;;  %v331_v48 = vld [vmem:[#allocation2 + $0xf] sm:$0xff]  ;;  %v6420_v18 = vld [vmem:[%s7956_s5 + $0x118] sm:$0xff]  }
 0x175   :  { %v362_v49 = vld [vmem:[#allocation2 + $0x9] sm:$0xff]  ;;  %v395_v50 = vpack.c.bf16 %v331_v48, %v330_v47  ;;  %v411_v47 = vpack.c.bf16 %v7492_v40, %v7487_v39 }
 0x176   :  { %5362 = vmatpush3.bf16.msra.mxu0 %v6403_v19  ;;  %v314_v52 = vld [vmem:[#allocation2 + $0x6] sm:$0xff]  ;;  %v315_v53 = vld [vmem:[#allocation2 + $0xe] sm:$0xff] }
 0x177   :  { %5426 = vmatpush3.bf16.msra.mxu1 %v6404_v20  ;;  %5363 = vmatprep.subr.bf16.mxu0 %v6405_v21  ;;  %v363_v51 = vld [vmem:[#allocation2 + $0x11] sm:$0xff]  ;;  %v394_v56 = vpack.c.bf16 %v315_v53, %v314_v52  ;;  %1344 = vst [vmem:[#allocation2 + $0x6] sm:$0x3] %v7006_v0  ;;  %v333_v58 = vld [vmem:[#allocation2 + $0x1f] sm:$0xff]  ;;  %v334_v3 = vld [vmem:[#allocation2 + $0x27] sm:$0xff] }
 0x178   :  { %5427 = vmatprep.subr.bf16.mxu1 %v6406_v22  ;;  %v397_v55 = vpack.c.bf16 %v363_v51, %v362_v49  ;;  %v332_v57 = vld [vmem:[#allocation2 + $0x17] sm:$0xff]  ;;  %786 = vmatprep.mubr.bf16.mxu0 %v395_v50  ;;  %v365_v61 = vld [vmem:[#allocation2 + $0x21] sm:$0xff]  ;;  %v335_v4 = vld [vmem:[#allocation2 + $0x2f] sm:$0xff] }
 0x179   :  { %v364_v59 = vld [vmem:[#allocation2 + $0x19] sm:$0xff]  ;;  %v400_v60 = vpack.c.bf16 %v333_v58, %v332_v57  ;;  %v366_v5 = vld [vmem:[#allocation2 + $0x29] sm:$0xff]  ;;  %v367_v6 = vld [vmem:[#allocation2 + $0x31] sm:$0xff]  ;;  %v405_v10 = vpack.c.bf16 %v335_v4, %v334_v3  ;;  %v416_v57 = vpack.c.bf16 %v7504_v42, %v7497_v41 }
 0x17a   :  { %5364 = vmatpush3.bf16.msra.mxu0 %v6407_v23  ;;  %883 = vmatprep.mubr.bf16.mxu1 %v397_v55  ;;  %v402_v63 = vpack.c.bf16 %v365_v61, %v364_v59  ;;  %v316_v1 = vld [vmem:[#allocation2 + $0x16] sm:$0xff]  ;;  %v317_v2 = vld [vmem:[#allocation2 + $0x1e] sm:$0xff]  ;;  %v407_v13 = vpack.c.bf16 %v367_v6, %v366_v5  ;;  %v318_v14 = vld [vmem:[#allocation2 + $0x26] sm:$0xff] }
 0x17b   :  { %5428 = vmatpush3.bf16.msra.mxu1 %v6408_v24  ;;  %5365 = vmatprep.subr.bf16.mxu0 %v6409_v25  ;;  %v6419_v7 = vld [vmem:[%s7956_s5 + $0x110] sm:$0xff]   ;;  %v399_v8 = vpack.c.bf16 %v317_v2, %v316_v1  ;;  %v337_v17 = vld [vmem:[#allocation2 + $0x3f] sm:$0xff]  ;;  %v7549_v19 = vld [vmem:[%s7957_s22 + $0x68] sm:$0xff]  ;;  %v421_v2 = vpack.c.bf16 %v7520_v45, %v7510_v43 }
 0x17c   :  { %5429 = vmatprep.subr.bf16.mxu1 %v6410_v26  ;;  %v7538_v11 = vld [vmem:[#allocation2 + $0x57] sm:$0xff]  ;;  %v319_v15 = vld [vmem:[#allocation2 + $0x2e] sm:$0xff]  ;;  %311 = vst [vmem:[#allocation2 + $0x80] sm:$0xff] %v7549_v19  ;;  %v369_v22 = vld [vmem:[#allocation2 + $0x41] sm:$0xff]  ;;  %v406_v26 = vpack.c.bf16 %v7479_v38, %v7474_v37 }
 0x17d   :  { %v7540_v12 = vld [vmem:[#allocation2 + $0x56] sm:$0xff]  ;;  %v6421_v23 = vld [vmem:[%s7956_s5 + $0x120] sm:$0xff]   ;;  %v404_v25 = vpack.c.bf16 %v319_v15, %v318_v14  ;;  %v372_v39 = vld [vmem:[#allocation2 + $0x69] sm:$0xff] }
 0x17e   :  { %5366 = vmatpush3.bf16.msra.mxu0 %v6411_v27  ;;  %1350 = vst [vmem:[#allocation2 + $0x56] sm:$0x3] %v7006_v0  ;;  %v336_v16 = vld [vmem:[#allocation2 + $0x37] sm:$0xff]  ;;  %v339_v33 = vld [vmem:[#allocation2 + $0x5f] sm:$0xff]  ;;  %v340_v55 = vld [vmem:[#allocation2 + $0x67] sm:$0xff] }
 0x17f   :  { %5430 = vmatpush3.bf16.msra.mxu1 %v6412_v28  ;;  %5367 = vmatprep.subr.bf16.mxu0 %v6413_v29  ;;  %v368_v20 = vld [vmem:[#allocation2 + $0x39] sm:$0xff]  ;;  %v7555_v21 = vld [vmem:[%s7957_s22 + $0x70] sm:$0xff]  ;;  %v410_v27 = vpack.c.bf16 %v337_v17, %v336_v16  ;;  %v6422_v29 = vld [vmem:[%s7956_s5 + $0x128] sm:$0xff]   ;;  %v415_v48 = vpack.c.bf16 %v339_v33, %v7538_v11 }
 0x180   :  { %5431 = vmatprep.subr.bf16.mxu1 %v6414_v30  ;;  %312 = vst [vmem:[#allocation2 + $0x88] sm:$0xff] %v7555_v21  ;;  %v7564_v24 = vld [vmem:[%s7957_s22 + $0x78] sm:$0xff]  ;;  %v412_v28 = vpack.c.bf16 %v369_v22, %v368_v20  ;;  %v7572_v30 = vld [vmem:[#allocation2 + $0x22] sm:$0xff]  ;;  %v6423_v36 = vld [vmem:[%s7956_s5 + $0x130] sm:$0xff]   ;;  %s7960_s22 = sld [smem:[#allocation51_spill]] }
 0x181   :  { %313 = vst [vmem:[#allocation2 + $0x90] sm:$0xff] %v7564_v24  ;;  %1345 = vst [vmem:[#allocation2 + $0x28] sm:$0x3] %v7006_v0  ;;  %v370_v34 = vld [vmem:[#allocation2 + $0x59] sm:$0xff]  ;;  %v371_v35 = vld [vmem:[#allocation2 + $0x61] sm:$0xff]  ;;  %v431_v15 = vpack.c.bf16 %v7564_v24, %v7555_v21 }
 0x182   :  { %5368 = vmatpush3.bf16.msra.mxu0 %v6415_v31  ;;  %v320_v31 = vld [vmem:[#allocation2 + $0x36] sm:$0xff]  ;;  %v417_v52 = vpack.c.bf16 %v371_v35, %v370_v34  ;;  %v325_v61 = vld [vmem:[#allocation2 + $0x6e] sm:$0xff]  ;;  %v1045_v35 = vlaneseq }
 0x183   :  { %5432 = vmatpush3.bf16.msra.mxu1 %v6416_v32  ;;  %5932 = vmatprep.subr.bf16.mxu0 %v6417_v44  ;;  %v321_v32 = vld [vmem:[#allocation2 + $0x3e] sm:$0xff]  ;;  %v373_v38 = vld [vmem:[#allocation2 + $0x71] sm:$0xff] }
 0x184   :  { %v409_v37 = vpack.c.bf16 %v321_v32, %v320_v31  ;;  %v374_v49 = vld [vmem:[#allocation2 + $0x79] sm:$0xff]  ;;  %v422_v59 = vpack.c.bf16 %v373_v38, %v372_v39  ;;  %v378_v43 = vld [vmem:[#allocation2 + $0xa] sm:$0xff] }
 0x185   :  { %787 = vmatmul.mubr.bf16.vlgmr.msra.gmra.mrb[0].mxu0 %v394_v56  ;;  %v326_v50 = vld [vmem:[#allocation2 + $0x76] sm:$0xff]  ;;  %v327_v5 = vld [vmem:[#allocation2 + $0x7e] sm:$0xff] }
 0x186   :  { %884 = vmatmul.mubr.bf16.vlgmr.msra.gmra.mrb[0].mxu1 %v396_v54  ;;  %794 = vmatprep.mubr.bf16.mxu0 %v400_v60  ;;  %v7581_v51 = vld [vmem:[#allocation2 + $0x72] sm:$0xff]  ;;  %v323_v54 = vld [vmem:[#allocation2 + $0x5e] sm:$0xff]  ;;  %v324_v60 = vld [vmem:[#allocation2 + $0x66] sm:$0xff] }
 0x187   :  { %891 = vmatprep.mubr.bf16.mxu1 %v402_v63  ;;  %5933 = vmatpush3.bf16.msra.mxu0 %v6417_v44  ;;  %v342_v44 = vld [vmem:[#allocation2 + $0x77] sm:$0xff]  ;;  %v341_v56 = vld [vmem:[#allocation2 + $0x6f] sm:$0xff]  ;;  %v414_v40 = vpack.c.bf16 %v323_v54, %v7540_v12  ;;  %v375_v63 = vld [vmem:[#allocation2 + $0x81] sm:$0xff]  ;;  %v419_v1 = vpack.c.bf16 %v325_v61, %v324_v60 }
 0x188   :  { %5934 = vmatprep.subr.bf16.mxu0 %v6418_v62  ;;  %v6424_v53 = vld [vmem:[%s7956_s5 + $0x138] sm:$0xff]   ;;  %1351 = vst [vmem:[#allocation2 + $0x78] sm:$0x3] %v7006_v0  ;;  %v420_v58 = vpack.c.bf16 %v341_v56, %v340_v55  ;;  %v427_v4 = vpack.c.bf16 %v375_v63, %v374_v49  ;;  %v344_v41 = vld [vmem:[#allocation2 + $0x87] sm:$0xff]  ;;  %v345_v42 = vld [vmem:[#allocation2 + $0x8f] sm:$0xff] }
 0x189   :  { %v376_v6 = vld [vmem:[#allocation2 + $0x89] sm:$0xff]  ;;  %v379_v45 = vld [vmem:[#allocation2 + $0x12] sm:$0xff]  ;;  %v380_v17 = vld [vmem:[#allocation2 + $0x1a] sm:$0xff] }
 0x18a   :  { %v328_v12 = vld [vmem:[#allocation2 + $0x86] sm:$0xff]  ;;  %v398_v16 = vpack.c.bf16 %v379_v45, %v378_v43  ;;  %v383_v20 = vld [vmem:[#allocation2 + $0x32] sm:$0xff]  ;;  %v384_v22 = vld [vmem:[#allocation2 + $0x3a] sm:$0xff] }
 0x18b   :  { %5935 = vmatpush3.bf16.msra.mxu0 %v6418_v62  ;;  %v343_v62 = vld [vmem:[#allocation2 + $0x7f] sm:$0xff]  ;;  %v392_v33 = vld [vmem:[#allocation2 + $0x8a] sm:$0xff]  ;;  %v393_v34 = vld [vmem:[#allocation2 + $0x92] sm:$0xff] }
 0x18c   :  { %5936 = vmatprep.subr.bf16.mxu0 %v6419_v7  ;;  %v425_v3 = vpack.c.bf16 %v343_v62, %v342_v44  ;;  %v390_v21 = vld [vmem:[#allocation2 + $0x7a] sm:$0xff]  ;;  %v391_v24 = vld [vmem:[#allocation2 + $0x82] sm:$0xff] }
 0x18d   :  { %795 = vmatmul.mubr.bf16.gmra.mrb[4].mxu0 %v399_v8  ;;  %v424_v8 = vpack.c.bf16 %v327_v5, %v326_v50  ;;  %v428_v32 = vpack.c.bf16 %v391_v24, %v390_v21 }
 0x18e   :  { %892 = vmatmul.mubr.bf16.gmra.mrb[4].mxu1 %v401_v9  ;;  %802 = vmatprep.mubr.bf16.mxu0 %v405_v10  ;;  %v426_v9 = vpack.c.bf16 %v7549_v19, %v7526_v46  ;;  %v430_v10 = vpack.c.bf16 %v345_v42, %v344_v41  ;;  %v403_v46 = vpack.c.bf16 %v7572_v30, %v380_v17 }
 0x18f   :  { %899 = vmatprep.mubr.bf16.mxu1 %v407_v13  ;;  %5937 = vmatpush3.bf16.msra.mxu0 %v6419_v7  ;;  %v377_v7 = vld [vmem:[#allocation2 + $0x91] sm:$0xff]  ;;  %v433_v30 = vpack.c.bf16 %v393_v34, %v392_v33 }
 0x190   :  { %5938 = vmatprep.subr.bf16.mxu0 %v6420_v18  ;;  %v432_v11 = vpack.c.bf16 %v377_v7, %v376_v6  ;;  %v329_v13 = vld [vmem:[#allocation2 + $0x8e] sm:$0xff] }
 0x191   :  { %v429_v14 = vpack.c.bf16 %v329_v13, %v328_v12 }
 0x193   :  { %5939 = vmatpush3.bf16.msra.mxu0 %v6420_v18  ;;  %v382_v18 = vld [vmem:[#allocation2 + $0x2a] sm:$0xff] }
 0x194   :  { %5940 = vmatprep.subr.bf16.mxu0 %v6421_v23  ;;  %v408_v19 = vpack.c.bf16 %v383_v20, %v382_v18 }
 0x195   :  { %803 = vmatmul.mubr.bf16.gmra.mrb[8].mxu0 %v404_v25  ;;  %v386_v25 = vld [vmem:[#allocation2 + $0x5a] sm:$0xff] }
 0x196   :  { %900 = vmatmul.mubr.bf16.gmra.mrb[8].mxu1 %v406_v26  ;;  %810 = vmatprep.mubr.bf16.mxu0 %v410_v27  ;;  %v387_v26 = vld [vmem:[#allocation2 + $0x62] sm:$0xff] }
 0x197   :  { %907 = vmatprep.mubr.bf16.mxu1 %v412_v28  ;;  %5941 = vmatpush3.bf16.msra.mxu0 %v6421_v23  ;;  %v385_v23 = vld [vmem:[#allocation2 + $0x42] sm:$0xff]  ;;  %v418_v28 = vpack.c.bf16 %v387_v26, %v386_v25 }
 0x198   :  { %5942 = vmatprep.subr.bf16.mxu0 %v6422_v29  ;;  %v413_v27 = vpack.c.bf16 %v385_v23, %v384_v22 }
 0x19b   :  { %5943 = vmatpush3.bf16.msra.mxu0 %v6422_v29  ;;  %v388_v29 = vld [vmem:[#allocation2 + $0x6a] sm:$0xff] }
 0x19c   :  { %5944 = vmatprep.subr.bf16.mxu0 %v6423_v36  ;;  %v423_v31 = vpack.c.bf16 %v7581_v51, %v388_v29 }
 0x19d   :  { %811 = vmatmul.mubr.bf16.gmra.mrb[12].mxu0 %v409_v37  ;;  %v7600_v37 = vand.u32 127, %v1045_v35 }
 0x19e   :  { %908 = vmatmul.mubr.bf16.gmra.mrb[12].mxu1 %v411_v47  ;;  %818 = vmatprep.mubr.bf16.mxu0 %v415_v48 }
 0x19f   :  { %915 = vmatprep.mubr.bf16.mxu1 %v417_v52  ;;  %5945 = vmatpush3.bf16.msra.mxu0 %v6423_v36  ;;  %v7598_v36 = vshrl.u32 %v1045_v35, 7 }
 0x1a0   :  { %5946 = vmatprep.subr.bf16.mxu0 %v6424_v53 }
 0x1a1   :  { %v1052_v38 = vmul.u32 2, %v7598_v36 }
 0x1a3   :  { %5947 = vmatpush3.bf16.msra.mxu0 %v6424_v53  ;;  %vm1056_vm0 = vcmp.eq.s32.totalorder %v7600_v37, %v1052_v38 }
 0x1a4   :  { %v7607_v44 = vsel %vm1056_vm0, 1.0, %v7006_v0 }
 0x1a5   :  { %819 = vmatmul.mubr.bf16.gmra.mrb[16].mxu0 %v414_v40 }
 0x1a6   :  { %916 = vmatmul.mubr.bf16.gmra.mrb[16].mxu1 %v416_v57  ;;  %826 = vmatprep.mubr.bf16.mxu0 %v420_v58 }
 0x1a7   :  { %923 = vmatprep.mubr.bf16.mxu1 %v422_v59 }
 0x1ad   :  { %827 = vmatmul.mubr.bf16.gmra.mrb[20].mxu0 %v419_v1 }
 0x1ae   :  { %924 = vmatmul.mubr.bf16.gmra.mrb[20].mxu1 %v421_v2  ;;  %834 = vmatprep.mubr.bf16.mxu0 %v425_v3 }
 0x1af   :  { %931 = vmatprep.mubr.bf16.mxu1 %v427_v4 }
 0x1b5   :  { %835 = vmatmul.mubr.bf16.gmra.mrb[24].mxu0 %v424_v8 }
 0x1b6   :  { %932 = vmatmul.mubr.bf16.gmra.mrb[24].mxu1 %v426_v9  ;;  %842 = vmatprep.mubr.bf16.mxu0 %v430_v10 }
 0x1b7   :  { %939 = vmatprep.mubr.bf16.mxu1 %v432_v11 }
 0x1bd   :  { %843 = vmatmul.mubr.bf16.gmra.mrb[28].mxu0 %v429_v14 }
 0x1be   :  { %940 = vmatmul.mubr.bf16.gmra.mrb[28].mxu1 %v431_v15  ;;  %5948 = vmatprep.mubr.bf16.mxu0 %v398_v16 }
 0x1bf   :  { %5980 = vmatprep.mubr.msk.f32.mxu1 %vm1068_vm1, %v7607_v44 }
 0x1c5   :  { %5949 = vmatmul.mubr.bf16.vlgmr.msra.gmra.mrb[32].mxu0 %v403_v46 }
 0x1c6   :  { %5952 = vmatprep.mubr.bf16.mxu0 %v408_v19 }
 0x1cd   :  { %5953 = vmatmul.mubr.bf16.gmra.mrb[36].mxu0 %v413_v27 }
 0x1ce   :  { %5956 = vmatprep.mubr.bf16.mxu0 %v418_v28 }
 0x1d5   :  { %5957 = vmatmul.mubr.bf16.gmra.mrb[40].mxu0 %v423_v31 }
 0x1d6   :  { %5960 = vmatprep.mubr.bf16.mxu0 %v428_v32 }
 0x1dd   :  { %5961 = vmatmul.mubr.bf16.gmra.mrb[44].mxu0 %v433_v30 }
 0x258   :  { %v5369_v47 = vpop.f32.mrb[0].mxu0 }
 0x259   :  { %v5433_v48 = vpop.f32.mrb[0].mxu1  ;;  %v5370_v49 = vpop.f32.mrb[1].mxu0 }
 0x25a   :  { %v5371_v50 = vadd.f32 %v5370_v49, %v5369_v47  ;;  %v5434_v51 = vpop.f32.mrb[1].mxu1  ;;  %v5372_v52 = vpop.f32.mrb[2].mxu0 }
 0x25b   :  { %v5435_v53 = vadd.f32 %v5434_v51, %v5433_v48  ;;  %v5436_v54 = vpop.f32.mrb[2].mxu1  ;;  %v5373_v55 = vpop.f32.mrb[3].mxu0 }
 0x25c   :  { %v5374_v56 = vadd.f32 %v5373_v55, %v5372_v52  ;;  %v5437_v39 = vpop.f32.mrb[3].mxu1 }
 0x25d   :  { %v5438_v40 = vadd.f32 %v5437_v39, %v5436_v54  ;;  %v7611_v57 = vadd.f32 %v5435_v53, %v5371_v50 }
 0x25f   :  { %v7613_v58 = vadd.f32 %v5438_v40, %v5374_v56 }
 0x260   :  { %v5375_v59 = vpop.f32.mrb[4].mxu0 }
 0x261   :  { %v5439_v60 = vpop.f32.mrb[4].mxu1  ;;  %v5376_v61 = vpop.f32.mrb[5].mxu0 }
 0x262   :  { %v5377_v62 = vadd.f32 %v5376_v61, %v5375_v59  ;;  %v5440_v63 = vpop.f32.mrb[5].mxu1  ;;  %v5378_v1 = vpop.f32.mrb[6].mxu0 }
 0x263   :  { %v5441_v2 = vadd.f32 %v5440_v63, %v5439_v60  ;;  %v5442_v3 = vpop.f32.mrb[6].mxu1  ;;  %v5379_v4 = vpop.f32.mrb[7].mxu0 }
 0x264   :  { %v5380_v5 = vadd.f32 %v5379_v4, %v5378_v1  ;;  %v5443_v41 = vpop.f32.mrb[7].mxu1 }
 0x265   :  { %v5444_v42 = vadd.f32 %v5443_v41, %v5442_v3  ;;  %v7615_v6 = vadd.f32 %v5441_v2, %v5377_v62 }
 0x267   :  { %v7617_v7 = vadd.f32 %v5444_v42, %v5380_v5 }
 0x268   :  { %v5381_v8 = vpop.f32.mrb[8].mxu0 }
 0x269   :  { %v5445_v9 = vpop.f32.mrb[8].mxu1  ;;  %v5382_v10 = vpop.f32.mrb[9].mxu0 }
 0x26a   :  { %v5383_v11 = vadd.f32 %v5382_v10, %v5381_v8  ;;  %v5446_v12 = vpop.f32.mrb[9].mxu1  ;;  %v5384_v13 = vpop.f32.mrb[10].mxu0 }
 0x26b   :  { %v5447_v43 = vadd.f32 %v5446_v12, %v5445_v9  ;;  %v5448_v45 = vpop.f32.mrb[10].mxu1  ;;  %v5385_v14 = vpop.f32.mrb[11].mxu0 }
 0x26c   :  { %v5386_v15 = vadd.f32 %v5385_v14, %v5384_v13  ;;  %v5449_v16 = vpop.f32.mrb[11].mxu1 }
 0x26d   :  { %v5450_v17 = vadd.f32 %v5449_v16, %v5448_v45  ;;  %v7619_v18 = vadd.f32 %v5447_v43, %v5383_v11 }
 0x26f   :  { %v7621_v20 = vadd.f32 %v5450_v17, %v5386_v15 }
 0x270   :  { %v5387_v46 = vpop.f32.mrb[12].mxu0 }
 0x271   :  { %v5451_v19 = vpop.f32.mrb[12].mxu1  ;;  %v5388_v22 = vpop.f32.mrb[13].mxu0 }
 0x272   :  { %v5389_v23 = vadd.f32 %v5388_v22, %v5387_v46  ;;  %v5452_v25 = vpop.f32.mrb[13].mxu1  ;;  %v5390_v26 = vpop.f32.mrb[14].mxu0 }
 0x273   :  { %v5453_v27 = vadd.f32 %v5452_v25, %v5451_v19  ;;  %v5454_v28 = vpop.f32.mrb[14].mxu1  ;;  %v5391_v29 = vpop.f32.mrb[15].mxu0 }
 0x274   :  { %v5392_v21 = vadd.f32 %v5391_v29, %v5390_v26  ;;  %v5455_v24 = vpop.f32.mrb[15].mxu1 }
 0x275   :  { %v5456_v31 = vadd.f32 %v5455_v24, %v5454_v28  ;;  %v7623_v32 = vadd.f32 %v5453_v27, %v5389_v23 }
 0x277   :  { %v7625_v33 = vadd.f32 %v5456_v31, %v5392_v21 }
 0x278   :  { %v5393_v34 = vpop.f32.mrb[16].mxu0 }
 0x279   :  { %v5457_v30 = vpop.f32.mrb[16].mxu1  ;;  %v5394_v35 = vpop.f32.mrb[17].mxu0 }
 0x27a   :  { %v5395_v47 = vadd.f32 %v5394_v35, %v5393_v34  ;;  %v5458_v48 = vpop.f32.mrb[17].mxu1  ;;  %v5396_v49 = vpop.f32.mrb[18].mxu0 }
 0x27b   :  { %v5459_v50 = vadd.f32 %v5458_v48, %v5457_v30  ;;  %v5460_v51 = vpop.f32.mrb[18].mxu1  ;;  %v5397_v52 = vpop.f32.mrb[19].mxu0 }
 0x27c   :  { %v5398_v53 = vadd.f32 %v5397_v52, %v5396_v49  ;;  %v5461_v54 = vpop.f32.mrb[19].mxu1 }
 0x27d   :  { %v5462_v55 = vadd.f32 %v5461_v54, %v5460_v51  ;;  %v7627_v56 = vadd.f32 %v5459_v50, %v5395_v47 }
 0x27f   :  { %v7629_v39 = vadd.f32 %v5462_v55, %v5398_v53 }
 0x280   :  { %v5399_v40 = vpop.f32.mrb[20].mxu0 }
 0x281   :  { %v5463_v59 = vpop.f32.mrb[20].mxu1  ;;  %v5400_v60 = vpop.f32.mrb[21].mxu0 }
 0x282   :  { %v5401_v61 = vadd.f32 %v5400_v60, %v5399_v40  ;;  %v5464_v62 = vpop.f32.mrb[21].mxu1  ;;  %v5402_v63 = vpop.f32.mrb[22].mxu0 }
 0x283   :  { %v5465_v1 = vadd.f32 %v5464_v62, %v5463_v59  ;;  %v5466_v2 = vpop.f32.mrb[22].mxu1  ;;  %v5403_v3 = vpop.f32.mrb[23].mxu0 }
 0x284   :  { %v5404_v4 = vadd.f32 %v5403_v3, %v5402_v63  ;;  %v5467_v5 = vpop.f32.mrb[23].mxu1  ;;  %v1048_v3 = vadd.s32 16, %v7598_v36 }
 0x285   :  { %v5468_v41 = vadd.f32 %v5467_v5, %v5466_v2  ;;  %v926_v42 = vadd.f32 %v5465_v1, %v5401_v61 }
 0x287   :  { %v7631_v8 = vadd.f32 %v5468_v41, %v5404_v4 }
 0x288   :  { %v5405_v9 = vpop.f32.mrb[24].mxu0 }
 0x289   :  { %v5469_v10 = vpop.f32.mrb[24].mxu1  ;;  %v5406_v11 = vpop.f32.mrb[25].mxu0 }
 0x28a   :  { %v5407_v12 = vadd.f32 %v5406_v11, %v5405_v9  ;;  %v5470_v13 = vpop.f32.mrb[25].mxu1  ;;  %v5408_v43 = vpop.f32.mrb[26].mxu0  ;;  %v1054_v9 = vmul.u32 2, %v1048_v3  ;;  %v6453_v3 = vld [vmem:[#allocation6 + $0x78] sm:$0xff]  }
 0x28b   :  { %v5471_v45 = vadd.f32 %v5470_v13, %v5469_v10  ;;  %v5472_v14 = vpop.f32.mrb[26].mxu1  ;;  %v5409_v15 = vpop.f32.mrb[27].mxu0 }
 0x28c   :  { %v5410_v16 = vadd.f32 %v5409_v15, %v5408_v43  ;;  %v5473_v17 = vpop.f32.mrb[27].mxu1  ;;  %vm1058_vm3 = vcmp.eq.s32.totalorder %v7600_v37, %v1054_v9 }
 0x28d   :  { %v5474_v46 = vadd.f32 %v5473_v17, %v5472_v14  ;;  %v7633_v19 = vadd.f32 %v5471_v45, %v5407_v12 }
 0x28f   :  { %v7635_v22 = vadd.f32 %v5474_v46, %v5410_v16 }
 0x290   :  { %v5411_v23 = vpop.f32.mrb[28].mxu0 }
 0x291   :  { %v5475_v25 = vpop.f32.mrb[28].mxu1  ;;  %v5412_v26 = vpop.f32.mrb[29].mxu0 }
 0x292   :  { %v5413_v27 = vadd.f32 %v5412_v26, %v5411_v23  ;;  %v5476_v28 = vpop.f32.mrb[29].mxu1  ;;  %v5414_v29 = vpop.f32.mrb[30].mxu0 }
 0x293   :  { %v5477_v21 = vadd.f32 %v5476_v28, %v5475_v25  ;;  %v5478_v24 = vpop.f32.mrb[30].mxu1  ;;  %v5415_v31 = vpop.f32.mrb[31].mxu0 }
 0x294   :  { %v5416_v34 = vadd.f32 %v5415_v31, %v5414_v29  ;;  %v5479_v30 = vpop.f32.mrb[31].mxu1  ;;  %v6429_v31 = vld [vmem:[#allocation6 + $0x48] sm:$0xff]  }
 0x295   :  { %v5480_v35 = vadd.f32 %v5479_v30, %v5478_v24  ;;  %v942_v47 = vadd.f32 %v5477_v21, %v5413_v27  ;;  %v6427_v21 = vld [vmem:[#allocation6] sm:$0xff]   ;;  %v6431_v30 = vld [vmem:[#allocation6 + $0x8] sm:$0xff]  }
 0x296   :  { %v6428_v24 = vld [vmem:[#allocation6 + $0x80] sm:$0xff]  }
 0x297   :  { %v945_v48 = vadd.f32 %v5480_v35, %v5416_v34  ;;  %v6430_v34 = vld [vmem:[#allocation6 + $0xc8] sm:$0xff]  }
 0x298   :  { %v5950_v49 = vpop.f32.mrb[32].mxu0  ;;  %v6432_v35 = vld [vmem:[#allocation6 + $0x88] sm:$0xff]  }
 0x299   :  { %v991_v50 = vadd.f32 %v5950_v49, %v7615_v6  ;;  %v982_v51 = vpop.f32.mrb[33].mxu0  ;;  %v6435_v49 = vld [vmem:[#allocation6 + $0x10] sm:$0xff]  }
 0x29a   :  { %v983_v52 = vadd.f32 %v982_v51, %v7611_v57  ;;  %v5951_v53 = vpop.f32.mrb[34].mxu0  ;;  %v1047_v57 = vadd.s32 8, %v7598_v36  ;;  %v6437_v51 = vld [vmem:[#allocation6 + $0x58] sm:$0xff]  }
 0x29b   :  { %v994_v54 = vadd.f32 %v5951_v53, %v7617_v7  ;;  %v985_v55 = vpop.f32.mrb[35].mxu0  ;;  %v6439_v53 = vld [vmem:[#allocation6 + $0x18] sm:$0xff]  }
 0x29c   :  { %v986_v40 = vadd.f32 %v985_v55, %v7613_v58  ;;  %v1053_v41 = vmul.u32 2, %v1047_v57  ;;  %v6441_v55 = vld [vmem:[#allocation6 + $0x60] sm:$0xff]   ;;  %v6450_v57 = vld [vmem:[#allocation6 + $0xf0] sm:$0xff]  }
 0x29d   :  { %v6239_v59 = vpack.c.bf16 %v994_v54, %v991_v50  ;;  %v6436_v50 = vld [vmem:[#allocation6 + $0x90] sm:$0xff]   ;;  %v6440_v54 = vld [vmem:[#allocation6 + $0x98] sm:$0xff]  }
 0x29e   :  { %v6235_v60 = vpack.c.bf16 %v986_v40, %v983_v52  ;;  %vm1057_vm2 = vcmp.eq.s32.totalorder %v7600_v37, %v1053_v41  ;;  %v6438_v52 = vld [vmem:[#allocation6 + $0xd8] sm:$0xff]   ;;  %v6442_v40 = vld [vmem:[#allocation6 + $0xe0] sm:$0xff]  }
 0x29f   :  { %v7671_v41 = vld [vmem:[#allocation6 + $0x100] sm:$0xff]  }
 0x2a0   :  { %v5954_v61 = vpop.f32.mrb[36].mxu0  ;;  %6236 = vmatprep.subr.bf16.mxu1 %v6235_v60 }
 0x2a1   :  { %v1007_v62 = vadd.f32 %v5954_v61, %v7623_v32  ;;  %v998_v63 = vpop.f32.mrb[37].mxu0  ;;  %6238 = vmatpush3.bf16.msra.mxu1 %v6235_v60  ;;  %v1049_v32 = vadd.s32 24, %v7598_v36  ;;  %v6444_v60 = vld [vmem:[#allocation6 + $0xa0] sm:$0xff]   ;;  %v6445_v61 = vld [vmem:[#allocation6 + $0x68] sm:$0xff]  }
 0x2a2   :  { %v999_v1 = vadd.f32 %v998_v63, %v7619_v18  ;;  %v5955_v6 = vpop.f32.mrb[38].mxu0  ;;  %6240 = vmatprep.subr.bf16.mxu1 %v6239_v59  ;;  %v6447_v63 = vld [vmem:[#allocation6 + $0x28] sm:$0xff]  }
 0x2a3   :  { %v1010_v2 = vadd.f32 %v5955_v6, %v7625_v33  ;;  %v1001_v7 = vpop.f32.mrb[39].mxu0  ;;  %v1055_v13 = vmul.u32 2, %v1049_v32  ;;  %v6449_v6 = vld [vmem:[#allocation6 + $0x70] sm:$0xff]  }
 0x2a4   :  { %v1002_v58 = vadd.f32 %v1001_v7, %v7621_v20  ;;  %v6452_v7 = vld [vmem:[#allocation6 + $0xb0] sm:$0xff]  }
 0x2a5   :  { %v6247_v4 = vpack.c.bf16 %v1010_v2, %v1007_v62  ;;  %6242 = vmatpush3.bf16.msra.mxu1 %v6239_v59  ;;  %vm1059_vm4 = vcmp.eq.s32.totalorder %v7600_v37, %v1055_v13  ;;  %v6443_v59 = vld [vmem:[#allocation6 + $0x20] sm:$0xff]   ;;  %v6446_v62 = vld [vmem:[#allocation6 + $0xe8] sm:$0xff]   ;;  %v6451_v2 = vld [vmem:[#allocation6 + $0x30] sm:$0xff]  }
 0x2a6   :  { %v6243_v5 = vpack.c.bf16 %v1002_v58, %v999_v1  ;;  %v6448_v1 = vld [vmem:[#allocation6 + $0xa8] sm:$0xff]   ;;  %v6454_v58 = vld [vmem:[#allocation6 + $0xf8] sm:$0xff]  }
 0x2a8   :  { %v5958_v10 = vpop.f32.mrb[40].mxu0  ;;  %6244 = vmatprep.subr.bf16.mxu1 %v6243_v5 }
 0x2a9   :  { %v1023_v18 = vadd.f32 %v5958_v10, %v926_v42  ;;  %v1014_v11 = vpop.f32.mrb[41].mxu0  ;;  %6246 = vmatpush3.bf16.msra.mxu1 %v6243_v5  ;;  %v7654_v42 = vsel %vm1057_vm2, 1.0, %v7006_v0  ;;  %v6456_v5 = vld [vmem:[#allocation6 + $0xb8] sm:$0xff]  }
 0x2aa   :  { %v1015_v12 = vadd.f32 %v1014_v11, %v7627_v56  ;;  %v5959_v33 = vpop.f32.mrb[42].mxu0  ;;  %6248 = vmatprep.subr.bf16.mxu1 %v6247_v4  ;;  %v5138_v56 = vsel %vm1058_vm3, 1.0, %v7006_v0 }
 0x2ab   :  { %v1026_v20 = vadd.f32 %v5959_v33, %v7631_v8  ;;  %v1017_v43 = vpop.f32.mrb[43].mxu0 }
 0x2ac   :  { %v1018_v45 = vadd.f32 %v1017_v43, %v7629_v39  ;;  %v5139_v39 = vsel %vm1059_vm4, 1.0, %v7006_v0 }
 0x2ad   :  { %v6255_v14 = vpack.c.bf16 %v1026_v20, %v1023_v18  ;;  %6250 = vmatpush3.bf16.msra.mxu1 %v6247_v4  ;;  %v6455_v4 = vld [vmem:[#allocation6 + $0x38] sm:$0xff]  }
 0x2ae   :  { %v6251_v15 = vpack.c.bf16 %v1018_v45, %v1015_v12 }
 0x2b0   :  { %v5962_v16 = vpop.f32.mrb[44].mxu0  ;;  %6252 = vmatprep.subr.bf16.mxu1 %v6251_v15  ;;  %5981 = vmatmul.mubr.msk.f32.vlgmr.msra.gmra.mrb[32].mxu1 %vm1068_vm1, %v7654_v42 }
 0x2b1   :  { %v1039_v8 = vadd.f32 %v5962_v16, %v942_v47  ;;  %v1030_v17 = vpop.f32.mrb[45].mxu0  ;;  %6254 = vmatpush3.bf16.msra.mxu1 %v6251_v15  ;;  %5983 = vmatprep.mubr.msk.f32.mxu1 %vm1068_vm1, %v5138_v56  ;;  %v6433_v47 = vld [vmem:[#allocation6 + $0x50] sm:$0xff]  }
 0x2b2   :  { %v1031_v46 = vadd.f32 %v1030_v17, %v7633_v19  ;;  %v5963_v23 = vpop.f32.mrb[46].mxu0  ;;  %6256 = vmatprep.subr.bf16.mxu1 %v6255_v14  ;;  %v6425_v19 = vld [vmem:[#allocation6 + $0x40] sm:$0xff]  }
 0x2b3   :  { %v1042_v25 = vadd.f32 %v5963_v23, %v945_v48  ;;  %v1033_v26 = vpop.f32.mrb[47].mxu0  ;;  %5521 = vmatprep.subr.bf16.mxu0 %v6425_v19  ;;  %v6434_v48 = vld [vmem:[#allocation6 + $0xd0] sm:$0xff]  }
 0x2b4   :  { %v1034_v27 = vadd.f32 %v1033_v26, %v7635_v22  ;;  %5984 = vmatmul.mubr.msk.f32.gmra.mrb[34].mxu1 %vm1068_vm1, %v5139_v39  ;;  %v6426_v22 = vld [vmem:[#allocation6 + $0xc0] sm:$0xff]   ;;  %5522 = vmatpush3.bf16.msra.mxu0 %v6427_v21 }
 0x2b5   :  { %v6263_v28 = vpack.c.bf16 %v1042_v25, %v1039_v8  ;;  %6258 = vmatpush3.bf16.msra.mxu1 %v6255_v14  ;;  %6002 = vmatprep.mubr.msk.f32.mxu1 %vm1068_vm1, %v7607_v44 }
 0x2b6   :  { %v6259_v29 = vpack.c.bf16 %v1034_v27, %v1031_v46  ;;  %5523 = vmatprep.subr.bf16.mxu0 %v6429_v31 }
 0x2b8   :  { %6260 = vmatprep.subr.bf16.mxu1 %v6259_v29  ;;  %5524 = vmatpush3.bf16.msra.mxu0 %v6431_v30 }
 0x2b9   :  { %6262 = vmatpush3.bf16.msra.mxu1 %v6259_v29  ;;  %5525 = vmatprep.subr.bf16.mxu0 %v6433_v47 }
 0x2ba   :  { %6264 = vmatprep.subr.bf16.mxu1 %v6263_v28 }
 0x2bc   :  { %5526 = vmatpush3.bf16.msra.mxu0 %v6435_v49 }
 0x2bd   :  { %6266 = vmatpush3.bf16.msra.mxu1 %v6263_v28  ;;  %5527 = vmatprep.subr.bf16.mxu0 %v6437_v51 }
 0x2be   :  { %5561 = vmatprep.subr.bf16.mxu1 %v6426_v22 }
 0x2c0   :  { %6003 = vmatmul.mubr.msk.f32.vlgmr.msra.gmra.mrb[36].mxu1 %vm1068_vm1, %v7654_v42  ;;  %5528 = vmatpush3.bf16.msra.mxu0 %v6439_v53 }
 0x2c1   :  { %6005 = vmatprep.mubr.msk.f32.mxu1 %vm1068_vm1, %v5138_v56  ;;  %5562 = vmatpush3.bf16.msra.mxu1 %v6428_v24 }
 0x2c2   :  { %5563 = vmatprep.subr.bf16.mxu1 %v6430_v34  ;;  %5529 = vmatprep.subr.bf16.mxu0 %v6441_v55 }
 0x2c4   :  { %6006 = vmatmul.mubr.msk.f32.gmra.mrb[38].mxu1 %vm1068_vm1, %v5139_v39  ;;  %5530 = vmatpush3.bf16.msra.mxu0 %v6443_v59 }
 0x2c5   :  { %5564 = vmatpush3.bf16.msra.mxu1 %v6432_v35  ;;  %5531 = vmatprep.subr.bf16.mxu0 %v6445_v61 }
 0x2c6   :  { %5565 = vmatprep.subr.bf16.mxu1 %v6434_v48 }
 0x2c8   :  { %5532 = vmatpush3.bf16.msra.mxu0 %v6447_v63 }
 0x2c9   :  { %5566 = vmatpush3.bf16.msra.mxu1 %v6436_v50  ;;  %5533 = vmatprep.subr.bf16.mxu0 %v6449_v6 }
 0x2ca   :  { %5567 = vmatprep.subr.bf16.mxu1 %v6438_v52 }
 0x2cc   :  { %5534 = vmatpush3.bf16.msra.mxu0 %v6451_v2 }
 0x2cd   :  { %5568 = vmatpush3.bf16.msra.mxu1 %v6440_v54  ;;  %5535 = vmatprep.subr.bf16.mxu0 %v6453_v3 }
 0x2ce   :  { %5569 = vmatprep.subr.bf16.mxu1 %v6442_v40 }
 0x2d0   :  { %5536 = vmatpush3.bf16.msra.mxu0 %v6455_v4 }
 0x2d1   :  { %5570 = vmatpush3.bf16.msra.mxu1 %v6444_v60  ;;  %6008 = vmatprep.subr.bf16.mxu0 %v7671_v41 }
 0x2d2   :  { %5571 = vmatprep.subr.bf16.mxu1 %v6446_v62 }
 0x2d5   :  { %5572 = vmatpush3.bf16.msra.mxu1 %v6448_v1 }
 0x2d6   :  { %5573 = vmatprep.subr.bf16.mxu1 %v6450_v57 }
 0x2d9   :  { %5574 = vmatpush3.bf16.msra.mxu1 %v6452_v7 }
 0x2da   :  { %5575 = vmatprep.subr.bf16.mxu1 %v6454_v58  ;;  %v5148_v58 = vld [vmem:[%s7958_s6] ss:$0 sm:$0xff] }
 0x2dd   :  { %5576 = vmatpush3.bf16.msra.mxu1 %v6456_v5 }
 0x383   :  { %v5982_v32 = vpop.f32.mrb[32].mxu1 }
 0x384   :  { %v1147_v9 = vpop.f32.mrb[33].mxu1 }
 0x385   :  { %v1251_v10 = vadd.f32 %v5982_v32, %v1147_v9 }
 0x387   :  { %v5985_v18 = vpop.f32.mrb[34].mxu1 }
 0x388   :  { %v1157_v11 = vpop.f32.mrb[35].mxu1 }
 0x389   :  { %v1252_v12 = vadd.f32 %v1251_v10, %v1157_v11 }
 0x38b   :  { %v1253_v33 = vadd.f32 %v5985_v18, %v1252_v12 }
 0x393   :  { %v6004_v13 = vpop.f32.mrb[36].mxu1 }
 0x394   :  { %v1232_v20 = vpop.f32.mrb[37].mxu1 }
 0x395   :  { %v1254_v43 = vadd.f32 %v1253_v33, %v1232_v20  ;;  %v5149_v33 = vld [vmem:[#allocation3] ss:$0 sm:$0xff] }
 0x397   :  { %v6007_v45 = vpop.f32.mrb[38].mxu1  ;;  %v1255_v14 = vadd.f32 %v6004_v13, %v1254_v43 }
 0x398   :  { %v1242_v15 = vpop.f32.mrb[39].mxu1 }
 0x399   :  { %v1256_v56 = vadd.f32 %v1255_v14, %v1242_v15 }
 0x39b   :  { %v1257_v16 = vadd.f32 %v6007_v45, %v1256_v56 }
 0x39d   :  { %v1258_v8 = vrot.slane %v1257_v16, 4 }
 0x39f   :  { %v1259_v17 = vadd.f32 %v1258_v8, %v1257_v16 }
 0x3a1   :  { %v1260_v39 = vrot.slane %v1259_v17, 2 }
 0x3a3   :  { %v1261_v46 = vadd.f32 %v1260_v39, %v1259_v17 }
 0x3a5   :  { %v1262_v23 = vrot.slane %v1261_v46, 1 }
 0x3a7   :  { %v1263_v25 = vadd.f32 %v1262_v23, %v1261_v46 }
 0x3a9   :  { %v1265_v26 = vmul.f32 0.015625, %v1263_v25 }
 0x3ab   :  { %v1266_v27 = vsub.f32 %v1147_v9, %v1265_v26  ;;  %v1267_v28 = vsub.f32 %v5982_v32, %v1265_v26  ;;  %v1268_v29 = vsub.f32 %v1157_v11, %v1265_v26  ;;  %v1269_v19 = vsub.f32 %v5985_v18, %v1265_v26 }
 0x3ac   :  { %v1270_v22 = vsub.f32 %v1232_v20, %v1265_v26  ;;  %v1271_v21 = vsub.f32 %v6004_v13, %v1265_v26  ;;  %v1272_v24 = vsub.f32 %v1242_v15, %v1265_v26  ;;  %v1273_v31 = vsub.f32 %v6007_v45, %v1265_v26 }
 0x3ad   :  { %v1274_v34 = vmul.f32 %v1266_v27, %v1266_v27  ;;  %v1275_v30 = vmul.f32 %v1267_v28, %v1267_v28  ;;  %v1276_v35 = vmul.f32 %v1268_v29, %v1268_v29  ;;  %v1277_v48 = vmul.f32 %v1269_v19, %v1269_v19 }
 0x3ae   :  { %v1278_v50 = vmul.f32 %v1270_v22, %v1270_v22  ;;  %v1279_v52 = vmul.f32 %v1271_v21, %v1271_v21  ;;  %v1280_v54 = vmul.f32 %v1272_v24, %v1272_v24  ;;  %v1281_v40 = vmul.f32 %v1273_v31, %v1273_v31 }
 0x3af   :  { %v1282_v47 = vadd.f32 %v1275_v30, %v1274_v34 }
 0x3b1   :  { %v1283_v49 = vadd.f32 %v1282_v47, %v1276_v35 }
 0x3b3   :  { %v1284_v51 = vadd.f32 %v1283_v49, %v1277_v48 }
 0x3b5   :  { %v1285_v53 = vadd.f32 %v1284_v51, %v1278_v50 }
 0x3b7   :  { %v1286_v55 = vadd.f32 %v1285_v53, %v1279_v52 }
 0x3b9   :  { %v1287_v59 = vadd.f32 %v1286_v55, %v1280_v54 }
 0x3bb   :  { %v1288_v60 = vadd.f32 %v1287_v59, %v1281_v40 }
 0x3bd   :  { %v1289_v61 = vrot.slane %v1288_v60, 4 }
 0x3bf   :  { %v1290_v62 = vadd.f32 %v1289_v61, %v1288_v60 }
 0x3c1   :  { %v1291_v63 = vrot.slane %v1290_v62, 2 }
 0x3c3   :  { %v1292_v1 = vadd.f32 %v1291_v63, %v1290_v62 }
 0x3c5   :  { %v1293_v6 = vrot.slane %v1292_v1, 1 }
 0x3c7   :  { %v1294_v57 = vadd.f32 %v1293_v6, %v1292_v1  ;;  %v6458_v6 = vld [vmem:[#allocation6 + $0x108] sm:$0xff]  }
 0x3c9   :  { %v1295_v2 = vmul.f32 0.015625, %v1294_v57 }
 0x3cb   :  { %v1296_v7 = vadd.f32 1e-05, %v1295_v2 }
 0x3cd   :  { %6601 = vrsqrt.f32 %v1296_v7 }
 0x3d7   :  { %v6602_v3 = vpop.eup %6601 }
 0x3d8   :  { %v1298_v4 = vmul.f32 %v6602_v3, %v1266_v27  ;;  %v1299_v5 = vmul.f32 %v6602_v3, %v1267_v28  ;;  %v1300_v32 = vmul.f32 %v6602_v3, %v1268_v29  ;;  %v1301_v9 = vmul.f32 %v6602_v3, %v1269_v19 }
 0x3d9   :  { %v1302_v10 = vmul.f32 %v6602_v3, %v1270_v22  ;;  %v1303_v18 = vmul.f32 %v6602_v3, %v1271_v21  ;;  %v1304_v11 = vmul.f32 %v6602_v3, %v1272_v24  ;;  %v1305_v12 = vmul.f32 %v6602_v3, %v1273_v31 }
 0x3da   :  { %v1313_v13 = vmul.f32 %v5148_v58, %v1298_v4  ;;  %v1314_v20 = vmul.f32 %v5148_v58, %v1299_v5  ;;  %v1315_v43 = vmul.f32 %v5148_v58, %v1300_v32  ;;  %v1316_v45 = vmul.f32 %v5148_v58, %v1301_v9  ;;  %v6459_v4 = vld [vmem:[#allocation6 + $0x110] sm:$0xff]  }
 0x3db   :  { %v1317_v14 = vmul.f32 %v5148_v58, %v1302_v10  ;;  %v1318_v15 = vmul.f32 %v5148_v58, %v1303_v18  ;;  %v1319_v56 = vmul.f32 %v5148_v58, %v1304_v11  ;;  %v1320_v16 = vmul.f32 %v5148_v58, %v1305_v12 }
 0x3dc   :  { %v1328_v8 = vadd.f32 %v5149_v33, %v1313_v13  ;;  %v1329_v17 = vadd.f32 %v5149_v33, %v1314_v20  ;;  %v1330_v39 = vadd.f32 %v5149_v33, %v1315_v43  ;;  %v1331_v46 = vadd.f32 %v5149_v33, %v1316_v45  ;;  %v6460_v13 = vld [vmem:[#allocation6 + $0x118] sm:$0xff]   ;;  %v6461_v43 = vld [vmem:[#allocation6 + $0x120] sm:$0xff]  }
 0x3dd   :  { %v1332_v23 = vadd.f32 %v5149_v33, %v1317_v14  ;;  %v1333_v25 = vadd.f32 %v5149_v33, %v1318_v15  ;;  %v1334_v26 = vadd.f32 %v5149_v33, %v1319_v56  ;;  %v1335_v27 = vadd.f32 %v5149_v33, %v1320_v16 }
 0x3de   :  { %v1336_v28 = vmax.f32 %v1328_v8, 0.0  ;;  %v1337_v29 = vmax.f32 %v1329_v17, 0.0  ;;  %v1338_v19 = vmax.f32 %v1330_v39, 0.0  ;;  %v1339_v22 = vmax.f32 %v1331_v46, 0.0  ;;  %v6462_v8 = vld [vmem:[#allocation6 + $0x128] sm:$0xff]  }
 0x3df   :  { %v1340_v21 = vmax.f32 %v1332_v23, 0.0  ;;  %v1341_v24 = vmax.f32 %v1333_v25, 0.0  ;;  %v1342_v31 = vmax.f32 %v1334_v26, 0.0  ;;  %v1343_v34 = vmax.f32 %v1335_v27, 0.0  ;;  %v6463_v23 = vld [vmem:[#allocation6 + $0x130] sm:$0xff]  }
 0x3e0   :  { %1346 = vst [vmem:[#allocation2 + $0x8] sm:$0xff] %v1336_v28  ;;  %1347 = vst [vmem:[#allocation2 + $0x10] sm:$0xff] %v1337_v29  ;;  %v1398_v30 = vpack.c.bf16 %v1337_v29, %v1336_v28  ;;  %v1403_v35 = vpack.c.bf16 %v1339_v22, %v1338_v19  ;;  %v6464_v29 = vld [vmem:[#allocation6 + $0x138] sm:$0xff]  }
 0x3e1   :  { %1348 = vst [vmem:[#allocation2 + $0x18] sm:$0xff] %v1338_v19  ;;  %1349 = vst [vmem:[#allocation2 + $0x20] sm:$0xff] %v1339_v22  ;;  %v7677_v47 = vpack.c.bf16 %v1341_v24, %v1340_v21  ;;  %v7679_v48 = vpack.c.bf16 %v1343_v34, %v1342_v31 }
 0x3e2   :  { %1352 = vst [vmem:[#allocation2 + $0x58] sm:$0xff] %v1340_v21  ;;  %1353 = vst [vmem:[#allocation2 + $0x60] sm:$0xff] %v1341_v24 }
 0x3e3   :  { %1354 = vst [vmem:[#allocation2 + $0x68] sm:$0xff] %v1342_v31  ;;  %1355 = vst [vmem:[#allocation2 + $0x70] sm:$0xff] %v1343_v34 }
 0x3e7   :  { %v1364_v49 = vld [vmem:[#allocation2 + $0x7] sm:$0xff]  ;;  %v1365_v50 = vld [vmem:[#allocation2 + $0xf] sm:$0xff] }
 0x3e8   :  { %v1380_v51 = vld [vmem:[#allocation2 + $0x9] sm:$0xff]  ;;  %v1397_v52 = vpack.c.bf16 %v1365_v50, %v1364_v49  ;;  %v1381_v53 = vld [vmem:[#allocation2 + $0x11] sm:$0xff]  ;;  %v1367_v61 = vld [vmem:[#allocation2 + $0x1f] sm:$0xff] }
 0x3e9   :  { %v1356_v54 = vld [vmem:[#allocation2 + $0x6] sm:$0xff]  ;;  %v1357_v55 = vld [vmem:[#allocation2 + $0xe] sm:$0xff]  ;;  %v1399_v40 = vpack.c.bf16 %v1381_v53, %v1380_v51  ;;  %v1366_v60 = vld [vmem:[#allocation2 + $0x17] sm:$0xff] }
 0x3ea   :  { %v1396_v59 = vpack.c.bf16 %v1357_v55, %v1356_v54  ;;  %2023 = vst [vmem:[#allocation2 + $0x6] sm:$0x3] %v7006_v0  ;;  %v1382_v62 = vld [vmem:[#allocation2 + $0x19] sm:$0xff]  ;;  %1768 = vmatprep.mubr.bf16.mxu0 %v1397_v52  ;;  %v1402_v63 = vpack.c.bf16 %v1367_v61, %v1366_v60  ;;  %v1383_v1 = vld [vmem:[#allocation2 + $0x21] sm:$0xff]  ;;  %v1387_v11 = vld [vmem:[#allocation2 + $0x71] sm:$0xff] }
 0x3eb   :  { %1833 = vmatprep.mubr.bf16.mxu1 %v1399_v40  ;;  %v1404_v57 = vpack.c.bf16 %v1383_v1, %v1382_v62  ;;  %v1368_v2 = vld [vmem:[#allocation2 + $0x57] sm:$0xff]  ;;  %v1369_v5 = vld [vmem:[#allocation2 + $0x5f] sm:$0xff]  ;;  %v1370_v45 = vld [vmem:[#allocation2 + $0x67] sm:$0xff] }
 0x3ec   :  { %1769 = vmatmul.mubr.bf16.vlgmr.msra.gmra.mrb[48].mxu0 %v1396_v59  ;;  %1834 = vmatmul.mubr.bf16.vlgmr.msra.gmra.mrb[40].mxu1 %v1398_v30  ;;  %v1360_v7 = vld [vmem:[#allocation2 + $0x56] sm:$0xff]  ;;  %v1359_v58 = vld [vmem:[#allocation2 + $0x1e] sm:$0xff]  ;;  %v1407_v33 = vpack.c.bf16 %v1369_v5, %v1368_v2  ;;  %v1386_v15 = vld [vmem:[#allocation2 + $0x69] sm:$0xff] }
 0x3ed   :  { %1776 = vmatprep.mubr.bf16.mxu0 %v1402_v63  ;;  %1841 = vmatprep.mubr.bf16.mxu1 %v1404_v57  ;;  %2029 = vst [vmem:[#allocation2 + $0x56] sm:$0x3] %v7006_v0  ;;  %v1358_v3 = vld [vmem:[#allocation2 + $0x16] sm:$0xff]  ;;  %v1385_v9 = vld [vmem:[#allocation2 + $0x61] sm:$0xff]  ;;  %v1414_v17 = vpack.c.bf16 %v1387_v11, %v1386_v15  ;;  %v1363_v46 = vld [vmem:[#allocation2 + $0x6e] sm:$0xff] }
 0x3ee   :  { %6009 = vmatpush3.bf16.msra.mxu0 %v7671_v41  ;;  %v1384_v32 = vld [vmem:[#allocation2 + $0x59] sm:$0xff]  ;;  %v1391_v10 = vld [vmem:[#allocation2 + $0x22] sm:$0xff]  ;;  %v1401_v18 = vpack.c.bf16 %v1359_v58, %v1358_v3  ;;  %v1371_v14 = vld [vmem:[#allocation2 + $0x6f] sm:$0xff] }
 0x3ef   :  { %6010 = vmatprep.subr.bf16.mxu0 %v6458_v6  ;;  %2024 = vst [vmem:[#allocation2 + $0x28] sm:$0x3] %v7006_v0  ;;  %v1395_v12 = vld [vmem:[#allocation2 + $0x72] sm:$0xff]  ;;  %v1409_v41 = vpack.c.bf16 %v1385_v9, %v1384_v32  ;;  %v1361_v20 = vld [vmem:[#allocation2 + $0x5e] sm:$0xff]  ;;  %v1412_v16 = vpack.c.bf16 %v1371_v14, %v1370_v45  ;;  %v1362_v39 = vld [vmem:[#allocation2 + $0x66] sm:$0xff] }
 0x3f0   :  { %2030 = vst [vmem:[#allocation2 + $0x78] sm:$0x3] %v7006_v0  ;;  %v1406_v56 = vpack.c.bf16 %v1361_v20, %v1360_v7  ;;  %v1388_v25 = vld [vmem:[#allocation2 + $0xa] sm:$0xff]  ;;  %v1389_v26 = vld [vmem:[#allocation2 + $0x12] sm:$0xff]  ;;  %v1411_v27 = vpack.c.bf16 %v1363_v46, %v1362_v39  ;;  %v1390_v19 = vld [vmem:[#allocation2 + $0x1a] sm:$0xff] }
 0x3f1   :  { %v1400_v28 = vpack.c.bf16 %v1389_v26, %v1388_v25  ;;  %v1392_v22 = vld [vmem:[#allocation2 + $0x5a] sm:$0xff]  ;;  %v1393_v21 = vld [vmem:[#allocation2 + $0x62] sm:$0xff]  ;;  %v1405_v24 = vpack.c.bf16 %v1391_v10, %v1390_v19  ;;  %v1394_v34 = vld [vmem:[#allocation2 + $0x6a] sm:$0xff] }
 0x3f2   :  { %6011 = vmatpush3.bf16.msra.mxu0 %v6458_v6  ;;  %v1410_v31 = vpack.c.bf16 %v1393_v21, %v1392_v22  ;;  %v1415_v30 = vpack.c.bf16 %v1395_v12, %v1394_v34  ;;  %v6467_v49 = vld [vmem:[#allocation11] sm:$0xff]   ;;  %v6470_v51 = vld [vmem:[#allocation11 + $0xc8] sm:$0xff]   ;;  %v6473_v54 = vld [vmem:[#allocation11 + $0x50] sm:$0xff]  }
 0x3f3   :  { %6012 = vmatprep.subr.bf16.mxu0 %v6459_v4  ;;  %v6468_v50 = vld [vmem:[#allocation11 + $0x80] sm:$0xff]   ;;  %v6471_v52 = vld [vmem:[#allocation11 + $0x8] sm:$0xff]   ;;  %v6474_v55 = vld [vmem:[#allocation11 + $0xd0] sm:$0xff]  }
 0x3f4   :  { %1777 = vmatmul.mubr.bf16.gmra.mrb[52].mxu0 %v1401_v18  ;;  %1842 = vmatmul.mubr.bf16.gmra.mrb[44].mxu1 %v1403_v35  ;;  %v6465_v35 = vld [vmem:[#allocation11 + $0x40] sm:$0xff]   ;;  %v6472_v53 = vld [vmem:[#allocation11 + $0x88] sm:$0xff]   ;;  %v6475_v40 = vld [vmem:[#allocation11 + $0x10] sm:$0xff]  }
 0x3f5   :  { %1784 = vmatprep.mubr.bf16.mxu0 %v1407_v33  ;;  %1849 = vmatprep.mubr.bf16.mxu1 %v1409_v41  ;;  %v6476_v59 = vld [vmem:[#allocation11 + $0x90] sm:$0xff]   ;;  %v6477_v60 = vld [vmem:[#allocation11 + $0x58] sm:$0xff]   ;;  %v6481_v1 = vld [vmem:[#allocation11 + $0x60] sm:$0xff]  }
 0x3f6   :  { %6013 = vmatpush3.bf16.msra.mxu0 %v6459_v4  ;;  %5613 = vmatprep.subr.bf16.mxu1 %v6465_v35  ;;  %v6478_v61 = vld [vmem:[#allocation11 + $0xd8] sm:$0xff]   ;;  %v6482_v6 = vld [vmem:[#allocation11 + $0xe0] sm:$0xff]   ;;  %v6485_v7 = vld [vmem:[#allocation11 + $0x68] sm:$0xff]  }
 0x3f7   :  { %6014 = vmatprep.subr.bf16.mxu0 %v6460_v13  ;;  %5614 = vmatpush3.bf16.msra.mxu1 %v6467_v49  ;;  %v6479_v62 = vld [vmem:[#allocation11 + $0x18] sm:$0xff]   ;;  %v6483_v57 = vld [vmem:[#allocation11 + $0x20] sm:$0xff]   ;;  %v6486_v3 = vld [vmem:[#allocation11 + $0xe8] sm:$0xff]  }
 0x3f8   :  { %v6480_v63 = vld [vmem:[#allocation11 + $0x98] sm:$0xff]   ;;  %v6484_v2 = vld [vmem:[#allocation11 + $0xa0] sm:$0xff]   ;;  %v6487_v58 = vld [vmem:[#allocation11 + $0x28] sm:$0xff]  }
 0x3f9   :  { %v6488_v4 = vld [vmem:[#allocation11 + $0xa8] sm:$0xff]   ;;  %v6489_v5 = vld [vmem:[#allocation11 + $0x70] sm:$0xff]   ;;  %v6493_v20 = vld [vmem:[#allocation11 + $0x78] sm:$0xff]  }
 0x3fa   :  { %6015 = vmatpush3.bf16.msra.mxu0 %v6460_v13  ;;  %v6490_v32 = vld [vmem:[#allocation11 + $0xf0] sm:$0xff]   ;;  %v6495_v39 = vld [vmem:[#allocation11 + $0x38] sm:$0xff]  }
 0x3fb   :  { %6016 = vmatprep.subr.bf16.mxu0 %v6461_v43  ;;  %v6491_v11 = vld [vmem:[#allocation11 + $0x30] sm:$0xff]   ;;  %v6496_v46 = vld [vmem:[#allocation11 + $0xb8] sm:$0xff]  }
 0x3fc   :  { %1785 = vmatmul.mubr.bf16.gmra.mrb[56].mxu0 %v1406_v56  ;;  %1850 = vmatmul.mubr.bf16.gmra.mrb[48].mxu1 %v7677_v47  ;;  %v6466_v47 = vld [vmem:[#allocation11 + $0xc0] sm:$0xff]   ;;  %v6492_v12 = vld [vmem:[#allocation11 + $0xb0] sm:$0xff]  }
 0x3fd   :  { %1792 = vmatprep.mubr.bf16.mxu0 %v1412_v16  ;;  %1857 = vmatprep.mubr.bf16.mxu1 %v1414_v17 }
 0x3fe   :  { %6017 = vmatpush3.bf16.msra.mxu0 %v6461_v43  ;;  %v6494_v43 = vld [vmem:[#allocation11 + $0xf8] sm:$0xff]  }
 0x3ff   :  { %6018 = vmatprep.subr.bf16.mxu0 %v6462_v8 }
 0x402   :  { %6019 = vmatpush3.bf16.msra.mxu0 %v6462_v8 }
 0x403   :  { %6020 = vmatprep.subr.bf16.mxu0 %v6463_v23 }
 0x404   :  { %1793 = vmatmul.mubr.bf16.gmra.mrb[60].mxu0 %v1411_v27  ;;  %1858 = vmatmul.mubr.bf16.gmra.mrb[52].mxu1 %v7679_v48  ;;  %v6469_v48 = vld [vmem:[#allocation11 + $0x48] sm:$0xff]  }
 0x405   :  { %6024 = vmatprep.mubr.bf16.mxu0 %v1400_v28  ;;  %5615 = vmatprep.subr.bf16.mxu1 %v6469_v48 }
 0x406   :  { %6021 = vmatpush3.bf16.msra.mxu0 %v6463_v23  ;;  %5616 = vmatpush3.bf16.msra.mxu1 %v6471_v52  ;;  %v7688_v23 = vld [vmem:[#allocation11 + $0x100] sm:$0xff]  }
 0x407   :  { %6022 = vmatprep.subr.bf16.mxu0 %v6464_v29  ;;  %5617 = vmatprep.subr.bf16.mxu1 %v6473_v54 }
 0x40a   :  { %6023 = vmatpush3.bf16.msra.mxu0 %v6464_v29  ;;  %5618 = vmatpush3.bf16.msra.mxu1 %v6475_v40 }
 0x40b   :  { %5653 = vmatprep.subr.bf16.mxu0 %v6466_v47  ;;  %5619 = vmatprep.subr.bf16.mxu1 %v6477_v60 }
 0x40d   :  { %6025 = vmatmul.mubr.bf16.vlgmr.msra.gmra.mrb[64].mxu0 %v1405_v24 }
 0x40e   :  { %6028 = vmatprep.mubr.bf16.mxu0 %v1410_v31  ;;  %5654 = vmatpush3.bf16.msra.mxu0 %v6468_v50 }
 0x40f   :  { %5655 = vmatprep.subr.bf16.mxu0 %v6470_v51  ;;  %5620 = vmatpush3.bf16.msra.mxu1 %v6479_v62 }
 0x410   :  { %5621 = vmatprep.subr.bf16.mxu1 %v6481_v1 }
 0x412   :  { %5656 = vmatpush3.bf16.msra.mxu0 %v6472_v53 }
 0x413   :  { %5657 = vmatprep.subr.bf16.mxu0 %v6474_v55  ;;  %5622 = vmatpush3.bf16.msra.mxu1 %v6483_v57 }
 0x414   :  { %5623 = vmatprep.subr.bf16.mxu1 %v6485_v7 }
 0x415   :  { %6029 = vmatmul.mubr.bf16.gmra.mrb[68].mxu0 %v1415_v30 }
 0x416   :  { %5658 = vmatpush3.bf16.msra.mxu0 %v6476_v59 }
 0x417   :  { %5659 = vmatprep.subr.bf16.mxu0 %v6478_v61  ;;  %5624 = vmatpush3.bf16.msra.mxu1 %v6487_v58 }
 0x418   :  { %5625 = vmatprep.subr.bf16.mxu1 %v6489_v5 }
 0x41a   :  { %5660 = vmatpush3.bf16.msra.mxu0 %v6480_v63 }
 0x41b   :  { %5661 = vmatprep.subr.bf16.mxu0 %v6482_v6  ;;  %5626 = vmatpush3.bf16.msra.mxu1 %v6491_v11 }
 0x41c   :  { %5627 = vmatprep.subr.bf16.mxu1 %v6493_v20 }
 0x41e   :  { %5662 = vmatpush3.bf16.msra.mxu0 %v6484_v2 }
 0x41f   :  { %5663 = vmatprep.subr.bf16.mxu0 %v6486_v3  ;;  %5628 = vmatpush3.bf16.msra.mxu1 %v6495_v39 }
 0x420   :  { %6032 = vmatprep.subr.bf16.mxu1 %v7688_v23 }
 0x422   :  { %5664 = vmatpush3.bf16.msra.mxu0 %v6488_v4 }
 0x423   :  { %5665 = vmatprep.subr.bf16.mxu0 %v6490_v32 }
 0x426   :  { %5666 = vmatpush3.bf16.msra.mxu0 %v6492_v12 }
 0x427   :  { %5667 = vmatprep.subr.bf16.mxu0 %v6494_v43 }
 0x42a   :  { %5668 = vmatpush3.bf16.msra.mxu0 %v6496_v46 }
 0x4bf   :  { %v5537_v9 = vpop.f32.mrb[48].mxu0  ;;  %v5577_v10 = vpop.f32.mrb[40].mxu1 }
 0x4c0   :  { %v5538_v18 = vpop.f32.mrb[49].mxu0  ;;  %v5578_v13 = vpop.f32.mrb[41].mxu1 }
 0x4c1   :  { %v5539_v33 = vadd.f32 %v5538_v18, %v5537_v9  ;;  %v5540_v41 = vpop.f32.mrb[50].mxu0  ;;  %v5579_v45 = vadd.f32 %v5578_v13, %v5577_v10  ;;  %v5580_v14 = vpop.f32.mrb[42].mxu1 }
 0x4c2   :  { %v5541_v15 = vpop.f32.mrb[51].mxu0  ;;  %v5581_v16 = vpop.f32.mrb[43].mxu1 }
 0x4c3   :  { %v5542_v56 = vadd.f32 %v5541_v15, %v5540_v41  ;;  %v5582_v8 = vadd.f32 %v5581_v16, %v5580_v14  ;;  %v1836_v17 = vadd.f32 %v5579_v45, %v5539_v33 }
 0x4c5   :  { %v1839_v25 = vadd.f32 %v5582_v8, %v5542_v56 }
 0x4c7   :  { %v5543_v26 = vpop.f32.mrb[52].mxu0  ;;  %v5583_v27 = vpop.f32.mrb[44].mxu1 }
 0x4c8   :  { %v5544_v28 = vpop.f32.mrb[53].mxu0  ;;  %v5584_v19 = vpop.f32.mrb[45].mxu1 }
 0x4c9   :  { %v5545_v29 = vadd.f32 %v5544_v28, %v5543_v26  ;;  %v5546_v22 = vpop.f32.mrb[54].mxu0  ;;  %v5585_v21 = vadd.f32 %v5584_v19, %v5583_v27  ;;  %v5586_v24 = vpop.f32.mrb[46].mxu1 }
 0x4ca   :  { %v5547_v31 = vpop.f32.mrb[55].mxu0  ;;  %v5587_v30 = vpop.f32.mrb[47].mxu1 }
 0x4cb   :  { %v5548_v34 = vadd.f32 %v5547_v31, %v5546_v22  ;;  %v5588_v35 = vadd.f32 %v5587_v30, %v5586_v24  ;;  %v1844_v47 = vadd.f32 %v5585_v21, %v5545_v29 }
 0x4cd   :  { %v1847_v49 = vadd.f32 %v5588_v35, %v5548_v34 }
 0x4cf   :  { %v5549_v50 = vpop.f32.mrb[56].mxu0  ;;  %v5589_v48 = vpop.f32.mrb[48].mxu1 }
 0x4d0   :  { %v5550_v51 = vpop.f32.mrb[57].mxu0  ;;  %v5590_v53 = vpop.f32.mrb[49].mxu1 }
 0x4d1   :  { %v5551_v52 = vadd.f32 %v5550_v51, %v5549_v50  ;;  %v5552_v54 = vpop.f32.mrb[58].mxu0  ;;  %v5591_v55 = vadd.f32 %v5590_v53, %v5589_v48  ;;  %v5592_v40 = vpop.f32.mrb[50].mxu1 }
 0x4d2   :  { %v5553_v59 = vpop.f32.mrb[59].mxu0  ;;  %v5593_v61 = vpop.f32.mrb[51].mxu1 }
 0x4d3   :  { %v5554_v60 = vadd.f32 %v5553_v59, %v5552_v54  ;;  %v5594_v62 = vadd.f32 %v5593_v61, %v5592_v40  ;;  %v1852_v63 = vadd.f32 %v5591_v55, %v5551_v52 }
 0x4d5   :  { %v1855_v1 = vadd.f32 %v5594_v62, %v5554_v60 }
 0x4d7   :  { %v5555_v6 = vpop.f32.mrb[60].mxu0  ;;  %v5595_v57 = vpop.f32.mrb[52].mxu1 }
 0x4d8   :  { %v5556_v2 = vpop.f32.mrb[61].mxu0  ;;  %v5596_v3 = vpop.f32.mrb[53].mxu1 }
 0x4d9   :  { %v5557_v7 = vadd.f32 %v5556_v2, %v5555_v6  ;;  %v5558_v58 = vpop.f32.mrb[62].mxu0  ;;  %v5597_v4 = vadd.f32 %v5596_v3, %v5595_v57  ;;  %v5598_v5 = vpop.f32.mrb[54].mxu1 }
 0x4da   :  { %v5559_v32 = vpop.f32.mrb[63].mxu0  ;;  %v5599_v10 = vpop.f32.mrb[55].mxu1 }
 0x4db   :  { %v5560_v9 = vadd.f32 %v5559_v32, %v5558_v58  ;;  %v5600_v18 = vadd.f32 %v5599_v10, %v5598_v5  ;;  %v1860_v11 = vadd.f32 %v5597_v4, %v5557_v7 }
 0x4dd   :  { %v1863_v12 = vadd.f32 %v5600_v18, %v5560_v9 }
 0x4e0   :  { %v6026_v33 = vpop.f32.mrb[64].mxu0 }
 0x4e1   :  { %v1909_v13 = vadd.f32 %v6026_v33, %v1844_v47  ;;  %v1900_v41 = vpop.f32.mrb[65].mxu0 }
 0x4e2   :  { %v1901_v20 = vadd.f32 %v1900_v41, %v1836_v17  ;;  %v6027_v43 = vpop.f32.mrb[66].mxu0 }
 0x4e3   :  { %v1912_v45 = vadd.f32 %v6027_v43, %v1847_v49  ;;  %v1903_v14 = vpop.f32.mrb[67].mxu0 }
 0x4e4   :  { %v1904_v15 = vadd.f32 %v1903_v14, %v1839_v25 }
 0x4e6   :  { %v1931_v56 = vadd.f32 %v1904_v15, %v1901_v20 }
 0x4e8   :  { %v1932_v16 = vadd.f32 %v1931_v56, %v1909_v13  ;;  %v6030_v8 = vpop.f32.mrb[68].mxu0 }
 0x4e9   :  { %v1925_v39 = vadd.f32 %v6030_v8, %v1860_v11  ;;  %v1916_v46 = vpop.f32.mrb[69].mxu0 }
 0x4ea   :  { %v1917_v26 = vadd.f32 %v1916_v46, %v1852_v63  ;;  %v1933_v27 = vadd.f32 %v1932_v16, %v1912_v45  ;;  %v6031_v28 = vpop.f32.mrb[70].mxu0 }
 0x4eb   :  { %v1928_v29 = vadd.f32 %v6031_v28, %v1863_v12  ;;  %v1919_v19 = vpop.f32.mrb[71].mxu0 }
 0x4ec   :  { %v1934_v22 = vadd.f32 %v1933_v27, %v1917_v26  ;;  %v1920_v21 = vadd.f32 %v1919_v19, %v1855_v1  ;;  %v5191_v27 = vld [vmem:[#allocation9] ss:$0 sm:$0xff] }
 0x4ee   :  { %v1935_v24 = vadd.f32 %v1934_v22, %v1920_v21 }
 0x4f0   :  { %v1936_v31 = vadd.f32 %v1935_v24, %v1925_v39 }
 0x4f2   :  { %v1937_v34 = vadd.f32 %v1936_v31, %v1928_v29 }
 0x4f4   :  { %v1938_v17 = vrot.slane %v1937_v34, 4 }
 0x4f6   :  { %v1939_v30 = vadd.f32 %v1938_v17, %v1937_v34 }
 0x4f8   :  { %v1940_v35 = vrot.slane %v1939_v30, 2 }
 0x4fa   :  { %v1941_v47 = vadd.f32 %v1940_v35, %v1939_v30 }
 0x4fc   :  { %v1942_v25 = vrot.slane %v1941_v47, 1 }
 0x4fe   :  { %v1943_v49 = vadd.f32 %v1942_v25, %v1941_v47 }
 0x500   :  { %v1944_v50 = vmul.f32 0.015625, %v1943_v49 }
 0x502   :  { %v1945_v48 = vsub.f32 %v1901_v20, %v1944_v50  ;;  %v1946_v51 = vsub.f32 %v1904_v15, %v1944_v50  ;;  %v1947_v52 = vsub.f32 %v1909_v13, %v1944_v50  ;;  %v1948_v53 = vsub.f32 %v1912_v45, %v1944_v50  ;;  %v5190_v45 = vld [vmem:[#allocation8] ss:$0 sm:$0xff] }
 0x503   :  { %v1949_v54 = vsub.f32 %v1917_v26, %v1944_v50  ;;  %v1950_v55 = vsub.f32 %v1920_v21, %v1944_v50  ;;  %v1951_v40 = vsub.f32 %v1925_v39, %v1944_v50  ;;  %v1952_v59 = vsub.f32 %v1928_v29, %v1944_v50 }
 0x504   :  { %v1953_v60 = vmul.f32 %v1945_v48, %v1945_v48  ;;  %v1954_v61 = vmul.f32 %v1946_v51, %v1946_v51  ;;  %v1955_v62 = vmul.f32 %v1947_v52, %v1947_v52  ;;  %v1956_v1 = vmul.f32 %v1948_v53, %v1948_v53 }
 0x505   :  { %v1957_v57 = vmul.f32 %v1949_v54, %v1949_v54  ;;  %v1958_v7 = vmul.f32 %v1950_v55, %v1950_v55  ;;  %v1959_v58 = vmul.f32 %v1951_v40, %v1951_v40  ;;  %v1960_v5 = vmul.f32 %v1952_v59, %v1952_v59 }
 0x506   :  { %v1961_v63 = vadd.f32 %v1954_v61, %v1953_v60 }
 0x508   :  { %v1962_v6 = vadd.f32 %v1961_v63, %v1955_v62 }
 0x50a   :  { %v1963_v2 = vadd.f32 %v1962_v6, %v1956_v1 }
 0x50c   :  { %v1964_v3 = vadd.f32 %v1963_v2, %v1957_v57 }
 0x50e   :  { %v1965_v4 = vadd.f32 %v1964_v3, %v1958_v7 }
 0x510   :  { %v1966_v32 = vadd.f32 %v1965_v4, %v1959_v58 }
 0x512   :  { %v1967_v9 = vadd.f32 %v1966_v32, %v1960_v5 }
 0x514   :  { %v1968_v10 = vrot.slane %v1967_v9, 4 }
 0x516   :  { %v1969_v18 = vadd.f32 %v1968_v10, %v1967_v9 }
 0x518   :  { %v1970_v11 = vrot.slane %v1969_v18, 2 }
 0x51a   :  { %v1971_v12 = vadd.f32 %v1970_v11, %v1969_v18 }
 0x51c   :  { %v1972_v33 = vrot.slane %v1971_v12, 1 }
 0x51e   :  { %v1973_v13 = vadd.f32 %v1972_v33, %v1971_v12  ;;  %v6498_v33 = vld [vmem:[#allocation11 + $0x108] sm:$0xff]  }
 0x520   :  { %v1974_v41 = vmul.f32 0.015625, %v1973_v13 }
 0x522   :  { %v1975_v20 = vadd.f32 1e-05, %v1974_v41 }
 0x524   :  { %6603 = vrsqrt.f32 %v1975_v20 }
 0x52e   :  { %v6604_v43 = vpop.eup %6603 }
 0x52f   :  { %v1977_v14 = vmul.f32 %v6604_v43, %v1945_v48  ;;  %v1978_v15 = vmul.f32 %v6604_v43, %v1946_v51  ;;  %v1979_v56 = vmul.f32 %v6604_v43, %v1947_v52  ;;  %v1980_v16 = vmul.f32 %v6604_v43, %v1948_v53 }
 0x530   :  { %v1981_v8 = vmul.f32 %v6604_v43, %v1949_v54  ;;  %v1982_v39 = vmul.f32 %v6604_v43, %v1950_v55  ;;  %v1983_v46 = vmul.f32 %v6604_v43, %v1951_v40  ;;  %v1984_v26 = vmul.f32 %v6604_v43, %v1952_v59  ;;  %v6499_v43 = vld [vmem:[#allocation11 + $0x110] sm:$0xff]  }
 0x531   :  { %v1992_v28 = vmul.f32 %v5190_v45, %v1977_v14  ;;  %v1993_v29 = vmul.f32 %v5190_v45, %v1978_v15  ;;  %v1994_v19 = vmul.f32 %v5190_v45, %v1979_v56  ;;  %v1995_v22 = vmul.f32 %v5190_v45, %v1980_v16 }
 0x532   :  { %v1996_v21 = vmul.f32 %v5190_v45, %v1981_v8  ;;  %v1997_v24 = vmul.f32 %v5190_v45, %v1982_v39  ;;  %v1998_v31 = vmul.f32 %v5190_v45, %v1983_v46  ;;  %v1999_v34 = vmul.f32 %v5190_v45, %v1984_v26  ;;  %v6500_v39 = vld [vmem:[#allocation11 + $0x118] sm:$0xff]  }
 0x533   :  { %v2007_v17 = vadd.f32 %v5191_v27, %v1992_v28  ;;  %v2008_v30 = vadd.f32 %v5191_v27, %v1993_v29  ;;  %v2009_v35 = vadd.f32 %v5191_v27, %v1994_v19  ;;  %v2010_v47 = vadd.f32 %v5191_v27, %v1995_v22 }
 0x534   :  { %v2011_v25 = vadd.f32 %v5191_v27, %v1996_v21  ;;  %v2012_v49 = vadd.f32 %v5191_v27, %v1997_v24  ;;  %v2013_v50 = vadd.f32 %v5191_v27, %v1998_v31  ;;  %v2014_v48 = vadd.f32 %v5191_v27, %v1999_v34  ;;  %v6501_v27 = vld [vmem:[#allocation11 + $0x120] sm:$0xff]   ;;  %v6502_v31 = vld [vmem:[#allocation11 + $0x128] sm:$0xff]  }
 0x535   :  { %v2015_v51 = vmax.f32 %v2007_v17, 0.0  ;;  %v2016_v52 = vmax.f32 %v2008_v30, 0.0  ;;  %v2017_v53 = vmax.f32 %v2009_v35, 0.0  ;;  %v2018_v54 = vmax.f32 %v2010_v47, 0.0  ;;  %v6503_v35 = vld [vmem:[#allocation11 + $0x130] sm:$0xff]  }
 0x536   :  { %v2019_v55 = vmax.f32 %v2011_v25, 0.0  ;;  %v2020_v40 = vmax.f32 %v2012_v49, 0.0  ;;  %v2021_v59 = vmax.f32 %v2013_v50, 0.0  ;;  %v2022_v60 = vmax.f32 %v2014_v48, 0.0  ;;  %v6504_v48 = vld [vmem:[#allocation11 + $0x138] sm:$0xff]  }
 0x537   :  { %2025 = vst [vmem:[#allocation2 + $0x8] sm:$0xff] %v2015_v51  ;;  %2026 = vst [vmem:[#allocation2 + $0x10] sm:$0xff] %v2016_v52  ;;  %v2077_v61 = vpack.c.bf16 %v2016_v52, %v2015_v51  ;;  %v2082_v62 = vpack.c.bf16 %v2018_v54, %v2017_v53 }
 0x538   :  { %2027 = vst [vmem:[#allocation2 + $0x18] sm:$0xff] %v2017_v53  ;;  %2028 = vst [vmem:[#allocation2 + $0x20] sm:$0xff] %v2018_v54  ;;  %v2087_v63 = vpack.c.bf16 %v2020_v40, %v2019_v55  ;;  %v7691_v1 = vpack.c.bf16 %v2022_v60, %v2021_v59 }
 0x539   :  { %2031 = vst [vmem:[#allocation2 + $0x58] sm:$0xff] %v2019_v55  ;;  %2032 = vst [vmem:[#allocation2 + $0x60] sm:$0xff] %v2020_v40 }
 0x53a   :  { %2033 = vst [vmem:[#allocation2 + $0x68] sm:$0xff] %v2021_v59  ;;  %2034 = vst [vmem:[#allocation2 + $0x70] sm:$0xff] %v2022_v60 }
 0x53e   :  { %v2043_v6 = vld [vmem:[#allocation2 + $0x7] sm:$0xff]  ;;  %v2044_v57 = vld [vmem:[#allocation2 + $0xf] sm:$0xff] }
 0x53f   :  { %v2059_v2 = vld [vmem:[#allocation2 + $0x9] sm:$0xff]  ;;  %v2076_v7 = vpack.c.bf16 %v2044_v57, %v2043_v6  ;;  %v2060_v3 = vld [vmem:[#allocation2 + $0x11] sm:$0xff]  ;;  %v2046_v10 = vld [vmem:[#allocation2 + $0x1f] sm:$0xff] }
 0x540   :  { %v2035_v58 = vld [vmem:[#allocation2 + $0x6] sm:$0xff]  ;;  %v2036_v4 = vld [vmem:[#allocation2 + $0xe] sm:$0xff]  ;;  %v2078_v5 = vpack.c.bf16 %v2060_v3, %v2059_v2  ;;  %v2045_v9 = vld [vmem:[#allocation2 + $0x17] sm:$0xff] }
 0x541   :  { %v2075_v32 = vpack.c.bf16 %v2036_v4, %v2035_v58  ;;  %v2061_v18 = vld [vmem:[#allocation2 + $0x19] sm:$0xff]  ;;  %2447 = vmatprep.mubr.bf16.mxu1 %v2076_v7  ;;  %v2081_v11 = vpack.c.bf16 %v2046_v10, %v2045_v9  ;;  %v2062_v12 = vld [vmem:[#allocation2 + $0x21] sm:$0xff]  ;;  %v2050_v29 = vld [vmem:[#allocation2 + $0x6f] sm:$0xff] }
 0x542   :  { %2512 = vmatprep.mubr.bf16.mxu0 %v2078_v5  ;;  %v2083_v13 = vpack.c.bf16 %v2062_v12, %v2061_v18  ;;  %v2037_v41 = vld [vmem:[#allocation2 + $0x16] sm:$0xff]  ;;  %v2038_v20 = vld [vmem:[#allocation2 + $0x1e] sm:$0xff]  ;;  %v2049_v28 = vld [vmem:[#allocation2 + $0x67] sm:$0xff] }
 0x543   :  { %2448 = vmatmul.mubr.bf16.vlgmr.msra.gmra.mrb[56].mxu1 %v2075_v32  ;;  %2513 = vmatmul.mubr.bf16.vlgmr.msra.gmra.mrb[72].mxu0 %v2077_v61  ;;  %v2047_v45 = vld [vmem:[#allocation2 + $0x57] sm:$0xff]  ;;  %v2048_v14 = vld [vmem:[#allocation2 + $0x5f] sm:$0xff]  ;;  %v2080_v16 = vpack.c.bf16 %v2038_v20, %v2037_v41  ;;  %v2065_v19 = vld [vmem:[#allocation2 + $0x69] sm:$0xff]  ;;  %v2091_v24 = vpack.c.bf16 %v2050_v29, %v2049_v28 }
 0x544   :  { %2455 = vmatprep.mubr.bf16.mxu1 %v2081_v11  ;;  %2520 = vmatprep.mubr.bf16.mxu0 %v2083_v13  ;;  %v2063_v15 = vld [vmem:[#allocation2 + $0x59] sm:$0xff]  ;;  %v2064_v56 = vld [vmem:[#allocation2 + $0x61] sm:$0xff]  ;;  %v2086_v8 = vpack.c.bf16 %v2048_v14, %v2047_v45  ;;  %v2066_v22 = vld [vmem:[#allocation2 + $0x71] sm:$0xff] }
 0x545   :  { %6033 = vmatpush3.bf16.msra.mxu1 %v7688_v23  ;;  %v2088_v46 = vpack.c.bf16 %v2064_v56, %v2063_v15  ;;  %v2039_v23 = vld [vmem:[#allocation2 + $0x56] sm:$0xff]  ;;  %v2040_v26 = vld [vmem:[#allocation2 + $0x5e] sm:$0xff]  ;;  %v2093_v34 = vpack.c.bf16 %v2066_v22, %v2065_v19  ;;  %v2041_v17 = vld [vmem:[#allocation2 + $0x66] sm:$0xff] }
 0x546   :  { %6034 = vmatprep.subr.bf16.mxu1 %v6498_v33  ;;  %v2085_v21 = vpack.c.bf16 %v2040_v26, %v2039_v23  ;;  %v2042_v30 = vld [vmem:[#allocation2 + $0x6e] sm:$0xff]  ;;  %v2069_v51 = vld [vmem:[#allocation2 + $0x1a] sm:$0xff]  ;;  %v2070_v52 = vld [vmem:[#allocation2 + $0x22] sm:$0xff] }
 0x547   :  { %v2067_v47 = vld [vmem:[#allocation2 + $0xa] sm:$0xff]  ;;  %v2068_v25 = vld [vmem:[#allocation2 + $0x12] sm:$0xff]  ;;  %v2090_v49 = vpack.c.bf16 %v2042_v30, %v2041_v17  ;;  %v2071_v53 = vld [vmem:[#allocation2 + $0x5a] sm:$0xff]  ;;  %v2084_v55 = vpack.c.bf16 %v2070_v52, %v2069_v51 }
 0x548   :  { %v2079_v50 = vpack.c.bf16 %v2068_v25, %v2067_v47  ;;  %v2072_v54 = vld [vmem:[#allocation2 + $0x62] sm:$0xff]  ;;  %v2073_v59 = vld [vmem:[#allocation2 + $0x6a] sm:$0xff]  ;;  %v2074_v60 = vld [vmem:[#allocation2 + $0x72] sm:$0xff] }
 0x549   :  { %6035 = vmatpush3.bf16.msra.mxu1 %v6498_v33  ;;  %v2089_v40 = vpack.c.bf16 %v2072_v54, %v2071_v53  ;;  %v2094_v61 = vpack.c.bf16 %v2074_v60, %v2073_v59 }
 0x54a   :  { %6036 = vmatprep.subr.bf16.mxu1 %v6499_v43 }
 0x54b   :  { %2456 = vmatmul.mubr.bf16.gmra.mrb[60].mxu1 %v2080_v16  ;;  %2521 = vmatmul.mubr.bf16.gmra.mrb[76].mxu0 %v2082_v62  ;;  %v7007_v62 = vmov -1e+30  }
 0x54c   :  { %2463 = vmatprep.mubr.bf16.mxu1 %v2086_v8  ;;  %2528 = vmatprep.mubr.bf16.mxu0 %v2088_v46  ;;  %2702 = vst [vmem:[#allocation2 + $0x7] sm:$0x1] %v7007_v62  ;;  %2703 = vst [vmem:[#allocation2 + $0x28] sm:$0x1] %v7007_v62 }
 0x54d   :  { %6037 = vmatpush3.bf16.msra.mxu1 %v6499_v43  ;;  %2708 = vst [vmem:[#allocation2 + $0x57] sm:$0x1] %v7007_v62  ;;  %2709 = vst [vmem:[#allocation2 + $0x78] sm:$0x1] %v7007_v62 }
 0x54e   :  { %6038 = vmatprep.subr.bf16.mxu1 %v6500_v39 }
 0x551   :  { %6039 = vmatpush3.bf16.msra.mxu1 %v6500_v39 }
 0x552   :  { %6040 = vmatprep.subr.bf16.mxu1 %v6501_v27 }
 0x553   :  { %2464 = vmatmul.mubr.bf16.gmra.mrb[64].mxu1 %v2085_v21  ;;  %2529 = vmatmul.mubr.bf16.gmra.mrb[80].mxu0 %v2087_v63 }
 0x554   :  { %2471 = vmatprep.mubr.bf16.mxu1 %v2091_v24  ;;  %2536 = vmatprep.mubr.bf16.mxu0 %v2093_v34 }
 0x555   :  { %6041 = vmatpush3.bf16.msra.mxu1 %v6501_v27 }
 0x556   :  { %6042 = vmatprep.subr.bf16.mxu1 %v6502_v31 }
 0x559   :  { %6043 = vmatpush3.bf16.msra.mxu1 %v6502_v31 }
 0x55a   :  { %6044 = vmatprep.subr.bf16.mxu1 %v6503_v35 }
 0x55b   :  { %2472 = vmatmul.mubr.bf16.gmra.mrb[68].mxu1 %v2090_v49  ;;  %2537 = vmatmul.mubr.bf16.gmra.mrb[84].mxu0 %v7691_v1 }
 0x55c   :  { %6048 = vmatprep.mubr.bf16.mxu1 %v2079_v50  ;;  %6064 = vmatprep.mubr.msk.f32.mxu0 %vm2754_vm5, %v7607_v44 }
 0x55d   :  { %6045 = vmatpush3.bf16.msra.mxu1 %v6503_v35 }
 0x55e   :  { %6046 = vmatprep.subr.bf16.mxu1 %v6504_v48 }
 0x561   :  { %6047 = vmatpush3.bf16.msra.mxu1 %v6504_v48 }
 0x564   :  { %6049 = vmatmul.mubr.bf16.vlgmr.msra.gmra.mrb[72].mxu1 %v2084_v55 }
 0x565   :  { %6052 = vmatprep.mubr.bf16.mxu1 %v2089_v40 }
 0x56c   :  { %6053 = vmatmul.mubr.bf16.gmra.mrb[76].mxu1 %v2094_v61 }
 0x56d   :  { %6075 = vmatprep.mubr.msk.f32.mxu1 %vm2754_vm5, %v7607_v44 }
 0x616   :  { %v5629_v63 = vpop.f32.mrb[56].mxu1  ;;  %v5669_v1 = vpop.f32.mrb[72].mxu0 }
 0x617   :  { %v5630_v6 = vpop.f32.mrb[57].mxu1  ;;  %v5670_v2 = vpop.f32.mrb[73].mxu0 }
 0x618   :  { %v5631_v57 = vadd.f32 %v5630_v6, %v5629_v63  ;;  %v5632_v7 = vpop.f32.mrb[58].mxu1  ;;  %v5671_v3 = vadd.f32 %v5670_v2, %v5669_v1  ;;  %v5672_v58 = vpop.f32.mrb[74].mxu0 }
 0x619   :  { %v5633_v4 = vpop.f32.mrb[59].mxu1  ;;  %v5673_v32 = vpop.f32.mrb[75].mxu0 }
 0x61a   :  { %v5634_v5 = vadd.f32 %v5633_v4, %v5632_v7  ;;  %v5674_v9 = vadd.f32 %v5673_v32, %v5672_v58  ;;  %v2515_v10 = vadd.f32 %v5671_v3, %v5631_v57 }
 0x61c   :  { %v2518_v18 = vadd.f32 %v5674_v9, %v5634_v5 }
 0x61e   :  { %v5635_v11 = vpop.f32.mrb[60].mxu1  ;;  %v5675_v12 = vpop.f32.mrb[76].mxu0 }
 0x61f   :  { %v5636_v33 = vpop.f32.mrb[61].mxu1  ;;  %v5676_v41 = vpop.f32.mrb[77].mxu0 }
 0x620   :  { %v5637_v13 = vadd.f32 %v5636_v33, %v5635_v11  ;;  %v5638_v20 = vpop.f32.mrb[62].mxu1  ;;  %v5677_v43 = vadd.f32 %v5676_v41, %v5675_v12  ;;  %v5678_v45 = vpop.f32.mrb[78].mxu0 }
 0x621   :  { %v5639_v14 = vpop.f32.mrb[63].mxu1  ;;  %v5679_v56 = vpop.f32.mrb[79].mxu0 }
 0x622   :  { %v5640_v15 = vadd.f32 %v5639_v14, %v5638_v20  ;;  %v5680_v16 = vadd.f32 %v5679_v56, %v5678_v45  ;;  %v2523_v8 = vadd.f32 %v5677_v43, %v5637_v13 }
 0x624   :  { %v2526_v39 = vadd.f32 %v5680_v16, %v5640_v15 }
 0x626   :  { %v5641_v46 = vpop.f32.mrb[64].mxu1  ;;  %v5681_v23 = vpop.f32.mrb[80].mxu0 }
 0x627   :  { %v5642_v26 = vpop.f32.mrb[65].mxu1  ;;  %v5682_v28 = vpop.f32.mrb[81].mxu0 }
 0x628   :  { %v5643_v27 = vadd.f32 %v5642_v26, %v5641_v46  ;;  %v5644_v29 = vpop.f32.mrb[66].mxu1  ;;  %v5683_v19 = vadd.f32 %v5682_v28, %v5681_v23  ;;  %v5684_v22 = vpop.f32.mrb[82].mxu0 }
 0x629   :  { %v5645_v21 = vpop.f32.mrb[67].mxu1  ;;  %v5685_v31 = vpop.f32.mrb[83].mxu0 }
 0x62a   :  { %v5646_v24 = vadd.f32 %v5645_v21, %v5644_v29  ;;  %v5686_v34 = vadd.f32 %v5685_v31, %v5684_v22  ;;  %v2531_v17 = vadd.f32 %v5683_v19, %v5643_v27 }
 0x62c   :  { %v2534_v30 = vadd.f32 %v5686_v34, %v5646_v24 }
 0x62e   :  { %v5647_v35 = vpop.f32.mrb[68].mxu1  ;;  %v5687_v47 = vpop.f32.mrb[84].mxu0 }
 0x62f   :  { %v5648_v25 = vpop.f32.mrb[69].mxu1  ;;  %v5688_v50 = vpop.f32.mrb[85].mxu0 }
 0x630   :  { %v5649_v49 = vadd.f32 %v5648_v25, %v5647_v35  ;;  %v5650_v48 = vpop.f32.mrb[70].mxu1  ;;  %v5689_v51 = vadd.f32 %v5688_v50, %v5687_v47  ;;  %v5690_v52 = vpop.f32.mrb[86].mxu0 }
 0x631   :  { %v5651_v53 = vpop.f32.mrb[71].mxu1  ;;  %v5691_v55 = vpop.f32.mrb[87].mxu0 }
 0x632   :  { %v5652_v54 = vadd.f32 %v5651_v53, %v5650_v48  ;;  %v5692_v40 = vadd.f32 %v5691_v55, %v5690_v52  ;;  %v2539_v59 = vadd.f32 %v5689_v51, %v5649_v49 }
 0x634   :  { %v2542_v60 = vadd.f32 %v5692_v40, %v5652_v54 }
 0x637   :  { %v6050_v61 = vpop.f32.mrb[72].mxu1 }
 0x638   :  { %v2588_v62 = vadd.f32 %v6050_v61, %v2523_v8  ;;  %v2579_v63 = vpop.f32.mrb[73].mxu1 }
 0x639   :  { %v2580_v1 = vadd.f32 %v2579_v63, %v2515_v10  ;;  %v6051_v6 = vpop.f32.mrb[74].mxu1 }
 0x63a   :  { %v2591_v57 = vadd.f32 %v6051_v6, %v2526_v39  ;;  %v2582_v2 = vpop.f32.mrb[75].mxu1  ;;  %v5232_v6 = vld [vmem:[#allocation12] ss:$0 sm:$0xff] }
 0x63b   :  { %v2583_v7 = vadd.f32 %v2582_v2, %v2518_v18 }
 0x63d   :  { %v2610_v3 = vadd.f32 %v2583_v7, %v2580_v1 }
 0x63f   :  { %v2611_v58 = vadd.f32 %v2610_v3, %v2588_v62  ;;  %v6054_v4 = vpop.f32.mrb[76].mxu1 }
 0x640   :  { %v2604_v5 = vadd.f32 %v6054_v4, %v2539_v59  ;;  %v2595_v32 = vpop.f32.mrb[77].mxu1 }
 0x641   :  { %v2596_v9 = vadd.f32 %v2595_v32, %v2531_v17  ;;  %v2612_v11 = vadd.f32 %v2611_v58, %v2591_v57  ;;  %v6055_v12 = vpop.f32.mrb[78].mxu1 }
 0x642   :  { %v2607_v33 = vadd.f32 %v6055_v12, %v2542_v60  ;;  %v2598_v13 = vpop.f32.mrb[79].mxu1 }
 0x643   :  { %v2613_v41 = vadd.f32 %v2612_v11, %v2596_v9  ;;  %v2599_v20 = vadd.f32 %v2598_v13, %v2534_v30 }
 0x645   :  { %v2614_v43 = vadd.f32 %v2613_v41, %v2599_v20 }
 0x647   :  { %v2615_v45 = vadd.f32 %v2614_v43, %v2604_v5 }
 0x649   :  { %v2616_v14 = vadd.f32 %v2615_v45, %v2607_v33 }
 0x64b   :  { %v2617_v10 = vrot.slane %v2616_v14, 4 }
 0x64d   :  { %v2618_v15 = vadd.f32 %v2617_v10, %v2616_v14 }
 0x64f   :  { %v2619_v56 = vrot.slane %v2618_v15, 2 }
 0x651   :  { %v2620_v16 = vadd.f32 %v2619_v56, %v2618_v15 }
 0x653   :  { %v2621_v18 = vrot.slane %v2620_v16, 1 }
 0x655   :  { %v2622_v8 = vadd.f32 %v2621_v18, %v2620_v16 }
 0x657   :  { %v2623_v39 = vmul.f32 0.015625, %v2622_v8 }
 0x659   :  { %v2624_v46 = vsub.f32 %v2580_v1, %v2623_v39  ;;  %v2625_v23 = vsub.f32 %v2583_v7, %v2623_v39  ;;  %v2626_v26 = vsub.f32 %v2588_v62, %v2623_v39  ;;  %v2627_v27 = vsub.f32 %v2591_v57, %v2623_v39 }
 0x65a   :  { %v2628_v28 = vsub.f32 %v2596_v9, %v2623_v39  ;;  %v2629_v29 = vsub.f32 %v2599_v20, %v2623_v39  ;;  %v2630_v19 = vsub.f32 %v2604_v5, %v2623_v39  ;;  %v2631_v22 = vsub.f32 %v2607_v33, %v2623_v39  ;;  %v5233_v9 = vld [vmem:[#allocation14] ss:$0 sm:$0xff] }
 0x65b   :  { %v2632_v21 = vmul.f32 %v2624_v46, %v2624_v46  ;;  %v2633_v24 = vmul.f32 %v2625_v23, %v2625_v23  ;;  %v2634_v31 = vmul.f32 %v2626_v26, %v2626_v26  ;;  %v2635_v17 = vmul.f32 %v2627_v27, %v2627_v27 }
 0x65c   :  { %v2636_v35 = vmul.f32 %v2628_v28, %v2628_v28  ;;  %v2637_v25 = vmul.f32 %v2629_v29, %v2629_v29  ;;  %v2638_v50 = vmul.f32 %v2630_v19, %v2630_v19  ;;  %v2639_v51 = vmul.f32 %v2631_v22, %v2631_v22 }
 0x65d   :  { %v2640_v34 = vadd.f32 %v2633_v24, %v2632_v21 }
 0x65f   :  { %v2641_v30 = vadd.f32 %v2640_v34, %v2634_v31 }
 0x661   :  { %v2642_v47 = vadd.f32 %v2641_v30, %v2635_v17 }
 0x663   :  { %v2643_v49 = vadd.f32 %v2642_v47, %v2636_v35 }
 0x665   :  { %v2644_v48 = vadd.f32 %v2643_v49, %v2637_v25 }
 0x667   :  { %v2645_v52 = vadd.f32 %v2644_v48, %v2638_v50 }
 0x669   :  { %v2646_v53 = vadd.f32 %v2645_v52, %v2639_v51 }
 0x66b   :  { %v2647_v54 = vrot.slane %v2646_v53, 4 }
 0x66d   :  { %v2648_v55 = vadd.f32 %v2647_v54, %v2646_v53 }
 0x66f   :  { %v2649_v40 = vrot.slane %v2648_v55, 2 }
 0x671   :  { %v2650_v59 = vadd.f32 %v2649_v40, %v2648_v55 }
 0x673   :  { %v2651_v60 = vrot.slane %v2650_v59, 1 }
 0x675   :  { %v2652_v61 = vadd.f32 %v2651_v60, %v2650_v59 }
 0x677   :  { %v2653_v62 = vmul.f32 0.015625, %v2652_v61 }
 0x679   :  { %v2654_v63 = vadd.f32 1e-05, %v2653_v62 }
 0x67b   :  { %6605 = vrsqrt.f32 %v2654_v63 }
 0x685   :  { %v6606_v1 = vpop.eup %6605 }
 0x686   :  { %v2656_v57 = vmul.f32 %v6606_v1, %v2624_v46  ;;  %v2657_v2 = vmul.f32 %v6606_v1, %v2625_v23  ;;  %v2658_v7 = vmul.f32 %v6606_v1, %v2626_v26  ;;  %v2659_v3 = vmul.f32 %v6606_v1, %v2627_v27 }
 0x687   :  { %v2660_v58 = vmul.f32 %v6606_v1, %v2628_v28  ;;  %v2661_v4 = vmul.f32 %v6606_v1, %v2629_v29  ;;  %v2662_v5 = vmul.f32 %v6606_v1, %v2630_v19  ;;  %v2663_v32 = vmul.f32 %v6606_v1, %v2631_v22 }
 0x688   :  { %v2671_v11 = vmul.f32 %v5232_v6, %v2656_v57  ;;  %v2672_v12 = vmul.f32 %v5232_v6, %v2657_v2  ;;  %v2673_v33 = vmul.f32 %v5232_v6, %v2658_v7  ;;  %v2674_v13 = vmul.f32 %v5232_v6, %v2659_v3 }
 0x689   :  { %v2675_v41 = vmul.f32 %v5232_v6, %v2660_v58  ;;  %v2676_v20 = vmul.f32 %v5232_v6, %v2661_v4  ;;  %v2677_v43 = vmul.f32 %v5232_v6, %v2662_v5  ;;  %v2678_v45 = vmul.f32 %v5232_v6, %v2663_v32 }
 0x68a   :  { %v2686_v14 = vadd.f32 %v5233_v9, %v2671_v11  ;;  %v2687_v10 = vadd.f32 %v5233_v9, %v2672_v12  ;;  %v2688_v15 = vadd.f32 %v5233_v9, %v2673_v33  ;;  %v2689_v56 = vadd.f32 %v5233_v9, %v2674_v13  ;;  %v6505_v33 = vld [vmem:[#allocation15 + $0x40] sm:$0xff]  }
 0x68b   :  { %v2690_v16 = vadd.f32 %v5233_v9, %v2675_v41  ;;  %v2691_v18 = vadd.f32 %v5233_v9, %v2676_v20  ;;  %v2692_v8 = vadd.f32 %v5233_v9, %v2677_v43  ;;  %v2693_v39 = vadd.f32 %v5233_v9, %v2678_v45  ;;  %v6509_v13 = vld [vmem:[#allocation15 + $0x80] sm:$0xff]   ;;  %v6507_v20 = vld [vmem:[#allocation15 + $0x48] sm:$0xff]  }
 0x68c   :  { %v2694_v46 = vmax.f32 %v2686_v14, 0.0  ;;  %v2695_v23 = vmax.f32 %v2687_v10, 0.0  ;;  %v2696_v26 = vmax.f32 %v2688_v15, 0.0  ;;  %v2697_v27 = vmax.f32 %v2689_v56, 0.0  ;;  %v6506_v41 = vld [vmem:[#allocation15] sm:$0xff]   ;;  %v6512_v43 = vld [vmem:[#allocation15 + $0x88] sm:$0xff]  }
 0x68d   :  { %v2698_v28 = vmax.f32 %v2690_v16, 0.0  ;;  %v2699_v29 = vmax.f32 %v2691_v18, 0.0  ;;  %v2700_v19 = vmax.f32 %v2692_v8, 0.0  ;;  %v2701_v22 = vmax.f32 %v2693_v39, 0.0  ;;  %v6508_v45 = vld [vmem:[#allocation15 + $0x8] sm:$0xff]   ;;  %v6510_v14 = vld [vmem:[#allocation15 + $0x50] sm:$0xff]  }
 0x68e   :  { %2704 = vst [vmem:[#allocation2 + $0x8] sm:$0xff] %v2694_v46  ;;  %2705 = vst [vmem:[#allocation2 + $0x10] sm:$0xff] %v2695_v23  ;;  %v6515_v10 = vld [vmem:[#allocation15 + $0x90] sm:$0xff]   ;;  %v6513_v56 = vld [vmem:[#allocation15 + $0x58] sm:$0xff]  }
 0x68f   :  { %2706 = vst [vmem:[#allocation2 + $0x18] sm:$0xff] %v2696_v26  ;;  %2707 = vst [vmem:[#allocation2 + $0x20] sm:$0xff] %v2697_v27  ;;  %v6511_v15 = vld [vmem:[#allocation15 + $0x10] sm:$0xff]   ;;  %v6518_v16 = vld [vmem:[#allocation15 + $0x98] sm:$0xff]  }
 0x690   :  { %2710 = vst [vmem:[#allocation2 + $0x58] sm:$0xff] %v2698_v28  ;;  %2711 = vst [vmem:[#allocation2 + $0x60] sm:$0xff] %v2699_v29  ;;  %v6514_v18 = vld [vmem:[#allocation15 + $0x18] sm:$0xff]   ;;  %v6516_v8 = vld [vmem:[#allocation15 + $0x60] sm:$0xff]  }
 0x691   :  { %2712 = vst [vmem:[#allocation2 + $0x68] sm:$0xff] %v2700_v19  ;;  %2713 = vst [vmem:[#allocation2 + $0x70] sm:$0xff] %v2701_v22  ;;  %v6519_v39 = vld [vmem:[#allocation15 + $0x68] sm:$0xff]  }
 0x695   :  { %v2714_v21 = vld [vmem:[#allocation2 + $0x7] sm:$0xff]  ;;  %v2715_v24 = vld [vmem:[#allocation2 + $0xf] sm:$0xff] }
 0x696   :  { %v2738_v31 = vmax.f32 %v2714_v21, %v2694_v46  ;;  %v2739_v34 = vmax.f32 %v2715_v24, %v2695_v23  ;;  %2909 = vst [vmem:[#allocation2 + $0x7] sm:$0x1] %v7006_v0  ;;  %v2730_v35 = vld [vmem:[#allocation2 + $0x9] sm:$0xff]  ;;  %v2731_v47 = vld [vmem:[#allocation2 + $0x11] sm:$0xff]  ;;  %v2717_v54 = vld [vmem:[#allocation2 + $0x1f] sm:$0xff] }
 0x697   :  { %v2718_v17 = vld [vmem:[#allocation2 + $0x57] sm:$0xff]  ;;  %v2719_v30 = vld [vmem:[#allocation2 + $0x5f] sm:$0xff]  ;;  %v2741_v61 = vmax.f32 %v2717_v54, %v2697_v27  ;;  %v6521_v23 = vld [vmem:[#allocation15 + $0xa0] sm:$0xff]  }
 0x698   :  { %v2742_v25 = vmax.f32 %v2718_v17, %v2698_v28  ;;  %v2743_v49 = vmax.f32 %v2719_v30, %v2699_v29  ;;  %2913 = vst [vmem:[#allocation2 + $0x57] sm:$0x1] %v7006_v0  ;;  %v2716_v50 = vld [vmem:[#allocation2 + $0x17] sm:$0xff]  ;;  %v2746_v48 = vmax.f32 %v2738_v31, %v2730_v35  ;;  %v2747_v51 = vmax.f32 %v2739_v34, %v2731_v47  ;;  %v2735_v53 = vld [vmem:[#allocation2 + $0x61] sm:$0xff]  ;;  %v2721_v63 = vld [vmem:[#allocation2 + $0x6f] sm:$0xff] }
 0x699   :  { %v2734_v52 = vld [vmem:[#allocation2 + $0x59] sm:$0xff]  ;;  %v2740_v55 = vmax.f32 %v2716_v50, %v2696_v26  ;;  %2910 = vst [vmem:[#allocation2 + $0x18] sm:$0x1] %v7006_v0  ;;  %v2720_v62 = vld [vmem:[#allocation2 + $0x67] sm:$0xff]  ;;  %v2745_v7 = vmax.f32 %v2721_v63, %v2701_v22  ;;  %v2737_v5 = vld [vmem:[#allocation2 + $0x71] sm:$0xff] }
 0x69a   :  { %v2750_v40 = vmax.f32 %v2742_v25, %v2734_v52  ;;  %v2751_v59 = vmax.f32 %v2743_v49, %v2735_v53  ;;  %v2732_v60 = vld [vmem:[#allocation2 + $0x19] sm:$0xff]  ;;  %v6267_v1 = vpack.c.bf16 %v2747_v51, %v2746_v48  ;;  %v2733_v6 = vld [vmem:[#allocation2 + $0x21] sm:$0xff]  ;;  %v2744_v2 = vmax.f32 %v2720_v62, %v2700_v19  ;;  %2914 = vst [vmem:[#allocation2 + $0x68] sm:$0x1] %v7006_v0  ;;  %v2736_v4 = vld [vmem:[#allocation2 + $0x69] sm:$0xff] }
 0x69b   :  { %v2748_v57 = vmax.f32 %v2740_v55, %v2732_v60  ;;  %v2749_v58 = vmax.f32 %v2741_v61, %v2733_v6  ;;  %v2753_v9 = vmax.f32 %v2745_v7, %v2737_v5  ;;  %v6520_v46 = vld [vmem:[#allocation15 + $0x28] sm:$0xff]   ;;  %v6522_v26 = vld [vmem:[#allocation15 + $0x70] sm:$0xff]   ;;  %v6525_v29 = vld [vmem:[#allocation15 + $0x78] sm:$0xff]  }
 0x69c   :  { %v6275_v3 = vpack.c.bf16 %v2751_v59, %v2750_v40  ;;  %6268 = vmatprep.subr.bf16.mxu0 %v6267_v1  ;;  %v2752_v32 = vmax.f32 %v2744_v2, %v2736_v4  ;;  %v6524_v27 = vld [vmem:[#allocation15 + $0xa8] sm:$0xff]   ;;  %v6523_v28 = vld [vmem:[#allocation15 + $0x30] sm:$0xff]   ;;  %v6526_v22 = vld [vmem:[#allocation15 + $0x38] sm:$0xff]  }
 0x69d   :  { %6270 = vmatpush3.bf16.msra.mxu0 %v6267_v1  ;;  %v6271_v11 = vpack.c.bf16 %v2749_v58, %v2748_v57  ;;  %v6527_v19 = vld [vmem:[#allocation15 + $0xb0] sm:$0xff]   ;;  %v6528_v21 = vld [vmem:[#allocation15 + $0xb8] sm:$0xff]   ;;  %v6529_v60 = vld [vmem:[#allocation20 + $0x40] sm:$0xff]  }
 0x69e   :  { %6276 = vmatprep.subr.bf16.mxu1 %v6275_v3  ;;  %v6279_v12 = vpack.c.bf16 %v2753_v9, %v2752_v32  ;;  %v6530_v61 = vld [vmem:[#allocation20 + $0x80] sm:$0xff]   ;;  %v6532_v63 = vld [vmem:[#allocation20 + $0x48] sm:$0xff]   ;;  %v6535_v57 = vld [vmem:[#allocation20 + $0x50] sm:$0xff]  }
 0x69f   :  { %6278 = vmatpush3.bf16.msra.mxu1 %v6275_v3  ;;  %6272 = vmatprep.subr.bf16.mxu0 %v6271_v11  ;;  %v6531_v62 = vld [vmem:[#allocation20] sm:$0xff]   ;;  %v6533_v1 = vld [vmem:[#allocation20 + $0x88] sm:$0xff]   ;;  %v6536_v2 = vld [vmem:[#allocation20 + $0x90] sm:$0xff]  }
 0x6a0   :  { %6280 = vmatprep.subr.bf16.mxu1 %v6279_v12  ;;  %v6534_v6 = vld [vmem:[#allocation20 + $0x8] sm:$0xff]   ;;  %v6537_v7 = vld [vmem:[#allocation20 + $0x10] sm:$0xff]   ;;  %v6538_v3 = vld [vmem:[#allocation20 + $0x58] sm:$0xff]  }
 0x6a1   :  { %6274 = vmatpush3.bf16.msra.mxu0 %v6271_v11  ;;  %v6539_v58 = vld [vmem:[#allocation20 + $0x98] sm:$0xff]   ;;  %v6541_v5 = vld [vmem:[#allocation20 + $0x60] sm:$0xff]   ;;  %v6544_v11 = vld [vmem:[#allocation20 + $0x68] sm:$0xff]  }
 0x6a2   :  { %5717 = vmatprep.subr.bf16.mxu0 %v6505_v33  ;;  %v6540_v4 = vld [vmem:[#allocation20 + $0x18] sm:$0xff]   ;;  %v6542_v32 = vld [vmem:[#allocation20 + $0xa0] sm:$0xff]   ;;  %v6546_v33 = vld [vmem:[#allocation20 + $0x28] sm:$0xff]  }
 0x6a3   :  { %6282 = vmatpush3.bf16.msra.mxu1 %v6279_v12  ;;  %v6543_v9 = vld [vmem:[#allocation20 + $0x20] sm:$0xff]   ;;  %v6545_v12 = vld [vmem:[#allocation20 + $0xa8] sm:$0xff]  }
 0x6a4   :  { %6078 = vmatprep.subr.bf16.mxu1 %v6509_v13  ;;  %6065 = vmatmul.mubr.msk.f32.vlgmr.msra.gmra.mrb[88].mxu0 %vm2754_vm5, %v7654_v42 }
 0x6a5   :  { %5718 = vmatpush3.bf16.msra.mxu0 %v6506_v41  ;;  %v6548_v41 = vld [vmem:[#allocation20 + $0xb0] sm:$0xff]  }
 0x6a6   :  { %6076 = vmatmul.mubr.msk.f32.vlgmr.msra.gmra.mrb[80].mxu1 %vm2754_vm5, %v7654_v42  ;;  %5719 = vmatprep.subr.bf16.mxu0 %v6507_v20  ;;  %v6517_v42 = vld [vmem:[#allocation15 + $0x20] sm:$0xff]   ;;  %v6549_v20 = vld [vmem:[#allocation20 + $0x30] sm:$0xff]  }
 0x6a7   :  { %6079 = vmatpush3.bf16.msra.mxu1 %v6509_v13  ;;  %v6547_v13 = vld [vmem:[#allocation20 + $0x70] sm:$0xff]  }
 0x6a8   :  { %6080 = vmatprep.subr.bf16.mxu1 %v6512_v43 }
 0x6a9   :  { %5720 = vmatpush3.bf16.msra.mxu0 %v6508_v45  ;;  %v6551_v45 = vld [vmem:[#allocation20 + $0xb8] sm:$0xff]  }
 0x6aa   :  { %5721 = vmatprep.subr.bf16.mxu0 %v6510_v14  ;;  %v6552_v14 = vld [vmem:[#allocation20 + $0x38] sm:$0xff]  }
 0x6ab   :  { %6081 = vmatpush3.bf16.msra.mxu1 %v6512_v43  ;;  %v6550_v43 = vld [vmem:[#allocation20 + $0x78] sm:$0xff]  }
 0x6ac   :  { %6082 = vmatprep.subr.bf16.mxu1 %v6515_v10 }
 0x6ad   :  { %5722 = vmatpush3.bf16.msra.mxu0 %v6511_v15 }
 0x6ae   :  { %5723 = vmatprep.subr.bf16.mxu0 %v6513_v56 }
 0x6af   :  { %6083 = vmatpush3.bf16.msra.mxu1 %v6515_v10 }
 0x6b0   :  { %6084 = vmatprep.subr.bf16.mxu1 %v6518_v16 }
 0x6b1   :  { %5724 = vmatpush3.bf16.msra.mxu0 %v6514_v18 }
 0x6b2   :  { %5725 = vmatprep.subr.bf16.mxu0 %v6516_v8 }
 0x6b3   :  { %6085 = vmatpush3.bf16.msra.mxu1 %v6518_v16 }
 0x6b4   :  { %6086 = vmatprep.subr.bf16.mxu1 %v6521_v23 }
 0x6b5   :  { %5726 = vmatpush3.bf16.msra.mxu0 %v6517_v42 }
 0x6b6   :  { %5727 = vmatprep.subr.bf16.mxu0 %v6519_v39 }
 0x6b7   :  { %6087 = vmatpush3.bf16.msra.mxu1 %v6521_v23 }
 0x6b8   :  { %6088 = vmatprep.subr.bf16.mxu1 %v6524_v27 }
 0x6b9   :  { %5728 = vmatpush3.bf16.msra.mxu0 %v6520_v46 }
 0x6ba   :  { %5729 = vmatprep.subr.bf16.mxu0 %v6522_v26 }
 0x6bb   :  { %6089 = vmatpush3.bf16.msra.mxu1 %v6524_v27 }
 0x6bc   :  { %6090 = vmatprep.subr.bf16.mxu1 %v6527_v19 }
 0x6bd   :  { %5730 = vmatpush3.bf16.msra.mxu0 %v6523_v28 }
 0x6be   :  { %5731 = vmatprep.subr.bf16.mxu0 %v6525_v29 }
 0x6bf   :  { %6091 = vmatpush3.bf16.msra.mxu1 %v6527_v19 }
 0x6c0   :  { %6092 = vmatprep.subr.bf16.mxu1 %v6528_v21 }
 0x6c1   :  { %5732 = vmatpush3.bf16.msra.mxu0 %v6526_v22 }
 0x6c2   :  { %5755 = vmatprep.subr.bf16.mxu0 %v6529_v60 }
 0x6c3   :  { %6093 = vmatpush3.bf16.msra.mxu1 %v6528_v21 }
 0x6c4   :  { %6098 = vmatprep.subr.bf16.mxu1 %v6530_v61 }
 0x777   :  { %v7707_v24 = vpop.f32.mrb[88].mxu0 }
 0x778   :  { %2912 = vst [vmem:[#allocation2 + $0x10] sm:$0xff] %v7707_v24  ;;  %v7710_v31 = vpop.f32.mrb[89].mxu0 }
 0x779   :  { %v7712_v34 = vpop.f32.mrb[80].mxu1  ;;  %2911 = vst [vmem:[#allocation2 + $0x8] sm:$0xff] %v7710_v31  ;;  %v2930_v30 = vpack.c.bf16 %v7707_v24, %v7710_v31 }
 0x77a   :  { %2916 = vst [vmem:[#allocation2 + $0x60] sm:$0xff] %v7712_v34  ;;  %v7716_v17 = vpop.f32.mrb[81].mxu1 }
 0x77b   :  { %2915 = vst [vmem:[#allocation2 + $0x58] sm:$0xff] %v7716_v17  ;;  %v2933_v35 = vpack.c.bf16 %v7712_v34, %v7716_v17  ;;  %3159 = vmatprep.mubr.bf16.mxu0 %v2930_v30 }
 0x77f   :  { %v2926_v47 = vld [vmem:[#allocation2 + $0x11] sm:$0xff] }
 0x780   :  { %v2917_v25 = vld [vmem:[#allocation2 + $0x7] sm:$0xff]  ;;  %v2918_v49 = vld [vmem:[#allocation2 + $0xf] sm:$0xff]  ;;  %3287 = vst [vmem:[#allocation2 + $0x18] sm:$0x1] %v7006_v0 }
 0x781   :  { %v2925_v50 = vld [vmem:[#allocation2 + $0x9] sm:$0xff]  ;;  %v2929_v48 = vpack.c.bf16 %v2918_v49, %v2917_v25  ;;  %3286 = vst [vmem:[#allocation2 + $0x7] sm:$0x1] %v7006_v0  ;;  %v2928_v53 = vld [vmem:[#allocation2 + $0x61] sm:$0xff] }
 0x782   :  { %v2931_v51 = vpack.c.bf16 %v2926_v47, %v2925_v50  ;;  %v2927_v52 = vld [vmem:[#allocation2 + $0x59] sm:$0xff]  ;;  %3291 = vst [vmem:[#allocation2 + $0x68] sm:$0x1] %v7006_v0 }
 0x783   :  { %v2919_v54 = vld [vmem:[#allocation2 + $0x57] sm:$0xff]  ;;  %v2934_v55 = vpack.c.bf16 %v2928_v53, %v2927_v52  ;;  %3160 = vmatmul.mubr.bf16.vlgmr.msra.gmra.mrb[92].mxu0 %v2929_v48  ;;  %v2920_v40 = vld [vmem:[#allocation2 + $0x5f] sm:$0xff] }
 0x784   :  { %3290 = vst [vmem:[#allocation2 + $0x57] sm:$0x1] %v7006_v0  ;;  %6094 = vmatprep.mubr.bf16.mxu1 %v2931_v51  ;;  %3167 = vmatprep.mubr.bf16.mxu0 %v2933_v35  ;;  %v2932_v59 = vpack.c.bf16 %v2920_v40, %v2919_v54 }
 0x785   :  { %6095 = vmatmul.mubr.bf16.vlgmr.msra.gmra.mrb[84].mxu1 %v2934_v55  ;;  %5756 = vmatpush3.bf16.msra.mxu0 %v6531_v62 }
 0x786   :  { %6099 = vmatpush3.bf16.msra.mxu1 %v6530_v61  ;;  %5757 = vmatprep.subr.bf16.mxu0 %v6532_v63 }
 0x787   :  { %6100 = vmatprep.subr.bf16.mxu1 %v6533_v1 }
 0x789   :  { %5758 = vmatpush3.bf16.msra.mxu0 %v6534_v6 }
 0x78a   :  { %6101 = vmatpush3.bf16.msra.mxu1 %v6533_v1  ;;  %5759 = vmatprep.subr.bf16.mxu0 %v6535_v57 }
 0x78b   :  { %3168 = vmatmul.mubr.bf16.gmra.mrb[96].mxu0 %v2932_v59  ;;  %6102 = vmatprep.subr.bf16.mxu1 %v6536_v2 }
 0x78d   :  { %5760 = vmatpush3.bf16.msra.mxu0 %v6537_v7 }
 0x78e   :  { %6103 = vmatpush3.bf16.msra.mxu1 %v6536_v2  ;;  %5761 = vmatprep.subr.bf16.mxu0 %v6538_v3 }
 0x78f   :  { %6104 = vmatprep.subr.bf16.mxu1 %v6539_v58 }
 0x791   :  { %5762 = vmatpush3.bf16.msra.mxu0 %v6540_v4 }
 0x792   :  { %6105 = vmatpush3.bf16.msra.mxu1 %v6539_v58  ;;  %5763 = vmatprep.subr.bf16.mxu0 %v6541_v5 }
 0x793   :  { %6106 = vmatprep.subr.bf16.mxu1 %v6542_v32 }
 0x795   :  { %5764 = vmatpush3.bf16.msra.mxu0 %v6543_v9 }
 0x796   :  { %6107 = vmatpush3.bf16.msra.mxu1 %v6542_v32  ;;  %5765 = vmatprep.subr.bf16.mxu0 %v6544_v11 }
 0x797   :  { %6108 = vmatprep.subr.bf16.mxu1 %v6545_v12 }
 0x799   :  { %5766 = vmatpush3.bf16.msra.mxu0 %v6546_v33 }
 0x79a   :  { %6109 = vmatpush3.bf16.msra.mxu1 %v6545_v12  ;;  %5767 = vmatprep.subr.bf16.mxu0 %v6547_v13 }
 0x79b   :  { %6110 = vmatprep.subr.bf16.mxu1 %v6548_v41 }
 0x79d   :  { %5768 = vmatpush3.bf16.msra.mxu0 %v6549_v20 }
 0x79e   :  { %6111 = vmatpush3.bf16.msra.mxu1 %v6548_v41  ;;  %5769 = vmatprep.subr.bf16.mxu0 %v6550_v43  ;;  %v5262_v41 = vld [vmem:[#allocation17] ss:$0 sm:$0xff] }
 0x79f   :  { %6112 = vmatprep.subr.bf16.mxu1 %v6551_v45 }
 0x7a1   :  { %5770 = vmatpush3.bf16.msra.mxu0 %v6552_v14 }
 0x7a2   :  { %6113 = vmatpush3.bf16.msra.mxu1 %v6551_v45 }
 0x856   :  { %v5733_v10 = vpop.f32.mrb[92].mxu0 }
 0x857   :  { %v5734_v15 = vpop.f32.mrb[93].mxu0 }
 0x858   :  { %v6096_v56 = vpop.f32.mrb[84].mxu1  ;;  %v5735_v16 = vadd.f32 %v5734_v15, %v5733_v10  ;;  %v5736_v18 = vpop.f32.mrb[94].mxu0  ;;  %v5263_v10 = vld [vmem:[#allocation18] ss:$0 sm:$0xff] }
 0x859   :  { %v3210_v8 = vpop.f32.mrb[85].mxu1  ;;  %v5737_v42 = vpop.f32.mrb[95].mxu0 }
 0x85a   :  { %v6097_v39 = vpop.f32.mrb[86].mxu1  ;;  %v5738_v46 = vadd.f32 %v5737_v42, %v5736_v18  ;;  %v3211_v23 = vadd.f32 %v5735_v16, %v3210_v8 }
 0x85b   :  { %v3213_v26 = vpop.f32.mrb[87].mxu1 }
 0x85c   :  { %v3214_v27 = vadd.f32 %v5738_v46, %v3213_v26 }
 0x85e   :  { %v5739_v28 = vpop.f32.mrb[96].mxu0  ;;  %v3225_v29 = vadd.f32 %v3214_v27, %v3211_v23 }
 0x85f   :  { %v5740_v19 = vpop.f32.mrb[97].mxu0 }
 0x860   :  { %v5741_v22 = vadd.f32 %v5740_v19, %v5739_v28  ;;  %v5742_v21 = vpop.f32.mrb[98].mxu0 }
 0x861   :  { %v5743_v30 = vpop.f32.mrb[99].mxu0 }
 0x862   :  { %v3219_v35 = vadd.f32 %v6096_v56, %v5741_v22  ;;  %v5744_v47 = vadd.f32 %v5743_v30, %v5742_v21 }
 0x864   :  { %v3226_v25 = vadd.f32 %v3225_v29, %v3219_v35  ;;  %v3222_v49 = vadd.f32 %v6097_v39, %v5744_v47 }
 0x866   :  { %v3227_v50 = vadd.f32 %v3226_v25, %v3222_v49 }
 0x868   :  { %v3228_v48 = vrot.slane %v3227_v50, 4 }
 0x86a   :  { %v3229_v51 = vadd.f32 %v3228_v48, %v3227_v50 }
 0x86c   :  { %v3230_v52 = vrot.slane %v3229_v51, 2 }
 0x86e   :  { %v3231_v53 = vadd.f32 %v3230_v52, %v3229_v51 }
 0x870   :  { %v3232_v54 = vrot.slane %v3231_v53, 1 }
 0x872   :  { %v3233_v55 = vadd.f32 %v3232_v54, %v3231_v53  ;;  %v6553_v54 = vld [vmem:[#allocation23 + $0x40] sm:$0xff]  }
 0x873   :  { %5793 = vmatprep.subr.bf16.mxu0 %v6553_v54 }
 0x874   :  { %v3235_v40 = vmul.f32 0.03125, %v3233_v55  ;;  %v6554_v55 = vld [vmem:[#allocation23 + $0x80] sm:$0xff]  }
 0x875   :  { %6118 = vmatprep.subr.bf16.mxu1 %v6554_v55 }
 0x876   :  { %v3236_v59 = vsub.f32 %v3211_v23, %v3235_v40  ;;  %v3237_v60 = vsub.f32 %v3214_v27, %v3235_v40  ;;  %v3238_v61 = vsub.f32 %v3219_v35, %v3235_v40  ;;  %v3239_v62 = vsub.f32 %v3222_v49, %v3235_v40  ;;  %v6555_v40 = vld [vmem:[#allocation23] sm:$0xff]  }
 0x878   :  { %v3240_v63 = vmul.f32 %v3236_v59, %v3236_v59  ;;  %v3241_v1 = vmul.f32 %v3237_v60, %v3237_v60  ;;  %v3242_v6 = vmul.f32 %v3238_v61, %v3238_v61  ;;  %v3243_v2 = vmul.f32 %v3239_v62, %v3239_v62 }
 0x87a   :  { %v3244_v57 = vadd.f32 %v3241_v1, %v3240_v63  ;;  %v6560_v63 = vld [vmem:[#allocation23 + $0x90] sm:$0xff]  }
 0x87b   :  { %v6561_v1 = vld [vmem:[#allocation23 + $0x10] sm:$0xff]  }
 0x87c   :  { %v3245_v7 = vadd.f32 %v3244_v57, %v3242_v6  ;;  %v6562_v6 = vld [vmem:[#allocation23 + $0x58] sm:$0xff]  }
 0x87d   :  { %v6563_v57 = vld [vmem:[#allocation23 + $0x98] sm:$0xff]  }
 0x87e   :  { %v3246_v3 = vadd.f32 %v3245_v7, %v3243_v2  ;;  %v6564_v2 = vld [vmem:[#allocation23 + $0x18] sm:$0xff]   ;;  %v6565_v7 = vld [vmem:[#allocation23 + $0x60] sm:$0xff]  }
 0x880   :  { %v3247_v58 = vrot.slane %v3246_v3, 4 }
 0x882   :  { %v3248_v4 = vadd.f32 %v3247_v58, %v3246_v3  ;;  %v6566_v3 = vld [vmem:[#allocation23 + $0xa0] sm:$0xff]  }
 0x883   :  { %v6567_v58 = vld [vmem:[#allocation23 + $0x20] sm:$0xff]  }
 0x884   :  { %v3249_v5 = vrot.slane %v3248_v4, 2 }
 0x886   :  { %v3250_v32 = vadd.f32 %v3249_v5, %v3248_v4  ;;  %v6568_v4 = vld [vmem:[#allocation23 + $0x68] sm:$0xff]  }
 0x887   :  { %v6569_v5 = vld [vmem:[#allocation23 + $0xa8] sm:$0xff]  }
 0x888   :  { %v3251_v9 = vrot.slane %v3250_v32, 1 }
 0x88a   :  { %v3252_v11 = vadd.f32 %v3251_v9, %v3250_v32  ;;  %v6570_v32 = vld [vmem:[#allocation23 + $0x28] sm:$0xff]   ;;  %v6571_v9 = vld [vmem:[#allocation23 + $0x70] sm:$0xff]  }
 0x88c   :  { %v3253_v12 = vmul.f32 0.03125, %v3252_v11  ;;  %v6572_v11 = vld [vmem:[#allocation23 + $0xb0] sm:$0xff]  }
 0x88e   :  { %v3254_v33 = vadd.f32 1e-05, %v3253_v12  ;;  %v6573_v12 = vld [vmem:[#allocation23 + $0x30] sm:$0xff]  }
 0x890   :  { %6607 = vrsqrt.f32 %v3254_v33  ;;  %v6574_v33 = vld [vmem:[#allocation23 + $0x78] sm:$0xff]  }
 0x89a   :  { %v6608_v13 = vpop.eup %6607 }
 0x89b   :  { %v3256_v20 = vmul.f32 %v6608_v13, %v3236_v59  ;;  %v3257_v43 = vmul.f32 %v6608_v13, %v3237_v60  ;;  %v3258_v45 = vmul.f32 %v6608_v13, %v3238_v61  ;;  %v3259_v14 = vmul.f32 %v6608_v13, %v3239_v62  ;;  %v6556_v59 = vld [vmem:[#allocation23 + $0x48] sm:$0xff]   ;;  %v6559_v62 = vld [vmem:[#allocation23 + $0x50] sm:$0xff]   ;;  %v6575_v13 = vld [vmem:[#allocation23 + $0xb8] sm:$0xff]  }
 0x89c   :  { %v6557_v60 = vld [vmem:[#allocation23 + $0x88] sm:$0xff]  }
 0x89d   :  { %v3267_v15 = vmul.f32 %v5262_v41, %v3256_v20  ;;  %v3268_v56 = vmul.f32 %v5262_v41, %v3257_v43  ;;  %v3269_v16 = vmul.f32 %v5262_v41, %v3258_v45  ;;  %v3270_v18 = vmul.f32 %v5262_v41, %v3259_v14  ;;  %v6558_v61 = vld [vmem:[#allocation23 + $0x8] sm:$0xff]   ;;  %v6576_v41 = vld [vmem:[#allocation23 + $0x38] sm:$0xff]  }
 0x89f   :  { %v3278_v8 = vadd.f32 %v5263_v10, %v3267_v15  ;;  %v3279_v42 = vadd.f32 %v5263_v10, %v3268_v56  ;;  %v3280_v39 = vadd.f32 %v5263_v10, %v3269_v16  ;;  %v3281_v46 = vadd.f32 %v5263_v10, %v3270_v18 }
 0x8a1   :  { %v3282_v23 = vmax.f32 %v3278_v8, 0.0  ;;  %v3283_v26 = vmax.f32 %v3279_v42, 0.0  ;;  %v3284_v27 = vmax.f32 %v3280_v39, 0.0  ;;  %v3285_v28 = vmax.f32 %v3281_v46, 0.0 }
 0x8a3   :  { %3288 = vst [vmem:[#allocation2 + $0x8] sm:$0xff] %v3282_v23  ;;  %3289 = vst [vmem:[#allocation2 + $0x10] sm:$0xff] %v3283_v26  ;;  %v3307_v29 = vpack.c.bf16 %v3283_v26, %v3282_v23  ;;  %v3310_v19 = vpack.c.bf16 %v3285_v28, %v3284_v27 }
 0x8a4   :  { %3292 = vst [vmem:[#allocation2 + $0x58] sm:$0xff] %v3284_v27  ;;  %3293 = vst [vmem:[#allocation2 + $0x60] sm:$0xff] %v3285_v28 }
 0x8a5   :  { %3536 = vmatprep.mubr.bf16.mxu0 %v3307_v29 }
 0x8aa   :  { %v3302_v22 = vld [vmem:[#allocation2 + $0x9] sm:$0xff]  ;;  %v3303_v21 = vld [vmem:[#allocation2 + $0x11] sm:$0xff] }
 0x8ab   :  { %v3294_v30 = vld [vmem:[#allocation2 + $0x7] sm:$0xff]  ;;  %v3308_v35 = vpack.c.bf16 %v3303_v21, %v3302_v22  ;;  %3667 = vst [vmem:[#allocation2 + $0x18] sm:$0x1] %v7006_v0  ;;  %v3295_v47 = vld [vmem:[#allocation2 + $0xf] sm:$0xff]  ;;  %v3304_v25 = vld [vmem:[#allocation2 + $0x59] sm:$0xff] }
 0x8ac   :  { %3666 = vst [vmem:[#allocation2 + $0x7] sm:$0x1] %v7006_v0  ;;  %v3305_v49 = vld [vmem:[#allocation2 + $0x61] sm:$0xff]  ;;  %v3306_v50 = vpack.c.bf16 %v3295_v47, %v3294_v30  ;;  %v3296_v51 = vld [vmem:[#allocation2 + $0x57] sm:$0xff] }
 0x8ad   :  { %v3311_v48 = vpack.c.bf16 %v3305_v49, %v3304_v25  ;;  %3671 = vst [vmem:[#allocation2 + $0x68] sm:$0x1] %v7006_v0  ;;  %6114 = vmatprep.mubr.bf16.mxu1 %v3308_v35  ;;  %3670 = vst [vmem:[#allocation2 + $0x57] sm:$0x1] %v7006_v0  ;;  %v3297_v52 = vld [vmem:[#allocation2 + $0x5f] sm:$0xff] }
 0x8ae   :  { %3537 = vmatmul.mubr.bf16.vlgmr.msra.gmra.mrb[100].mxu0 %v3306_v50  ;;  %v3309_v53 = vpack.c.bf16 %v3297_v52, %v3296_v51 }
 0x8af   :  { %6115 = vmatmul.mubr.bf16.vlgmr.msra.gmra.mrb[88].mxu1 %v3311_v48  ;;  %3544 = vmatprep.mubr.bf16.mxu0 %v3310_v19 }
 0x8b0   :  { %5794 = vmatpush3.bf16.msra.mxu0 %v6555_v40  ;;  %6119 = vmatpush3.bf16.msra.mxu1 %v6554_v55 }
 0x8b1   :  { %5795 = vmatprep.subr.bf16.mxu0 %v6556_v59  ;;  %6120 = vmatprep.subr.bf16.mxu1 %v6557_v60 }
 0x8b4   :  { %5796 = vmatpush3.bf16.msra.mxu0 %v6558_v61  ;;  %6121 = vmatpush3.bf16.msra.mxu1 %v6557_v60 }
 0x8b5   :  { %5797 = vmatprep.subr.bf16.mxu0 %v6559_v62  ;;  %6122 = vmatprep.subr.bf16.mxu1 %v6560_v63 }
 0x8b6   :  { %3545 = vmatmul.mubr.bf16.gmra.mrb[104].mxu0 %v3309_v53 }
 0x8b8   :  { %5798 = vmatpush3.bf16.msra.mxu0 %v6561_v1  ;;  %6123 = vmatpush3.bf16.msra.mxu1 %v6560_v63 }
 0x8b9   :  { %5799 = vmatprep.subr.bf16.mxu0 %v6562_v6  ;;  %6124 = vmatprep.subr.bf16.mxu1 %v6563_v57 }
 0x8bc   :  { %5800 = vmatpush3.bf16.msra.mxu0 %v6564_v2  ;;  %6125 = vmatpush3.bf16.msra.mxu1 %v6563_v57 }
 0x8bd   :  { %5801 = vmatprep.subr.bf16.mxu0 %v6565_v7  ;;  %6126 = vmatprep.subr.bf16.mxu1 %v6566_v3 }
 0x8c0   :  { %5802 = vmatpush3.bf16.msra.mxu0 %v6567_v58  ;;  %6127 = vmatpush3.bf16.msra.mxu1 %v6566_v3 }
 0x8c1   :  { %5803 = vmatprep.subr.bf16.mxu0 %v6568_v4  ;;  %6128 = vmatprep.subr.bf16.mxu1 %v6569_v5 }
 0x8c4   :  { %5804 = vmatpush3.bf16.msra.mxu0 %v6570_v32  ;;  %6129 = vmatpush3.bf16.msra.mxu1 %v6569_v5 }
 0x8c5   :  { %5805 = vmatprep.subr.bf16.mxu0 %v6571_v9  ;;  %6130 = vmatprep.subr.bf16.mxu1 %v6572_v11 }
 0x8c8   :  { %5806 = vmatpush3.bf16.msra.mxu0 %v6573_v12  ;;  %6131 = vmatpush3.bf16.msra.mxu1 %v6572_v11  ;;  %v5288_v11 = vld [vmem:[#allocation21] ss:$0 sm:$0xff] }
 0x8c9   :  { %5807 = vmatprep.subr.bf16.mxu0 %v6574_v33  ;;  %6132 = vmatprep.subr.bf16.mxu1 %v6575_v13 }
 0x8cc   :  { %5808 = vmatpush3.bf16.msra.mxu0 %v6576_v41  ;;  %6133 = vmatpush3.bf16.msra.mxu1 %v6575_v13 }
 0x981   :  { %v5771_v20 = vpop.f32.mrb[100].mxu0 }
 0x982   :  { %v6116_v43 = vpop.f32.mrb[88].mxu1  ;;  %v5772_v45 = vpop.f32.mrb[101].mxu0 }
 0x983   :  { %v3587_v14 = vpop.f32.mrb[89].mxu1  ;;  %v5773_v10 = vadd.f32 %v5772_v45, %v5771_v20  ;;  %v5774_v15 = vpop.f32.mrb[102].mxu0  ;;  %v5289_v20 = vld [vmem:[%s7903_s15] ss:$0 sm:$0xff] }
 0x984   :  { %v6117_v56 = vpop.f32.mrb[90].mxu1  ;;  %v5775_v16 = vpop.f32.mrb[103].mxu0 }
 0x985   :  { %v3590_v18 = vpop.f32.mrb[91].mxu1  ;;  %v3588_v8 = vadd.f32 %v5773_v10, %v3587_v14  ;;  %v5776_v42 = vadd.f32 %v5775_v16, %v5774_v15 }
 0x987   :  { %v3591_v39 = vadd.f32 %v5776_v42, %v3590_v18 }
 0x989   :  { %v3602_v46 = vadd.f32 %v3591_v39, %v3588_v8  ;;  %v5777_v23 = vpop.f32.mrb[104].mxu0 }
 0x98a   :  { %v5778_v26 = vpop.f32.mrb[105].mxu0 }
 0x98b   :  { %v5779_v27 = vadd.f32 %v5778_v26, %v5777_v23  ;;  %v5780_v28 = vpop.f32.mrb[106].mxu0 }
 0x98c   :  { %v5781_v29 = vpop.f32.mrb[107].mxu0 }
 0x98d   :  { %v3596_v19 = vadd.f32 %v6116_v43, %v5779_v27  ;;  %v5782_v22 = vadd.f32 %v5781_v29, %v5780_v28 }
 0x98f   :  { %v3603_v21 = vadd.f32 %v3602_v46, %v3596_v19  ;;  %v3599_v30 = vadd.f32 %v6117_v56, %v5782_v22 }
 0x991   :  { %v3604_v35 = vadd.f32 %v3603_v21, %v3599_v30 }
 0x993   :  { %v3605_v47 = vrot.slane %v3604_v35, 4 }
 0x995   :  { %v3606_v25 = vadd.f32 %v3605_v47, %v3604_v35 }
 0x997   :  { %v3607_v49 = vrot.slane %v3606_v25, 2 }
 0x999   :  { %v3608_v50 = vadd.f32 %v3607_v49, %v3606_v25 }
 0x99b   :  { %v3609_v48 = vrot.slane %v3608_v50, 1 }
 0x99d   :  { %v3610_v51 = vadd.f32 %v3609_v48, %v3608_v50  ;;  %v7008_v48 = vmov 0.0|0.0  }
 0x99e   :  { %6283 = vmatprep.subr.bf16.mxu1 %v7008_v48 }
 0x99f   :  { %v3611_v52 = vmul.f32 0.03125, %v3610_v51 }
 0x9a1   :  { %v3612_v53 = vsub.f32 %v3588_v8, %v3611_v52  ;;  %v3613_v54 = vsub.f32 %v3591_v39, %v3611_v52  ;;  %v3614_v55 = vsub.f32 %v3596_v19, %v3611_v52  ;;  %v3615_v40 = vsub.f32 %v3599_v30, %v3611_v52 }
 0x9a3   :  { %v3616_v59 = vmul.f32 %v3612_v53, %v3612_v53  ;;  %v3617_v60 = vmul.f32 %v3613_v54, %v3613_v54  ;;  %v3618_v61 = vmul.f32 %v3614_v55, %v3614_v55  ;;  %v3619_v63 = vmul.f32 %v3615_v40, %v3615_v40 }
 0x9a5   :  { %v3620_v62 = vadd.f32 %v3617_v60, %v3616_v59 }
 0x9a7   :  { %v3621_v1 = vadd.f32 %v3620_v62, %v3618_v61 }
 0x9a9   :  { %v3622_v6 = vadd.f32 %v3621_v1, %v3619_v63 }
 0x9ab   :  { %v3623_v57 = vrot.slane %v3622_v6, 4 }
 0x9ad   :  { %v3624_v2 = vadd.f32 %v3623_v57, %v3622_v6 }
 0x9af   :  { %v3625_v7 = vrot.slane %v3624_v2, 2 }
 0x9b1   :  { %v3626_v3 = vadd.f32 %v3625_v7, %v3624_v2 }
 0x9b3   :  { %v3627_v58 = vrot.slane %v3626_v3, 1 }
 0x9b5   :  { %v3628_v4 = vadd.f32 %v3627_v58, %v3626_v3 }
 0x9b7   :  { %v3629_v5 = vmul.f32 0.03125, %v3628_v4 }
 0x9b9   :  { %v3630_v32 = vadd.f32 1e-05, %v3629_v5 }
 0x9bb   :  { %6609 = vrsqrt.f32 %v3630_v32 }
 0x9c5   :  { %v6610_v9 = vpop.eup %6609 }
 0x9c6   :  { %v3632_v12 = vmul.f32 %v6610_v9, %v3612_v53  ;;  %v3633_v33 = vmul.f32 %v6610_v9, %v3613_v54  ;;  %v3634_v13 = vmul.f32 %v6610_v9, %v3614_v55  ;;  %v3635_v41 = vmul.f32 %v6610_v9, %v3615_v40 }
 0x9c8   :  { %v3643_v43 = vmul.f32 %v5288_v11, %v3632_v12  ;;  %v3644_v45 = vmul.f32 %v5288_v11, %v3633_v33  ;;  %v3645_v14 = vmul.f32 %v5288_v11, %v3634_v13  ;;  %v3646_v10 = vmul.f32 %v5288_v11, %v3635_v41  ;;  %v6577_v11 = vld [vmem:[#allocation24 + $0x40] sm:$0xff]   ;;  %v6580_v13 = vld [vmem:[#allocation24 + $0x48] sm:$0xff]  }
 0x9c9   :  { %v6578_v12 = vld [vmem:[#allocation24] sm:$0xff]   ;;  %5837 = vmatprep.subr.bf16.mxu0 %v6577_v11  ;;  %v6581_v41 = vld [vmem:[#allocation24 + $0x8] sm:$0xff]  }
 0x9ca   :  { %v3654_v15 = vadd.f32 %v5289_v20, %v3643_v43  ;;  %v3655_v56 = vadd.f32 %v5289_v20, %v3644_v45  ;;  %v3656_v16 = vadd.f32 %v5289_v20, %v3645_v14  ;;  %v3657_v18 = vadd.f32 %v5289_v20, %v3646_v10  ;;  %v6579_v33 = vld [vmem:[#allocation24 + $0x80] sm:$0xff]   ;;  %v6582_v20 = vld [vmem:[#allocation24 + $0x88] sm:$0xff]   ;;  %v6583_v43 = vld [vmem:[#allocation24 + $0x50] sm:$0xff]  }
 0x9cb   :  { %v6584_v45 = vld [vmem:[#allocation24 + $0x10] sm:$0xff]   ;;  %v6586_v10 = vld [vmem:[#allocation24 + $0x58] sm:$0xff]  }
 0x9cc   :  { %v3658_v8 = vadd.f32 %v3654_v15, %v7710_v31  ;;  %v3659_v42 = vadd.f32 %v7707_v24, %v3655_v56  ;;  %v3660_v39 = vadd.f32 %v3656_v16, %v7716_v17  ;;  %v3661_v46 = vadd.f32 %v7712_v34, %v3657_v18  ;;  %v6585_v14 = vld [vmem:[#allocation24 + $0x90] sm:$0xff]   ;;  %v6587_v15 = vld [vmem:[#allocation24 + $0x18] sm:$0xff]   ;;  %v6589_v16 = vld [vmem:[#allocation24 + $0x60] sm:$0xff]  }
 0x9cd   :  { %v6588_v56 = vld [vmem:[#allocation24 + $0x98] sm:$0xff]   ;;  %v6590_v18 = vld [vmem:[#allocation24 + $0x20] sm:$0xff]  }
 0x9ce   :  { %v3662_v23 = vmax.f32 %v3658_v8, 0.0  ;;  %v3663_v26 = vmax.f32 %v3659_v42, 0.0  ;;  %v3664_v27 = vmax.f32 %v3660_v39, 0.0  ;;  %v3665_v28 = vmax.f32 %v3661_v46, 0.0  ;;  %v6591_v8 = vld [vmem:[#allocation24 + $0xa0] sm:$0xff]   ;;  %v6592_v42 = vld [vmem:[#allocation24 + $0x68] sm:$0xff]  }
 0x9cf   :  { %v6593_v39 = vld [vmem:[#allocation24 + $0x28] sm:$0xff]  }
 0x9d0   :  { %3668 = vst [vmem:[#allocation2 + $0x8] sm:$0xff] %v3662_v23  ;;  %3669 = vst [vmem:[#allocation2 + $0x10] sm:$0xff] %v3663_v26  ;;  %v7738_v29 = vpack.c.bf16 %v3663_v26, %v3662_v23  ;;  %v7740_v19 = vpack.c.bf16 %v3665_v28, %v3664_v27  ;;  %v6594_v46 = vld [vmem:[#allocation24 + $0xa8] sm:$0xff]   ;;  %v6595_v23 = vld [vmem:[#allocation24 + $0x70] sm:$0xff]  }
 0x9d1   :  { %3672 = vst [vmem:[#allocation2 + $0x58] sm:$0xff] %v3664_v27  ;;  %3673 = vst [vmem:[#allocation2 + $0x60] sm:$0xff] %v3665_v28  ;;  %v6596_v26 = vld [vmem:[#allocation24 + $0x30] sm:$0xff]   ;;  %v6598_v28 = vld [vmem:[#allocation24 + $0x78] sm:$0xff]  }
 0x9d2   :  { %3916 = vmatprep.mubr.bf16.mxu0 %v7738_v29  ;;  %v6597_v27 = vld [vmem:[#allocation24 + $0xb0] sm:$0xff]  }
 0x9d7   :  { %v3682_v31 = vld [vmem:[#allocation2 + $0x9] sm:$0xff]  ;;  %v3683_v24 = vld [vmem:[#allocation2 + $0x11] sm:$0xff] }
 0x9d8   :  { %v3674_v22 = vld [vmem:[#allocation2 + $0x7] sm:$0xff]  ;;  %v3688_v17 = vpack.c.bf16 %v3683_v24, %v3682_v31  ;;  %v3675_v21 = vld [vmem:[#allocation2 + $0xf] sm:$0xff]  ;;  %v3684_v34 = vld [vmem:[#allocation2 + $0x59] sm:$0xff] }
 0x9d9   :  { %4170 = vst [vmem:[#allocation2 + $0x7] sm:$0x1] %v7006_v0  ;;  %v3685_v30 = vld [vmem:[#allocation2 + $0x61] sm:$0xff]  ;;  %v3686_v35 = vpack.c.bf16 %v3675_v21, %v3674_v22  ;;  %4171 = vst [vmem:[#allocation2 + $0x10] sm:$0x1] %v7006_v0  ;;  %v3676_v25 = vld [vmem:[#allocation2 + $0x57] sm:$0xff] }
 0x9da   :  { %v3691_v47 = vpack.c.bf16 %v3685_v30, %v3684_v34  ;;  %v3677_v49 = vld [vmem:[#allocation2 + $0x5f] sm:$0xff]  ;;  %6134 = vmatprep.mubr.bf16.mxu1 %v3688_v17  ;;  %4173 = vst [vmem:[#allocation2 + $0x57] sm:$0x1] %v7006_v0  ;;  %v6599_v31 = vld [vmem:[#allocation24 + $0x38] sm:$0xff]  }
 0x9db   :  { %4174 = vst [vmem:[#allocation2 + $0x60] sm:$0x1] %v7006_v0  ;;  %3917 = vmatmul.mubr.bf16.vlgmr.msra.gmra.mrb[108].mxu0 %v3686_v35  ;;  %v3689_v50 = vpack.c.bf16 %v3677_v49, %v3676_v25  ;;  %v6600_v24 = vld [vmem:[#allocation24 + $0xb8] sm:$0xff]  }
 0x9dc   :  { %6135 = vmatmul.mubr.bf16.vlgmr.msra.gmra.mrb[92].mxu1 %v3691_v47  ;;  %3924 = vmatprep.mubr.bf16.mxu0 %v7740_v19 }
 0x9dd   :  { %6142 = vmatprep.mubr.msk.f32.mxu1 %vm7009_vm6, %v7006_v0  ;;  %5838 = vmatpush3.bf16.msra.mxu0 %v6578_v12 }
 0x9de   :  { %5839 = vmatprep.subr.bf16.mxu0 %v6580_v13 }
 0x9e1   :  { %5840 = vmatpush3.bf16.msra.mxu0 %v6581_v41 }
 0x9e2   :  { %5841 = vmatprep.subr.bf16.mxu0 %v6583_v43 }
 0x9e3   :  { %3925 = vmatmul.mubr.bf16.gmra.mrb[112].mxu0 %v3689_v50 }
 0x9e5   :  { %5842 = vmatpush3.bf16.msra.mxu0 %v6584_v45 }
 0x9e6   :  { %5843 = vmatprep.subr.bf16.mxu0 %v6586_v10 }
 0x9e9   :  { %5844 = vmatpush3.bf16.msra.mxu0 %v6587_v15 }
 0x9ea   :  { %5845 = vmatprep.subr.bf16.mxu0 %v6589_v16  ;;  %v4833_v16 = vld [vmem:[#allocation26 + $0x8] sm:$0xff] }
 0x9ed   :  { %5846 = vmatpush3.bf16.msra.mxu0 %v6590_v18  ;;  %v4850_v18 = vld [vmem:[#allocation26 + $0x90] sm:$0xff] }
 0x9ee   :  { %5847 = vmatprep.subr.bf16.mxu0 %v6592_v42  ;;  %v4851_v42 = vld [vmem:[#allocation26 + $0x98] sm:$0xff] }
 0x9f1   :  { %5848 = vmatpush3.bf16.msra.mxu0 %v6593_v39  ;;  %v4834_v39 = vld [vmem:[#allocation26 + $0x10] sm:$0xff] }
 0x9f2   :  { %5849 = vmatprep.subr.bf16.mxu0 %v6595_v23 }
 0x9f5   :  { %5850 = vmatpush3.bf16.msra.mxu0 %v6596_v26  ;;  %v4852_v26 = vld [vmem:[#allocation26 + $0xa0] sm:$0xff] }
 0x9f6   :  { %5851 = vmatprep.subr.bf16.mxu0 %v6598_v28 }
 0x9f9   :  { %5852 = vmatpush3.bf16.msra.mxu0 %v6599_v31  ;;  %v4837_v31 = vld [vmem:[#allocation26 + $0x28] sm:$0xff] }
 0x9fa   :  { %6289 = vmatprep.subr.bf16.mxu0 %v7008_v48 }
 0xaae   :  { %v5809_v51 = vpop.f32.mrb[108].mxu0 }
 0xaaf   :  { %v6136_v52 = vpop.f32.mrb[92].mxu1  ;;  %v5810_v53 = vpop.f32.mrb[109].mxu0 }
 0xab0   :  { %v3967_v54 = vpop.f32.mrb[93].mxu1  ;;  %v5811_v55 = vadd.f32 %v5810_v53, %v5809_v51  ;;  %v5812_v40 = vpop.f32.mrb[110].mxu0 }
 0xab1   :  { %v6137_v59 = vpop.f32.mrb[94].mxu1  ;;  %v5813_v60 = vpop.f32.mrb[111].mxu0 }
 0xab2   :  { %v3970_v61 = vpop.f32.mrb[95].mxu1  ;;  %v3968_v62 = vadd.f32 %v5811_v55, %v3967_v54  ;;  %v5814_v63 = vadd.f32 %v5813_v60, %v5812_v40 }
 0xab4   :  { %v3971_v1 = vadd.f32 %v5814_v63, %v3970_v61 }
 0xab6   :  { %v6284_v6 = vpack.c.bf16 %v3971_v1, %v3968_v62  ;;  %v5815_v57 = vpop.f32.mrb[112].mxu0 }
 0xab7   :  { %v5816_v2 = vpop.f32.mrb[113].mxu0 }
 0xab8   :  { %v5817_v7 = vadd.f32 %v5816_v2, %v5815_v57  ;;  %v5818_v3 = vpop.f32.mrb[114].mxu0  ;;  %6285 = vmatpush3.bf16.msra.mxu1 %v6284_v6 }
 0xab9   :  { %v5819_v58 = vpop.f32.mrb[115].mxu0  ;;  %6286 = vmatprep.subr.bf16.mxu1 %v7008_v48 }
 0xaba   :  { %v3976_v4 = vadd.f32 %v6136_v52, %v5817_v7  ;;  %v5820_v5 = vadd.f32 %v5819_v58, %v5818_v3  ;;  %v5316_v3 = vld [vmem:[%s7905_s17] ss:$0 sm:$0xff] }
 0xabb   :  { %6143 = vmatmul.mubr.msk.f32.vlgmr.msra.gmra.mrb[82].mxu1 %vm3982_vm7, %v7607_v44 }
 0xabc   :  { %v3979_v32 = vadd.f32 %v6137_v59, %v5820_v5  ;;  %6149 = vmatprep.mubr.msk.f32.mxu1 %vm7009_vm6, %v7006_v0  ;;  %v5317_v5 = vld [vmem:[%s7906_s18] ss:$0 sm:$0xff] }
 0xabe   :  { %v6287_v9 = vpack.c.bf16 %v3979_v32, %v3976_v4 }
 0xac0   :  { %6288 = vmatpush3.bf16.msra.mxu1 %v6287_v9 }
 0xac1   :  { %6152 = vmatprep.subr.bf16.mxu1 %v7006_v0 }
 0xac3   :  { %6150 = vmatmul.mubr.msk.f32.vlgmr.msra.gmra.mrb[96].mxu1 %vm3982_vm7, %v7607_v44 }
 0xac4   :  { %6168 = vmatprep.mubr.msk.bf16.mxu1 %vm7009_vm6, %v7006_v0  ;;  %6153 = vmatpush3.bf16.msra.mxu1 %v6579_v33 }
 0xac5   :  { %6154 = vmatprep.subr.bf16.mxu1 %v7006_v0 }
 0xac8   :  { %6155 = vmatpush3.bf16.msra.mxu1 %v6582_v20 }
 0xac9   :  { %6156 = vmatprep.subr.bf16.mxu1 %v7006_v0 }
 0xacc   :  { %6157 = vmatpush3.bf16.msra.mxu1 %v6585_v14 }
 0xacd   :  { %6158 = vmatprep.subr.bf16.mxu1 %v7006_v0 }
 0xad0   :  { %6159 = vmatpush3.bf16.msra.mxu1 %v6588_v56  ;;  %v4641_v56 = vadd.s32 1, %v1052_v38  ;;  %v4849_v38 = vld [vmem:[#allocation26 + $0x88] sm:$0xff] }
 0xad1   :  { %6160 = vmatprep.subr.bf16.mxu1 %v7006_v0 }
 0xad2   :  { %vm4642_vm8 = vcmp.eq.s32.totalorder %v7600_v37, %v4641_v56  ;;  %v4848_v37 = vld [vmem:[#allocation26 + $0x80] sm:$0xff] }
 0xad3   :  { %v5346_v36 = vsel %vm4642_vm8, 1.0, %v7006_v0 }
 0xad4   :  { %6161 = vmatpush3.bf16.msra.mxu1 %v6591_v8 }
 0xad5   :  { %6162 = vmatprep.subr.bf16.mxu1 %v7006_v0 }
 0xad8   :  { %6163 = vmatpush3.bf16.msra.mxu1 %v6594_v46  ;;  %v4835_v46 = vld [vmem:[#allocation26 + $0x18] sm:$0xff] }
 0xad9   :  { %6164 = vmatprep.subr.bf16.mxu1 %v7006_v0  ;;  %v6307_v23 = vpack.c.bf16 %v4835_v46, %v4834_v39 }
 0xadc   :  { %6165 = vmatpush3.bf16.msra.mxu1 %v6597_v27  ;;  %v4853_v27 = vld [vmem:[#allocation26 + $0xa8] sm:$0xff] }
 0xadd   :  { %6166 = vmatprep.subr.bf16.mxu1 %v7006_v0  ;;  %v6309_v28 = vpack.c.bf16 %v4853_v27, %v4852_v26 }
 0xae0   :  { %6167 = vmatpush3.bf16.msra.mxu1 %v6600_v24 }
 0xb8e   :  { %v4051_v22 = vpop.f32.mrb[82].mxu1 }
 0xb8f   :  { %v6144_v17 = vpop.f32.mrb[83].mxu1 }
 0xb90   :  { %v4855_v17 = vld [vmem:[#allocation26 + $0xb8] sm:$0xff] }
 0xb96   :  { %v4121_v21 = vpop.f32.mrb[96].mxu1 }
 0xb97   :  { %v4125_v34 = vadd.f32 %v4121_v21, %v4051_v22  ;;  %v6151_v30 = vpop.f32.mrb[97].mxu1 }
 0xb98   :  { %v4839_v30 = vld [vmem:[#allocation26 + $0x38] sm:$0xff] }
 0xb99   :  { %v4126_v35 = vrot.slane %v4125_v34, 4 }
 0xb9b   :  { %v4127_v47 = vadd.f32 %v4126_v35, %v4125_v34  ;;  %v4838_v34 = vld [vmem:[#allocation26 + $0x30] sm:$0xff] }
 0xb9c   :  { %v6315_v35 = vpack.c.bf16 %v4839_v30, %v4838_v34 }
 0xb9d   :  { %v4128_v25 = vrot.slane %v4127_v47, 2 }
 0xb9f   :  { %v4129_v49 = vadd.f32 %v4128_v25, %v4127_v47  ;;  %v4856_v47 = vld [vmem:[#allocation26 + $0xc0] sm:$0xff]  ;;  %v4857_v25 = vld [vmem:[#allocation26 + $0xc8] sm:$0xff] }
 0xba1   :  { %v4130_v50 = vrot.slane %v4129_v49, 1 }
 0xba3   :  { %v4131_v51 = vadd.f32 %v4130_v50, %v4129_v49  ;;  %v6317_v49 = vpack.c.bf16 %v4857_v25, %v4856_v47  ;;  %v4840_v50 = vld [vmem:[#allocation26 + $0x40] sm:$0xff] }
 0xba5   :  { %v4133_v52 = vmul.f32 0.0625, %v4131_v51  ;;  %v4841_v51 = vld [vmem:[#allocation26 + $0x48] sm:$0xff] }
 0xba7   :  { %v4134_v53 = vsub.f32 %v4051_v22, %v4133_v52  ;;  %v4135_v54 = vsub.f32 %v4121_v21, %v4133_v52  ;;  %v4854_v22 = vld [vmem:[#allocation26 + $0xb0] sm:$0xff] }
 0xba8   :  { %v6313_v21 = vpack.c.bf16 %v4855_v17, %v4854_v22  ;;  %v4858_v52 = vld [vmem:[#allocation26 + $0xd0] sm:$0xff] }
 0xba9   :  { %v4136_v55 = vmul.f32 %v4134_v53, %v4134_v53  ;;  %v4137_v40 = vmul.f32 %v4135_v54, %v4135_v54 }
 0xbab   :  { %v4138_v59 = vadd.f32 %v4137_v40, %v4136_v55  ;;  %v4842_v55 = vld [vmem:[#allocation26 + $0x50] sm:$0xff]  ;;  %v4843_v40 = vld [vmem:[#allocation26 + $0x58] sm:$0xff] }
 0xbad   :  { %v4139_v60 = vrot.slane %v4138_v59, 4 }
 0xbaf   :  { %v4140_v61 = vadd.f32 %v4139_v60, %v4138_v59  ;;  %v4860_v60 = vld [vmem:[#allocation26 + $0xe0] sm:$0xff] }
 0xbb1   :  { %v4141_v62 = vrot.slane %v4140_v61, 2 }
 0xbb3   :  { %v4142_v63 = vadd.f32 %v4141_v62, %v4140_v61  ;;  %v4861_v61 = vld [vmem:[#allocation26 + $0xe8] sm:$0xff]  ;;  %v6323_v62 = vpack.c.bf16 %v4843_v40, %v4842_v55 }
 0xbb5   :  { %v4143_v1 = vrot.slane %v4142_v63, 1 }
 0xbb7   :  { %v4144_v6 = vadd.f32 %v4143_v1, %v4142_v63  ;;  %v6325_v63 = vpack.c.bf16 %v4861_v61, %v4860_v60  ;;  %v4844_v1 = vld [vmem:[#allocation26 + $0x60] sm:$0xff] }
 0xbb9   :  { %v4145_v57 = vmul.f32 0.0625, %v4144_v6  ;;  %v4845_v6 = vld [vmem:[#allocation26 + $0x68] sm:$0xff] }
 0xbbb   :  { %v4146_v2 = vadd.f32 1e-05, %v4145_v57  ;;  %v4862_v57 = vld [vmem:[#allocation26 + $0xf0] sm:$0xff] }
 0xbbd   :  { %6611 = vrsqrt.f32 %v4146_v2  ;;  %v4863_v2 = vld [vmem:[#allocation26 + $0xf8] sm:$0xff] }
 0xbc7   :  { %v6612_v7 = vpop.eup %6611 }
 0xbc8   :  { %v4148_v58 = vmul.f32 %v6612_v7, %v4134_v53  ;;  %v4149_v4 = vmul.f32 %v6612_v7, %v4135_v54  ;;  %v6319_v53 = vpack.c.bf16 %v4841_v51, %v4840_v50  ;;  %v4859_v54 = vld [vmem:[#allocation26 + $0xd8] sm:$0xff]  ;;  %v6327_v7 = vpack.c.bf16 %v4845_v6, %v4844_v1 }
 0xbc9   :  { %v6321_v59 = vpack.c.bf16 %v4859_v54, %v4858_v52 }
 0xbca   :  { %v4157_v32 = vmul.f32 %v5316_v3, %v4148_v58  ;;  %v4158_v9 = vmul.f32 %v5316_v3, %v4149_v4  ;;  %v6329_v3 = vpack.c.bf16 %v4863_v2, %v4862_v57  ;;  %v4846_v58 = vld [vmem:[#allocation26 + $0x70] sm:$0xff]  ;;  %v4847_v4 = vld [vmem:[#allocation26 + $0x78] sm:$0xff] }
 0xbcc   :  { %v4166_v11 = vadd.f32 %v5317_v5, %v4157_v32  ;;  %v4167_v12 = vadd.f32 %v5317_v5, %v4158_v9  ;;  %v6331_v5 = vpack.c.bf16 %v4847_v4, %v4846_v58 }
 0xbce   :  { %v4168_v33 = vmax.f32 %v4166_v11, 0.0  ;;  %v4169_v13 = vmax.f32 %v4167_v12, 0.0 }
 0xbd0   :  { %4172 = vst [vmem:[#allocation2 + $0x8] sm:$0xff] %v4168_v33  ;;  %4175 = vst [vmem:[#allocation2 + $0x58] sm:$0xff] %v4169_v13  ;;  %v4183_v41 = vpack.c.bf16 %v4169_v13, %v4168_v33 }
 0xbd2   :  { %4409 = vmatprep.mubr.bf16.mxu0 %v4183_v41 }
 0xbd7   :  { %v4180_v20 = vld [vmem:[#allocation2 + $0x9] sm:$0xff]  ;;  %v4181_v43 = vld [vmem:[#allocation2 + $0x59] sm:$0xff] }
 0xbd8   :  { %v4176_v45 = vld [vmem:[#allocation2 + $0x7] sm:$0xff]  ;;  %v4184_v14 = vpack.c.bf16 %v4181_v43, %v4180_v20  ;;  %v4177_v10 = vld [vmem:[#allocation2 + $0x57] sm:$0xff] }
 0xbd9   :  { %v4182_v15 = vpack.c.bf16 %v4177_v10, %v4176_v45 }
 0xbda   :  { %6169 = vmatmul.mubr.bf16.vlgmr.msra.gmra.mrb[100].mxu1 %v4184_v14 }
 0xbdb   :  { %4410 = vmatmul.mubr.bf16.vlgmr.msra.gmra.mrb[116].mxu0 %v4182_v15 }
 0xbdc   :  { %6291 = vmatpush3.bf16.msra.mxu0 %v7738_v29  ;;  %6176 = vmatprep.mubr.msk.f32.mxu0 %vm7009_vm6, %v7006_v0 }
 0xbdd   :  { %6292 = vmatprep.subr.bf16.mxu0 %v7008_v48 }
 0xbe3   :  { %6177 = vmatmul.mubr.msk.f32.vlgmr.msra.gmra.mrb[90].mxu0 %vm3982_vm7, %v7607_v44 }
 0xbe4   :  { %6294 = vmatpush3.bf16.msra.mxu0 %v7740_v19  ;;  %6183 = vmatprep.mubr.msk.f32.mxu0 %vm7009_vm6, %v7006_v0 }
 0xbe5   :  { %6295 = vmatprep.subr.bf16.mxu0 %v7008_v48 }
 0xbe7   :  { %6184 = vmatmul.mubr.msk.f32.vlgmr.msra.gmra.mrb[120].mxu0 %vm3982_vm7, %v7607_v44  ;;  %v6301_v44 = vpack.c.bf16 %v4849_v38, %v4848_v37 }
 0xbe8   :  { %6297 = vmatpush3.bf16.msra.mxu0 %v7738_v29  ;;  %6190 = vmatprep.mubr.msk.f32.mxu0 %vm7009_vm6, %v7006_v0  ;;  %v4832_v29 = vld [vmem:[#allocation26] sm:$0xff] }
 0xbe9   :  { %6298 = vmatprep.subr.bf16.mxu0 %v7008_v48  ;;  %v6303_v8 = vpack.c.bf16 %v4833_v16, %v4832_v29  ;;  %6302 = vmatprep.subr.bf16.mxu1 %v6301_v44 }
 0xbeb   :  { %6191 = vmatmul.mubr.msk.f32.vlgmr.msra.gmra.mrb[90].mxu0 %vm3982_vm7, %v5346_v36  ;;  %6304 = vmatpush3.bf16.msra.mxu1 %v6303_v8 }
 0xbec   :  { %6300 = vmatpush3.bf16.msra.mxu0 %v7740_v19  ;;  %6197 = vmatprep.mubr.msk.f32.mxu0 %vm7009_vm6, %v7006_v0  ;;  %v6305_v19 = vpack.c.bf16 %v4851_v42, %v4850_v18 }
 0xbed   :  { %6333 = vmatprep.subr.bf16.mxu0 %v7008_v48 }
 0xbee   :  { %6306 = vmatprep.subr.bf16.mxu1 %v6305_v19 }
 0xbef   :  { %6198 = vmatmul.mubr.msk.f32.vlgmr.msra.gmra.mrb[120].mxu0 %vm3982_vm7, %v5346_v36  ;;  %6308 = vmatpush3.bf16.msra.mxu1 %v6307_v23 }
 0xbf0   :  { %6232 = vmatprep.mubr.msk.f32.mxu0 %vm7009_vm6, %v7006_v0  ;;  %v4836_v0 = vld [vmem:[#allocation26 + $0x20] sm:$0xff]  ;;  %6310 = vmatprep.subr.bf16.mxu1 %v6309_v28 }
 0xbf1   :  { %v6311_v24 = vpack.c.bf16 %v4837_v31, %v4836_v0 }
 0xbf3   :  { %6312 = vmatpush3.bf16.msra.mxu1 %v6311_v24 }
 0xbf4   :  { %6314 = vmatprep.subr.bf16.mxu1 %v6313_v21 }
 0xbf7   :  { %6316 = vmatpush3.bf16.msra.mxu1 %v6315_v35  ;;  %v5342_v35 = vld [vmem:[%s7908_s20] ss:$0 sm:$0xff] }
 0xbf8   :  { %6318 = vmatprep.subr.bf16.mxu1 %v6317_v49  ;;  %v5343_v49 = vld [vmem:[%s7909_s21] ss:$0 sm:$0xff] }
 0xbfb   :  { %6320 = vmatpush3.bf16.msra.mxu1 %v6319_v53 }
 0xbfc   :  { %6322 = vmatprep.subr.bf16.mxu1 %v6321_v59 }
 0xbff   :  { %6324 = vmatpush3.bf16.msra.mxu1 %v6323_v62 }
 0xc00   :  { %6326 = vmatprep.subr.bf16.mxu1 %v6325_v63 }
 0xc03   :  { %6328 = vmatpush3.bf16.msra.mxu1 %v6327_v7 }
 0xc04   :  { %6330 = vmatprep.subr.bf16.mxu1 %v6329_v3 }
 0xc07   :  { %6332 = vmatpush3.bf16.msra.mxu1 %v6331_v5 }
 0xcad   :  { %v4452_v32 = vpop.f32.mrb[100].mxu1 }
 0xcae   :  { %v5853_v9 = vpop.f32.mrb[116].mxu0  ;;  %v6170_v11 = vpop.f32.mrb[101].mxu1 }
 0xcaf   :  { %v5854_v12 = vpop.f32.mrb[117].mxu0  ;;  %v4455_v33 = vpop.f32.mrb[102].mxu1 }
 0xcb0   :  { %v5855_v13 = vadd.f32 %v5854_v12, %v5853_v9  ;;  %v5856_v41 = vpop.f32.mrb[118].mxu0  ;;  %v6171_v20 = vpop.f32.mrb[103].mxu1 }
 0xcb1   :  { %v5857_v43 = vpop.f32.mrb[119].mxu0 }
 0xcb2   :  { %v4453_v45 = vadd.f32 %v5855_v13, %v4452_v32  ;;  %v5858_v14 = vadd.f32 %v5857_v43, %v5856_v41 }
 0xcb4   :  { %v4456_v10 = vadd.f32 %v5858_v14, %v4455_v33 }
 0xcb6   :  { %v4459_v15 = vadd.f32 %v4456_v10, %v4453_v45 }
 0xcb8   :  { %v4460_v56 = vrot.slane %v4459_v15, 4 }
 0xcba   :  { %v4461_v36 = vadd.f32 %v4460_v56, %v4459_v15 }
 0xcbc   :  { %v4462_v37 = vrot.slane %v4461_v36, 2 }
 0xcbe   :  { %v4463_v38 = vadd.f32 %v4462_v37, %v4461_v36  ;;  %v4714_v44 = vpop.f32.mrb[90].mxu0 }
 0xcbf   :  { %v6192_v29 = vpop.f32.mrb[91].mxu0  ;;  %v4790_v53 = vmul.f32 0.5, %v4714_v44  ;;  %v4980_v44 = vld [vmem:[%s7914_s26] sm:$0xff] }
 0xcc0   :  { %v4464_v16 = vrot.slane %v4463_v38, 1  ;;  %v4981_v29 = vld [vmem:[%s7914_s26 + $0x8] sm:$0xff] }
 0xcc2   :  { %v4465_v18 = vadd.f32 %v4464_v16, %v4463_v38  ;;  %v4784_v8 = vpop.f32.mrb[120].mxu0  ;;  %v6334_v16 = vpack.c.bf16 %v4981_v29, %v4980_v44 }
 0xcc3   :  { %v6199_v42 = vpop.f32.mrb[121].mxu0  ;;  %v4791_v55 = vmul.f32 0.5, %v4784_v8  ;;  %v4983_v8 = vld [vmem:[%s7914_s26 + $0x18] sm:$0xff] }
 0xcc4   :  { %v4466_v19 = vmul.f32 0.0625, %v4465_v18  ;;  %6335 = vmatpush3.bf16.msra.mxu0 %v6334_v16  ;;  %v4982_v18 = vld [vmem:[%s7914_s26 + $0x10] sm:$0xff] }
 0xcc5   :  { %6336 = vmatprep.subr.bf16.mxu0 %v7008_v48  ;;  %v6337_v42 = vpack.c.bf16 %v4983_v8, %v4982_v18 }
 0xcc6   :  { %v4467_v39 = vsub.f32 %v4453_v45, %v4466_v19  ;;  %v4468_v46 = vsub.f32 %v4456_v10, %v4466_v19  ;;  %v4984_v19 = vld [vmem:[%s7914_s26 + $0x20] sm:$0xff] }
 0xcc8   :  { %v4469_v23 = vmul.f32 %v4467_v39, %v4467_v39  ;;  %v4470_v26 = vmul.f32 %v4468_v46, %v4468_v46  ;;  %6338 = vmatpush3.bf16.msra.mxu0 %v6337_v42 }
 0xcc9   :  { %6339 = vmatprep.subr.bf16.mxu0 %v7008_v48 }
 0xcca   :  { %v4471_v27 = vadd.f32 %v4470_v26, %v4469_v23  ;;  %v4986_v23 = vld [vmem:[%s7914_s26 + $0x30] sm:$0xff]  ;;  %v4987_v26 = vld [vmem:[%s7914_s26 + $0x38] sm:$0xff] }
 0xccc   :  { %v4472_v28 = vrot.slane %v4471_v27, 4 }
 0xcce   :  { %v4473_v0 = vadd.f32 %v4472_v28, %v4471_v27  ;;  %v6343_v27 = vpack.c.bf16 %v4987_v26, %v4986_v23  ;;  %v4988_v28 = vld [vmem:[%s7914_s26 + $0x40] sm:$0xff] }
 0xcd0   :  { %v4474_v31 = vrot.slane %v4473_v0, 2 }
 0xcd2   :  { %v4475_v24 = vadd.f32 %v4474_v31, %v4473_v0  ;;  %v4989_v0 = vld [vmem:[%s7914_s26 + $0x48] sm:$0xff] }
 0xcd3   :  { %v6346_v31 = vpack.c.bf16 %v4989_v0, %v4988_v28 }
 0xcd4   :  { %v4476_v22 = vrot.slane %v4475_v24, 1 }
 0xcd6   :  { %v4477_v17 = vadd.f32 %v4476_v22, %v4475_v24  ;;  %v4990_v24 = vld [vmem:[%s7914_s26 + $0x50] sm:$0xff]  ;;  %v4991_v22 = vld [vmem:[%s7914_s26 + $0x58] sm:$0xff] }
 0xcd8   :  { %v4478_v21 = vmul.f32 0.0625, %v4477_v17  ;;  %v6349_v17 = vpack.c.bf16 %v4991_v22, %v4990_v24 }
 0xcda   :  { %v4479_v34 = vadd.f32 1e-05, %v4478_v21  ;;  %v4992_v21 = vld [vmem:[%s7914_s26 + $0x60] sm:$0xff] }
 0xcdc   :  { %6613 = vrsqrt.f32 %v4479_v34  ;;  %v4993_v34 = vld [vmem:[%s7914_s26 + $0x68] sm:$0xff] }
 0xce6   :  { %v6614_v30 = vpop.eup %6613 }
 0xce7   :  { %v4482_v47 = vmul.f32 %v6614_v30, %v4468_v46  ;;  %v4481_v25 = vmul.f32 %v6614_v30, %v4467_v39  ;;  %v4985_v39 = vld [vmem:[%s7914_s26 + $0x28] sm:$0xff]  ;;  %v4994_v30 = vld [vmem:[%s7914_s26 + $0x70] sm:$0xff] }
 0xce8   :  { %v6340_v46 = vpack.c.bf16 %v4985_v39, %v4984_v19 }
 0xce9   :  { %v4490_v50 = vmul.f32 %v5342_v35, %v4481_v25  ;;  %v4491_v51 = vmul.f32 %v5342_v35, %v4482_v47  ;;  %v6352_v35 = vpack.c.bf16 %v4993_v34, %v4992_v21  ;;  %v4995_v47 = vld [vmem:[%s7914_s26 + $0x78] sm:$0xff] }
 0xcea   :  { %6341 = vmatpush3.bf16.msra.mxu0 %v6340_v46  ;;  %v6355_v25 = vpack.c.bf16 %v4995_v47, %v4994_v30 }
 0xceb   :  { %v4499_v52 = vadd.f32 %v5343_v49, %v4490_v50  ;;  %v4500_v54 = vadd.f32 %v5343_v49, %v4491_v51  ;;  %6342 = vmatprep.subr.bf16.mxu0 %v7008_v48  ;;  %v5349_v50 = vld [vmem:[%s7911_s23] ss:$0 sm:$0xff] }
 0xced   :  { %v4792_v40 = vadd.f32 %v4790_v53, %v4499_v52  ;;  %v4793_v59 = vadd.f32 %v4791_v55, %v4500_v54 }
 0xcee   :  { %6344 = vmatpush3.bf16.msra.mxu0 %v6343_v27 }
 0xcef   :  { %v4794_v60 = vmax.f32 %v4792_v40, 0.0  ;;  %v4795_v61 = vmax.f32 %v4793_v59, 0.0  ;;  %6345 = vmatprep.subr.bf16.mxu0 %v7008_v48 }
 0xcf1   :  { %v4796_v62 = vrot.slane %v4794_v60, 4  ;;  %v4810_v63 = vrot.slane %v4795_v61, 4 }
 0xcf2   :  { %6347 = vmatpush3.bf16.msra.mxu0 %v6346_v31 }
 0xcf3   :  { %v4797_v1 = vmax.f32 %v4794_v60, %v4796_v62  ;;  %v4803_v6 = vadd.f32 %v4796_v62, %v4794_v60  ;;  %v4811_v57 = vmax.f32 %v4795_v61, %v4810_v63  ;;  %v4817_v2 = vadd.f32 %v4810_v63, %v4795_v61  ;;  %6348 = vmatprep.subr.bf16.mxu0 %v7008_v48 }
 0xcf5   :  { %v4798_v7 = vrot.slane %v4797_v1, 2  ;;  %v4804_v3 = vrot.slane %v4803_v6, 2  ;;  %v4812_v58 = vrot.slane %v4811_v57, 2  ;;  %v4818_v4 = vrot.slane %v4817_v2, 2 }
 0xcf6   :  { %6350 = vmatpush3.bf16.msra.mxu0 %v6349_v17 }
 0xcf7   :  { %v4799_v5 = vmax.f32 %v4797_v1, %v4798_v7  ;;  %v4813_v32 = vmax.f32 %v4811_v57, %v4812_v58  ;;  %v4805_v9 = vadd.f32 %v4804_v3, %v4803_v6  ;;  %v4819_v11 = vadd.f32 %v4818_v4, %v4817_v2  ;;  %6351 = vmatprep.subr.bf16.mxu0 %v7008_v48 }
 0xcf9   :  { %v4806_v12 = vrot.slane %v4805_v9, 1  ;;  %v4820_v33 = vrot.slane %v4819_v11, 1  ;;  %v4800_v13 = vrot.slane %v4799_v5, 1  ;;  %v4814_v41 = vrot.slane %v4813_v32, 1 }
 0xcfa   :  { %6353 = vmatpush3.bf16.msra.mxu0 %v6352_v35 }
 0xcfb   :  { %v4807_v20 = vadd.f32 %v4806_v12, %v4805_v9  ;;  %v4821_v43 = vadd.f32 %v4820_v33, %v4819_v11  ;;  %v4815_v45 = vmax.f32 %v4813_v32, %v4814_v41  ;;  %v4801_v10 = vmax.f32 %v4799_v5, %v4800_v13  ;;  %6354 = vmatprep.subr.bf16.mxu0 %v7008_v48  ;;  %v5350_v11 = vld [vmem:[%s7912_s24] ss:$0 sm:$0xff]  ;;  %s6947_s24 = scalar_lea.vmem %s5081_s1, 32 }
 0xcfc   :  { %v5351_v33 = vld [vmem:[%s7959_s7] ss:$0 sm:$0xff]  ;;  %p6948_p8 = scmp.ne.s32.totalorder %s5081_s1, %s6947_s24  ;;  %p6953_p10 = scmp.lt.s32.totalorder %s6947_s24, %s6947_s24 }
 0xcfd   :  { %v4822_v14 = vmul.f32 0.125, %v4821_v43  ;;  %v4825_v15 = vrot.slane %v4815_v45, 7  ;;  %v4809_v56 = vmul.f32 0.125, %v4807_v20  ;;  %v5352_v20 = vld [vmem:[%s7960_s22] ss:$0 sm:$0xff] }
 0xcfe   :  { %6356 = vmatpush3.bf16.msra.mxu0 %v6355_v25  ;;  %p6954_p11 = por %p6953_p10, %p6952_p9 }
 0xcff   :  { %v4826_v36 = vrot.slane %v4822_v14, 7  ;;  %v4830_v37 = vsel %vm4829_vm9, %v4801_v10, %v4825_v15 }
 0xd00   :  { %p6955_p12 = pnand %p6954_p11, %p6948_p8 }
 0xd01   :  { %v4831_v38 = vsel %vm4829_vm9, %v4809_v56, %v4826_v36 }
 0xd02   :  { %4935 = vmatprep.mubr.f32.mxu1 %v4831_v38 }
 0xd03   :  { %4936 = vmatmul.mubr.f32.vlgmr.msra.gmra.mrb[98].mxu1 %v4830_v37 }
 0xdd6   :  { %v5912_v49 = vpop.f32.mrb[98].mxu1 }
 0xdd7   :  { %v5913_v51 = vpop.f32.mrb[99].mxu1 }
 0xdd8   :  { %v5914_v52 = vadd.f32 %v5913_v51, %v5912_v49 }
 0xdda   :  { %v4938_v53 = vadd.f32 %v5914_v52, %v5349_v50 }
 0xddc   :  { %v4942_v54 = vsel %vm4941_vm10, %v4938_v53, 0.0 }
 0xddd   :  { %v4943_v55 = vrot.slane %v4942_v54, 4 }
 0xddf   :  { %v4944_v40 = vadd.f32 %v4943_v55, %v4942_v54 }
 0xde1   :  { %v4945_v59 = vrot.slane %v4944_v40, 2 }
 0xde3   :  { %v4946_v60 = vadd.f32 %v4945_v59, %v4944_v40 }
 0xde5   :  { %v4947_v61 = vrot.slane %v4946_v60, 1 }
 0xde7   :  { %v4948_v62 = vadd.f32 %v4947_v61, %v4946_v60 }
 0xde9   :  { %v4950_v63 = vmul.f32 0.5, %v4948_v62 }
 0xdeb   :  { %v4951_v1 = vsub.f32 %v4938_v53, %v4950_v63 }
 0xded   :  { %v4952_v48 = vmul.f32 %v4951_v1, %v4951_v1 }
 0xdef   :  { %v4953_v6 = vsel %vm4941_vm10, %v4952_v48, 0.0 }
 0xdf0   :  { %v4954_v57 = vrot.slane %v4953_v6, 4 }
 0xdf2   :  { %v4955_v2 = vadd.f32 %v4954_v57, %v4953_v6 }
 0xdf4   :  { %v4956_v7 = vrot.slane %v4955_v2, 2 }
 0xdf6   :  { %v4957_v3 = vadd.f32 %v4956_v7, %v4955_v2 }
 0xdf8   :  { %v4958_v58 = vrot.slane %v4957_v3, 1 }
 0xdfa   :  { %v4959_v4 = vadd.f32 %v4958_v58, %v4957_v3 }
 0xdfc   :  { %v4960_v5 = vmul.f32 0.5, %v4959_v4 }
 0xdfe   :  { %v4961_v32 = vadd.f32 1e-05, %v4960_v5 }
 0xe00   :  { %6615 = vrsqrt.f32 %v4961_v32 }
 0xe0a   :  { %v6616_v9 = vpop.eup %6615 }
 0xe0b   :  { %v4963_v12 = vmul.f32 %v6616_v9, %v4951_v1 }
 0xe0d   :  { %v4971_v13 = vmul.f32 %v5350_v11, %v4963_v12 }
 0xe0f   :  { %v4979_v41 = vadd.f32 %v5351_v33, %v4971_v13 }
 0xe11   :  { %6233 = vmatmul.mubr.f32.vlgmr.msra.gmra.mrb[122].mxu0 %v4979_v41 }
 0xee4   :  { %v5069_v43 = vpop.f32.mrb[122].mxu0 }
 0xee5   :  { %v5070_v45 = vadd.f32 %v5352_v20, %v5069_v43  ;;  %v6234_v14 = vpop.f32.mrb[123].mxu0 }
 0xee7   :  { %5073 = vst [vmem:[#allocation27] sm:$0x3] %v5070_v45 }
 0xee8   :  { %6958 = shalt.err (!%p6955_p12)
}
 0xee9   :  { %s7961_s30 = sld [smem:[#allocation52_spill]] }
 0xeef   :  { %s6959_s6 = scalar_lea.hbm %s7961_s30, 32 }
 0xef0   :  { %p6960_p13 = scmp.ne.s32.totalorder %s7961_s30, %s6959_s6  ;;  %p6963_p0 = scmp.lt.u32.totalorder %s6959_s6, %s7961_s30 }
 0xef2   :  { %p6965_p1 = pnand %p6963_p0, %p6960_p13 }
 0xef4   :  { %6968 = shalt.err (!%p6965_p1)
}
 0xef5   :  { %5083 = dma.vmem_to_hbm [thread:$0]  %s5081_s1, 32, %s7961_s30, [#allocation5]  }
 0xef6   :  { %6985 = dma.done.wait [#allocation5], 32  }
 0xef7   :  { %6986 = vsyncadd [#allocation5], 4294967264 }
 0xef8   :  { %5087 = vsyncpa [#allocation4], 1 }
 0xef9   :  { %5088 = vsyncpa [#allocation7], 1 }
 0xefa   :  { %5089 = vsyncpa [#allocation10], 1 }
 0xefb   :  { %5090 = vsyncpa [#allocation13], 1 }
 0xefc   :  { %5091 = vsyncpa [#allocation16], 1 }
 0xefd   :  { %5092 = vsyncpa [#allocation19], 1 }
 0xefe   :  { %5093 = vsyncpa [#allocation22], 1 }
 0xeff   :  { %5094 = vsyncpa [#allocation25], 1 }
 0xf00   :  { %5095 = vsyncpa [#allocation5], 1 }

</bundles_post_ra>
